<compile_context>
chip_gen: v7x
topology: tpu7x:2x2x1
jax: 0.10.0
libtpu: 0.0.40
codegen_flags: <defaults>
</compile_context>

<pallas_src>
import functools

import jax
import jax.numpy as jnp
from jax import lax
from jax.experimental import pallas as pl
from jax.experimental.pallas import tpu as pltpu


COMPUTE_DTYPE = jnp.bfloat16          # matmul operands / activations
VMEM_LIMIT = 32 * 1024 * 1024         # explicit scoped-VMEM budget (v7x-safe)
LN_EPS = 1e-5


def _pick_tile(dim, cap, align):
    """Largest tile <= cap that is `align`-aligned and divides `dim`, else full dim."""
    if dim <= cap:
        return dim
    t = (cap // align) * align
    while t >= align:
        if dim % t == 0:
            return t
        t -= align
    return dim


# ---------------------------------------------------------------------------
# Tiled linear (+ optional row-softmax epilogue).  Used for the fused QKV /
# Q / KV projections and the final output Linear+Softmax.
# ---------------------------------------------------------------------------

def _linear_kernel(x_ref, w_ref, b_ref, o_ref, acc_ref, *, activation):
    @pl.when(pl.program_id(2) == 0)
    def _():
        acc_ref[...] = jnp.zeros_like(acc_ref)

    acc_ref[...] += jnp.dot(x_ref[...], w_ref[...],
                            preferred_element_type=jnp.float32)

    @pl.when(pl.program_id(2) == pl.num_programs(2) - 1)
    def _():
        y = acc_ref[...] + b_ref[...].astype(jnp.float32)
        if activation == "softmax":
            m = jnp.max(y, axis=-1, keepdims=True)
            e = jnp.exp(y - m)
            # exact reciprocal for the final output distribution
            y = e * pl.reciprocal(jnp.sum(e, axis=-1, keepdims=True), approx=False)
        o_ref[...] = y.astype(o_ref.dtype)


def linear(x, w, b, activation=None, out_dtype=None,
           tm_cap=256, tn_cap=256, tk_cap=512):
    """x: [..., K] -> [..., N]; K-tiled MXU matmul with fp32 VMEM accumulator."""
    lead = x.shape[:-1]
    K = x.shape[-1]
    N = w.shape[1]
    x2 = x.reshape(-1, K)
    M = x2.shape[0]
    out_dtype = x.dtype if out_dtype is None else out_dtype

    tm = _pick_tile(M, tm_cap, 8)
    tk = _pick_tile(K, tk_cap, 128)
    # softmax needs the whole row in one tile
    tn = N if activation == "softmax" else _pick_tile(N, tn_cap, 128)

    out = pl.pallas_call(
        functools.partial(_linear_kernel, activation=activation),
        out_shape=jax.ShapeDtypeStruct((M, N), out_dtype),
        grid=(M // tm, N // tn, K // tk),
        in_specs=[
            pl.BlockSpec((tm, tk), lambda i, j, k: (i, k)),
            pl.BlockSpec((tk, tn), lambda i, j, k: (k, j)),
            pl.BlockSpec((1, tn), lambda i, j, k: (0, j)),
        ],
        out_specs=pl.BlockSpec((tm, tn), lambda i, j, k: (i, j)),
        scratch_shapes=[pltpu.VMEM((tm, tn), jnp.float32)],
        compiler_params=pltpu.CompilerParams(
            dimension_semantics=("parallel", "parallel", "arbitrary"),
            vmem_limit_bytes=VMEM_LIMIT),
    )(x2, w, b)
    return out.reshape(*lead, N)


# ---------------------------------------------------------------------------
# Fused: y = LayerNorm((x @ w + b) + residual)
# K is the reduction grid axis; N (= d_model) is kept whole because LayerNorm
# needs the full row.  The residual block is read from the already-resident
# (tm, N) output slab, so the projected activation never round-trips HBM.
# ---------------------------------------------------------------------------

def _linear_add_ln_kernel(x_ref, w_ref, b_ref, r_ref, g_ref, be_ref,
                          o_ref, acc_ref, *, eps):
    @pl.when(pl.program_id(1) == 0)
    def _():
        acc_ref[...] = jnp.zeros_like(acc_ref)

    acc_ref[...] += jnp.dot(x_ref[...], w_ref[...],
                            preferred_element_type=jnp.float32)

    @pl.when(pl.program_id(1) == pl.num_programs(1) - 1)
    def _():
        z = (acc_ref[...] + b_ref[...].astype(jnp.float32)
             + r_ref[...].astype(jnp.float32))
        mean = jnp.mean(z, axis=-1, keepdims=True)
        var = jnp.mean(jnp.square(z - mean), axis=-1, keepdims=True)
        zn = (z - mean) * lax.rsqrt(var + eps)
        o_ref[...] = (zn * g_ref[...].astype(jnp.float32)
                      + be_ref[...].astype(jnp.float32)).astype(o_ref.dtype)


def linear_add_ln(x, w, b, residual, gamma, beta, eps=LN_EPS,
                  out_dtype=None, tm_cap=256, tk_cap=512):
    lead = x.shape[:-1]
    K = x.shape[-1]
    N = w.shape[1]
    x2 = x.reshape(-1, K)
    r2 = residual.reshape(-1, N)
    M = x2.shape[0]
    out_dtype = residual.dtype if out_dtype is None else out_dtype

    tm = _pick_tile(M, tm_cap, 8)
    tk = _pick_tile(K, tk_cap, 128)

    out = pl.pallas_call(
        functools.partial(_linear_add_ln_kernel, eps=eps),
        out_shape=jax.ShapeDtypeStruct((M, N), out_dtype),
        grid=(M // tm, K // tk),
        in_specs=[
            pl.BlockSpec((tm, tk), lambda i, k: (i, k)),
            pl.BlockSpec((tk, N), lambda i, k: (k, 0)),
            pl.BlockSpec((1, N), lambda i, k: (0, 0)),
            pl.BlockSpec((tm, N), lambda i, k: (i, 0)),
            pl.BlockSpec((1, N), lambda i, k: (0, 0)),
            pl.BlockSpec((1, N), lambda i, k: (0, 0)),
        ],
        out_specs=pl.BlockSpec((tm, N), lambda i, k: (i, 0)),
        scratch_shapes=[pltpu.VMEM((tm, N), jnp.float32)],
        compiler_params=pltpu.CompilerParams(
            dimension_semantics=("parallel", "arbitrary"),
            vmem_limit_bytes=VMEM_LIMIT),
    )(x2, w, b, r2, gamma, beta)
    return out.reshape(*lead, N)


# ---------------------------------------------------------------------------
# Fused feed-forward + residual + LayerNorm:
#   y = LayerNorm(x + relu(x @ w1 + b1) @ w2 + b2)
# The [tm, tf] hidden tile stays in VMEM; d_ff is the reduction grid axis and
# the residual is the already-resident x block (indexed (i, 0) at every step).
# ---------------------------------------------------------------------------

def _ffn_add_ln_kernel(x_ref, w1_ref, b1_ref, w2_ref, b2_ref, g_ref, be_ref,
                       o_ref, acc_ref, *, eps):
    @pl.when(pl.program_id(1) == 0)
    def _():
        acc_ref[...] = jnp.zeros_like(acc_ref)

    h = jnp.dot(x_ref[...], w1_ref[...], preferred_element_type=jnp.float32)
    h = jnp.maximum(h + b1_ref[...].astype(jnp.float32), 0.0)
    acc_ref[...] += jnp.dot(h.astype(w2_ref.dtype), w2_ref[...],
                            preferred_element_type=jnp.float32)

    @pl.when(pl.program_id(1) == pl.num_programs(1) - 1)
    def _():
        z = (acc_ref[...] + b2_ref[...].astype(jnp.float32)
             + x_ref[...].astype(jnp.float32))
        mean = jnp.mean(z, axis=-1, keepdims=True)
        var = jnp.mean(jnp.square(z - mean), axis=-1, keepdims=True)
        zn = (z - mean) * lax.rsqrt(var + eps)
        o_ref[...] = (zn * g_ref[...].astype(jnp.float32)
                      + be_ref[...].astype(jnp.float32)).astype(o_ref.dtype)


def ffn_add_ln(x, w1, b1, w2, b2, gamma, beta, eps=LN_EPS,
               out_dtype=None, tm_cap=256, tf_cap=512):
    lead = x.shape[:-1]
    D = x.shape[-1]
    F = w1.shape[1]
    x2 = x.reshape(-1, D)
    M = x2.shape[0]
    out_dtype = x.dtype if out_dtype is None else out_dtype

    tm = _pick_tile(M, tm_cap, 8)
    tf = _pick_tile(F, tf_cap, 128)

    out = pl.pallas_call(
        functools.partial(_ffn_add_ln_kernel, eps=eps),
        out_shape=jax.ShapeDtypeStruct((M, D), out_dtype),
        grid=(M // tm, F // tf),
        in_specs=[
            pl.BlockSpec((tm, D), lambda i, f: (i, 0)),
            pl.BlockSpec((D, tf), lambda i, f: (0, f)),
            pl.BlockSpec((1, tf), lambda i, f: (0, f)),
            pl.BlockSpec((tf, D), lambda i, f: (f, 0)),
            pl.BlockSpec((1, D), lambda i, f: (0, 0)),
            pl.BlockSpec((1, D), lambda i, f: (0, 0)),
            pl.BlockSpec((1, D), lambda i, f: (0, 0)),
        ],
        out_specs=pl.BlockSpec((tm, D), lambda i, f: (i, 0)),
        scratch_shapes=[pltpu.VMEM((tm, D), jnp.float32)],
        compiler_params=pltpu.CompilerParams(
            dimension_semantics=("parallel", "arbitrary"),
            vmem_limit_bytes=VMEM_LIMIT),
    )(x2, w1, b1, w2, b2, gamma, beta)
    return out.reshape(*lead, D)


# ---------------------------------------------------------------------------
# Multi-head attention core: one grid step per batch element, all heads
# in-kernel.  Head slicing is done on the VMEM tile (static lane slices) so no
# XLA split/merge-head transposes (and no extra HBM round trips) are needed.
# Returns the concatenated per-head context; the output projection is fused
# with the residual add + LayerNorm (linear_add_ln) by the caller.
# ---------------------------------------------------------------------------

def _mha_kernel(q_ref, k_ref, v_ref, o_ref, *, n_heads, d_head, scale, causal):
    q = q_ref[0]          # [Sq, D]
    k = k_ref[0]          # [Sk, D]
    v = v_ref[0]          # [Sk, D]
    sq = q.shape[0]
    sk = k.shape[0]

    if causal:
        row = lax.broadcasted_iota(jnp.int32, (sq, sk), 0)
        col = lax.broadcasted_iota(jnp.int32, (sq, sk), 1)
        bias = jnp.where(col <= row, 0.0, -1e30).astype(jnp.float32)

    # q @ k^T via dot_general contracting d_head of BOTH operands (no .T relayout)
    dn = (((1,), (1,)), ((), ()))
    for h in range(n_heads):
        lo = h * d_head
        hi = lo + d_head
        qh = q[:, lo:hi]
        kh = k[:, lo:hi]
        vh = v[:, lo:hi]
        s = lax.dot_general(qh, kh, dn, preferred_element_type=jnp.float32) * scale
        if causal:
            s = s + bias
        m = jnp.max(s, axis=-1, keepdims=True)
        p = jnp.exp(s - m)
        p = p * pl.reciprocal(jnp.sum(p, axis=-1, keepdims=True), approx=True)
        oh = jnp.dot(p.astype(vh.dtype), vh, preferred_element_type=jnp.float32)
        o_ref[0, :, lo:hi] = oh.astype(o_ref.dtype)
    # TODO(synk): for long sequences (Sk >~ 512) switch this to an online-softmax
    # (flash) form with a K/V tile loop + accumulator scratch to bound VMEM.


def multi_head_attention(q, k, v, n_heads, causal):
    """Scaled dot-product attention over heads; returns [B, Sq, D] (pre-projection)."""
    B, Sq, D = q.shape
    Sk = k.shape[1]
    assert D % n_heads == 0, "d_model must be divisible by n_heads"
    d_head = D // n_heads
    scale = 1.0 / float(d_head) ** 0.5

    return pl.pallas_call(
        functools.partial(_mha_kernel, n_heads=n_heads, d_head=d_head,
                          scale=scale, causal=causal),
        out_shape=jax.ShapeDtypeStruct((B, Sq, D), q.dtype),
        grid=(B,),
        in_specs=[
            pl.BlockSpec((1, Sq, D), lambda b: (b, 0, 0)),
            pl.BlockSpec((1, Sk, D), lambda b: (b, 0, 0)),
            pl.BlockSpec((1, Sk, D), lambda b: (b, 0, 0)),
        ],
        out_specs=pl.BlockSpec((1, Sq, D), lambda b: (b, 0, 0)),
        compiler_params=pltpu.CompilerParams(
            dimension_semantics=("parallel",),
            vmem_limit_bytes=VMEM_LIMIT),
    )(q, k, v)


# ---------------------------------------------------------------------------
# Model glue (plain JAX around the Pallas kernels)
# ---------------------------------------------------------------------------

def encoder_unit_forward(x, p, n_heads):
    d = x.shape[-1]
    qkv = linear(x, p["w_qkv"], p["b_qkv"])              # fused Q/K/V projection
    q, k, v = qkv[..., :d], qkv[..., d:2 * d], qkv[..., 2 * d:]
    att = multi_head_attention(q, k, v, n_heads, causal=False)
    # output projection + residual + LayerNorm fused
    y = linear_add_ln(att, p["wo"], p["bo"], x, p["ln_g"], p["ln_b"])
    # FFN + residual + LayerNorm fused
    y = ffn_add_ln(y, p["w1"], p["b1"], p["w2"], p["b2"], p["ln_g"], p["ln_b"])
    return y


def decoder_unit_forward(x, memory, p, n_heads):
    d = x.shape[-1]
    # masked self-attention
    qkv = linear(x, p["w_qkv"], p["b_qkv"])
    q, k, v = qkv[..., :d], qkv[..., d:2 * d], qkv[..., 2 * d:]
    att = multi_head_attention(q, k, v, n_heads, causal=True)
    y = linear_add_ln(att, p["wo_self"], p["bo_self"], x, p["ln_g"], p["ln_b"])
    # cross-attention on encoder memory (fused K/V projection)
    dq = linear(y, p["w_q"], p["b_q"])
    kv = linear(memory, p["w_kv"], p["b_kv"])
    mk, mv = kv[..., :d], kv[..., d:]
    xatt = multi_head_attention(dq, mk, mv, n_heads, causal=False)
    y = linear_add_ln(xatt, p["wo_cross"], p["bo_cross"], y, p["ln_g"], p["ln_b"])
    # feed-forward + residual + LayerNorm fused
    y = ffn_add_ln(y, p["w1"], p["b1"], p["w2"], p["b2"], p["ln_g"], p["ln_b"])
    return y


def transformer_forward(embeddings, params, n_heads):
    x_in = embeddings.astype(COMPUTE_DTYPE)
    memory = x_in
    for p in params["encoder"]:
        memory = encoder_unit_forward(memory, p, n_heads)
    x = x_in
    for p in params["decoder"]:
        x = decoder_unit_forward(x, memory, p, n_heads)
    # final Linear + Softmax(dim=-1) fused into one Pallas kernel; fp32 output
    return linear(x, params["w_out"], params["b_out"],
                  activation="softmax", out_dtype=jnp.float32)


# ---------------------------------------------------------------------------
# Deterministic parameter initialization (PyTorch nn.Linear-style uniform)
# ---------------------------------------------------------------------------

def _init_linear(key, d_in, d_out, dtype):
    kw, kb = jax.random.split(key)
    lim = 1.0 / (d_in ** 0.5)
    w = jax.random.uniform(kw, (d_in, d_out), jnp.float32, -lim, lim).astype(dtype)
    b = jax.random.uniform(kb, (1, d_out), jnp.float32, -lim, lim).astype(dtype)
    return w, b


def init_params(key, n_encoder, n_decoder, d_model, d_output, d_ff,
                dtype=COMPUTE_DTYPE):
    params = {"encoder": [], "decoder": []}
    for _ in range(n_encoder):
        keys = jax.random.split(key, 6)
        key = keys[0]
        p = {}
        p["w_qkv"], p["b_qkv"] = _init_linear(keys[1], d_model, 3 * d_model, dtype)
        p["wo"], p["bo"] = _init_linear(keys[2], d_model, d_model, dtype)
        p["w1"], p["b1"] = _init_linear(keys[3], d_model, d_ff, dtype)
        p["w2"], p["b2"] = _init_linear(keys[4], d_ff, d_model, dtype)
        # one shared LayerNorm per unit, matching the reference module
        p["ln_g"] = jnp.ones((1, d_model), dtype)
        p["ln_b"] = jnp.zeros((1, d_model), dtype)
        params["encoder"].append(p)
    for _ in range(n_decoder):
        keys = jax.random.split(key, 9)
        key = keys[0]
        p = {}
        p["w_qkv"], p["b_qkv"] = _init_linear(keys[1], d_model, 3 * d_model, dtype)
        p["wo_self"], p["bo_self"] = _init_linear(keys[2], d_model, d_model, dtype)
        p["w_q"], p["b_q"] = _init_linear(keys[3], d_model, d_model, dtype)
        p["w_kv"], p["b_kv"] = _init_linear(keys[4], d_model, 2 * d_model, dtype)
        p["wo_cross"], p["bo_cross"] = _init_linear(keys[5], d_model, d_model, dtype)
        p["w1"], p["b1"] = _init_linear(keys[6], d_model, d_ff, dtype)
        p["w2"], p["b2"] = _init_linear(keys[7], d_ff, d_model, dtype)
        p["ln_g"] = jnp.ones((1, d_model), dtype)
        p["ln_b"] = jnp.zeros((1, d_model), dtype)
        params["decoder"].append(p)
    key, k_out = jax.random.split(key)
    params["w_out"], params["b_out"] = _init_linear(k_out, d_model, d_output, dtype)
    return params


# ---------------------------------------------------------------------------

if __name__ == "__main__":
    # Small, module-consistent config.
    B, S = 2, 8
    d_model = 32
    d_output = 32
    n_heads = 8          # default multi_head in encoder/decoder units
    d_ff = 128           # FeedForwardNetwork hidden (scaled down from 2048)
    n_encoder = 2
    n_decoder = 2

    key = jax.random.PRNGKey(0)
    key, k_x = jax.random.split(key)
    embeddings = jax.random.normal(k_x, (B, S, d_model), jnp.float32)

    params = init_params(key, n_encoder, n_decoder, d_model, d_output, d_ff)

    fwd = jax.jit(functools.partial(transformer_forward, n_heads=n_heads))
    out = fwd(embeddings, params)
    out = jax.block_until_ready(out)

    assert out.shape == (B, S, d_output)
    # final softmax rows must sum to 1 (softmax computed in fp32 in-kernel)
    row_sums = jnp.sum(out, axis=-1)
    assert bool(jnp.allclose(row_sums, 1.0, atol=1e-3)), row_sums

    print("KERNEL_OK")
</pallas_src>

<mosaic_0001>
module attributes {stable_mosaic.version = 11 : i64} {
  func.func @_linear_kernel(%arg0: i32, %arg1: i32, %arg2: i32, %arg3: memref<16x32xbf16, #tpu.memory_space<vmem>>, %arg4: memref<32x96xbf16, #tpu.memory_space<vmem>>, %arg5: memref<1x96xbf16, #tpu.memory_space<vmem>>, %arg6: memref<16x96xbf16, #tpu.memory_space<vmem>>, %arg7: memref<16x96xf32, #tpu.memory_space<vmem>>) attributes {dimension_semantics = [#tpu.dimension_semantics<parallel>, #tpu.dimension_semantics<parallel>, #tpu.dimension_semantics<arbitrary>], iteration_bounds = array<i64: 1, 1, 1>, scalar_prefetch = 0 : i64, scratch_operands = 1 : i64, tpu.core_type = #tpu.core_type<tc>, window_params = [{transform_indices = @transform_0, window_bounds = array<i64: 16, 32>}, {transform_indices = @transform_1, window_bounds = array<i64: 32, 96>}, {transform_indices = @transform_2, window_bounds = array<i64: 1, 96>}, {transform_indices = @transform_3, window_bounds = array<i64: 16, 96>}]} {
    %c0_i32 = arith.constant 0 : i32
    %0 = arith.cmpi eq, %arg2, %c0_i32 : i32
    %1 = arith.extui %0 : i1 to i32
    %c0_i32_0 = arith.constant 0 : i32
    %2 = arith.cmpi ne, %1, %c0_i32_0 : i32
    scf.if %2 {
      %cst_10 = arith.constant 0.000000e+00 : f32
      %12 = vector.broadcast %cst_10 : f32 to vector<16x96xf32>
      %c0_11 = arith.constant 0 : index
      %c0_12 = arith.constant 0 : index
      %13 = vector.load %arg7[%c0_11, %c0_12] : memref<16x96xf32, #tpu.memory_space<vmem>>, vector<16x96xf32>
      tpu.vector_store %arg7[%c0_11, %c0_12], %12 {strides = array<i32>} : memref<16x96xf32, #tpu.memory_space<vmem>>, vector<16x96xf32>,
    } else {
    }
    %c0 = arith.constant 0 : index
    %c0_1 = arith.constant 0 : index
    %3 = vector.load %arg7[%c0, %c0_1] : memref<16x96xf32, #tpu.memory_space<vmem>>, vector<16x96xf32>
    %c0_2 = arith.constant 0 : index
    %c0_3 = arith.constant 0 : index
    %4 = vector.load %arg3[%c0_2, %c0_3] : memref<16x32xbf16, #tpu.memory_space<vmem>>, vector<16x32xbf16>
    %c0_4 = arith.constant 0 : index
    %c0_5 = arith.constant 0 : index
    %5 = vector.load %arg4[%c0_4, %c0_5] : memref<32x96xbf16, #tpu.memory_space<vmem>>, vector<32x96xbf16>
    %cst = arith.constant dense<0.000000e+00> : vector<16x96xf32>
    %6 = tpu.matmul %4, %5, %cst {dimension_numbers = #tpu.dot_dimension_numbers<[1], [0], [0], [1], [0, 0, 1, 1], [], []>} : vector<16x32xbf16>, vector<32x96xbf16>, vector<16x96xf32> -> vector<16x96xf32>
    %7 = arith.addf %3, %6 : vector<16x96xf32>
    %c0_6 = arith.constant 0 : index
    %c0_7 = arith.constant 0 : index
    %8 = vector.load %arg7[%c0_6, %c0_7] : memref<16x96xf32, #tpu.memory_space<vmem>>, vector<16x96xf32>
    tpu.vector_store %arg7[%c0_6, %c0_7], %7 {strides = array<i32>} : memref<16x96xf32, #tpu.memory_space<vmem>>, vector<16x96xf32>,
    %c0_i32_8 = arith.constant 0 : i32
    %9 = arith.cmpi eq, %arg2, %c0_i32_8 : i32
    %10 = arith.extui %9 : i1 to i32
    %c0_i32_9 = arith.constant 0 : i32
    %11 = arith.cmpi ne, %10, %c0_i32_9 : i32
    scf.if %11 {
      %c0_10 = arith.constant 0 : index
      %c0_11 = arith.constant 0 : index
      %12 = vector.load %arg7[%c0_10, %c0_11] : memref<16x96xf32, #tpu.memory_space<vmem>>, vector<16x96xf32>
      %c0_12 = arith.constant 0 : index
      %c0_13 = arith.constant 0 : index
      %13 = vector.load %arg5[%c0_12, %c0_13] : memref<1x96xbf16, #tpu.memory_space<vmem>>, vector<1x96xbf16>
      %14 = arith.extf %13 : vector<1x96xbf16> to vector<1x96xf32>
      %15 = vector.broadcast %14 : vector<1x96xf32> to vector<16x96xf32>
      %16 = arith.addf %12, %15 : vector<16x96xf32>
      %17 = arith.truncf %16 : vector<16x96xf32> to vector<16x96xbf16>
      %c0_14 = arith.constant 0 : index
      %c0_15 = arith.constant 0 : index
      %18 = vector.load %arg6[%c0_14, %c0_15] : memref<16x96xbf16, #tpu.memory_space<vmem>>, vector<16x96xbf16>
      tpu.vector_store %arg6[%c0_14, %c0_15], %17 {strides = array<i32>} : memref<16x96xbf16, #tpu.memory_space<vmem>>, vector<16x96xbf16>,
    } else {
    }
    return
  }
  func.func @transform_0(%arg0: i32, %arg1: i32, %arg2: i32) -> (i32, i32) {
    %c0_i32 = arith.constant 0 : i32
    return %arg0, %arg2 : i32, i32
  }
  func.func @transform_1(%arg0: i32, %arg1: i32, %arg2: i32) -> (i32, i32) {
    %c0_i32 = arith.constant 0 : i32
    return %arg2, %arg1 : i32, i32
  }
  func.func @transform_2(%arg0: i32, %arg1: i32, %arg2: i32) -> (i32, i32) {
    %c0_i32 = arith.constant 0 : i32
    %c0_i32_0 = arith.constant 0 : i32
    return %c0_i32, %arg1 : i32, i32
  }
  func.func @transform_3(%arg0: i32, %arg1: i32, %arg2: i32) -> (i32, i32) {
    %c0_i32 = arith.constant 0 : i32
    return %arg0, %arg1 : i32, i32
  }
}

module attributes {stable_mosaic.version = 11 : i64} {
  func.func @_mha_kernel(%arg0: i32, %arg1: memref<1x8x32xbf16, #tpu.memory_space<vmem>>, %arg2: memref<1x8x32xbf16, #tpu.memory_space<vmem>>, %arg3: memref<1x8x32xbf16, #tpu.memory_space<vmem>>, %arg4: memref<1x8x32xbf16, #tpu.memory_space<vmem>>) attributes {dimension_semantics = [#tpu.dimension_semantics<parallel>], iteration_bounds = array<i64: 2>, scalar_prefetch = 0 : i64, scratch_operands = 0 : i64, tpu.core_type = #tpu.core_type<tc>, window_params = [{transform_indices = @transform_0, window_bounds = array<i64: 1, 8, 32>}, {transform_indices = @transform_1, window_bounds = array<i64: 1, 8, 32>}, {transform_indices = @transform_2, window_bounds = array<i64: 1, 8, 32>}, {transform_indices = @transform_3, window_bounds = array<i64: 1, 8, 32>}]} {
    %c0 = arith.constant 0 : index
    %c0_0 = arith.constant 0 : index
    %c0_1 = arith.constant 0 : index
    %0 = vector.load %arg1[%c0, %c0_0, %c0_1] : memref<1x8x32xbf16, #tpu.memory_space<vmem>>, vector<1x8x32xbf16>
    %1 = vector.shape_cast %0 : vector<1x8x32xbf16> to vector<8x32xbf16>
    %c0_2 = arith.constant 0 : index
    %c0_3 = arith.constant 0 : index
    %c0_4 = arith.constant 0 : index
    %2 = vector.load %arg2[%c0_2, %c0_3, %c0_4] : memref<1x8x32xbf16, #tpu.memory_space<vmem>>, vector<1x8x32xbf16>
    %3 = vector.shape_cast %2 : vector<1x8x32xbf16> to vector<8x32xbf16>
    %c0_5 = arith.constant 0 : index
    %c0_6 = arith.constant 0 : index
    %c0_7 = arith.constant 0 : index
    %4 = vector.load %arg3[%c0_5, %c0_6, %c0_7] : memref<1x8x32xbf16, #tpu.memory_space<vmem>>, vector<1x8x32xbf16>
    %5 = vector.shape_cast %4 : vector<1x8x32xbf16> to vector<8x32xbf16>
    %6 = vector.extract_strided_slice %1 {offsets = [0, 0], sizes = [8, 4], strides = [1, 1]} : vector<8x32xbf16> to vector<8x4xbf16>
    %7 = vector.extract_strided_slice %3 {offsets = [0, 0], sizes = [8, 4], strides = [1, 1]} : vector<8x32xbf16> to vector<8x4xbf16>
    %8 = vector.extract_strided_slice %5 {offsets = [0, 0], sizes = [8, 4], strides = [1, 1]} : vector<8x32xbf16> to vector<8x4xbf16>
    %cst = arith.constant dense<0.000000e+00> : vector<8x8xf32>
    %9 = tpu.matmul %6, %7, %cst {dimension_numbers = #tpu.dot_dimension_numbers<[1], [1], [0], [0], [0, 0, 1, 0], [], []>} : vector<8x4xbf16>, vector<8x4xbf16>, vector<8x8xf32> -> vector<8x8xf32>
    %cst_8 = arith.constant 5.000000e-01 : f32
    %10 = vector.broadcast %cst_8 : f32 to vector<8x8xf32>
    %11 = arith.mulf %9, %10 : vector<8x8xf32>
    %cst_9 = arith.constant dense<0xFF800000> : vector<8xf32>
    %12 = vector.multi_reduction <maximumf>, %11, %cst_9 [1] : vector<8x8xf32> to vector<8xf32>
    %13 = vector.shape_cast %12 : vector<8xf32> to vector<8x1xf32>
    %14 = vector.broadcast %13 : vector<8x1xf32> to vector<8x8xf32>
    %15 = arith.subf %11, %14 : vector<8x8xf32>
    %16 = math.exp %15 : vector<8x8xf32>
    %cst_10 = arith.constant dense<0.000000e+00> : vector<8xf32>
    %17 = vector.multi_reduction <add>, %16, %cst_10 [1] : vector<8x8xf32> to vector<8xf32>
    %18 = vector.shape_cast %17 : vector<8xf32> to vector<8x1xf32>
    %19 = tpu.reciprocal %18 {approx = true} : vector<8x1xf32> -> vector<8x1xf32>
    %20 = vector.broadcast %19 : vector<8x1xf32> to vector<8x8xf32>
    %21 = arith.mulf %16, %20 : vector<8x8xf32>
    %22 = arith.truncf %21 : vector<8x8xf32> to vector<8x8xbf16>
    %cst_11 = arith.constant dense<0.000000e+00> : vector<8x4xf32>
    %23 = tpu.matmul %22, %8, %cst_11 {dimension_numbers = #tpu.dot_dimension_numbers<[1], [0], [0], [1], [0, 0, 1, 1], [], []>} : vector<8x8xbf16>, vector<8x4xbf16>, vector<8x4xf32> -> vector<8x4xf32>
    %24 = arith.truncf %23 : vector<8x4xf32> to vector<8x4xbf16>
    %c0_12 = arith.constant 0 : index
    %c0_13 = arith.constant 0 : index
    %c0_14 = arith.constant 0 : index
    %25 = vector.load %arg4[%c0_12, %c0_13, %c0_14] : memref<1x8x32xbf16, #tpu.memory_space<vmem>>, vector<1x8x4xbf16>
    %26 = vector.shape_cast %25 : vector<1x8x4xbf16> to vector<8x4xbf16>
    %27 = vector.shape_cast %24 : vector<8x4xbf16> to vector<1x8x4xbf16>
    tpu.vector_store %arg4[%c0_12, %c0_13, %c0_14], %27 {strides = array<i32>} : memref<1x8x32xbf16, #tpu.memory_space<vmem>>, vector<1x8x4xbf16>,
    %28 = vector.extract_strided_slice %1 {offsets = [0, 4], sizes = [8, 4], strides = [1, 1]} : vector<8x32xbf16> to vector<8x4xbf16>
    %29 = vector.extract_strided_slice %3 {offsets = [0, 4], sizes = [8, 4], strides = [1, 1]} : vector<8x32xbf16> to vector<8x4xbf16>
    %30 = vector.extract_strided_slice %5 {offsets = [0, 4], sizes = [8, 4], strides = [1, 1]} : vector<8x32xbf16> to vector<8x4xbf16>
    %cst_15 = arith.constant dense<0.000000e+00> : vector<8x8xf32>
    %31 = tpu.matmul %28, %29, %cst_15 {dimension_numbers = #tpu.dot_dimension_numbers<[1], [1], [0], [0], [0, 0, 1, 0], [], []>} : vector<8x4xbf16>, vector<8x4xbf16>, vector<8x8xf32> -> vector<8x8xf32>
    %cst_16 = arith.constant 5.000000e-01 : f32
    %32 = vector.broadcast %cst_16 : f32 to vector<8x8xf32>
    %33 = arith.mulf %31, %32 : vector<8x8xf32>
    %cst_17 = arith.constant dense<0xFF800000> : vector<8xf32>
    %34 = vector.multi_reduction <maximumf>, %33, %cst_17 [1] : vector<8x8xf32> to vector<8xf32>
    %35 = vector.shape_cast %34 : vector<8xf32> to vector<8x1xf32>
    %36 = vector.broadcast %35 : vector<8x1xf32> to vector<8x8xf32>
    %37 = arith.subf %33, %36 : vector<8x8xf32>
    %38 = math.exp %37 : vector<8x8xf32>
    %cst_18 = arith.constant dense<0.000000e+00> : vector<8xf32>
    %39 = vector.multi_reduction <add>, %38, %cst_18 [1] : vector<8x8xf32> to vector<8xf32>
    %40 = vector.shape_cast %39 : vector<8xf32> to vector<8x1xf32>
    %41 = tpu.reciprocal %40 {approx = true} : vector<8x1xf32> -> vector<8x1xf32>
    %42 = vector.broadcast %41 : vector<8x1xf32> to vector<8x8xf32>
    %43 = arith.mulf %38, %42 : vector<8x8xf32>
    %44 = arith.truncf %43 : vector<8x8xf32> to vector<8x8xbf16>
    %cst_19 = arith.constant dense<0.000000e+00> : vector<8x4xf32>
    %45 = tpu.matmul %44, %30, %cst_19 {dimension_numbers = #tpu.dot_dimension_numbers<[1], [0], [0], [1], [0, 0, 1, 1], [], []>} : vector<8x8xbf16>, vector<8x4xbf16>, vector<8x4xf32> -> vector<8x4xf32>
    %46 = arith.truncf %45 : vector<8x4xf32> to vector<8x4xbf16>
    %c0_20 = arith.constant 0 : index
    %c0_21 = arith.constant 0 : index
    %c4 = arith.constant 4 : index
    %47 = vector.load %arg4[%c0_20, %c0_21, %c4] : memref<1x8x32xbf16, #tpu.memory_space<vmem>>, vector<1x8x4xbf16>
    %48 = vector.shape_cast %47 : vector<1x8x4xbf16> to vector<8x4xbf16>
    %49 = vector.shape_cast %46 : vector<8x4xbf16> to vector<1x8x4xbf16>
    tpu.vector_store %arg4[%c0_20, %c0_21, %c4], %49 {strides = array<i32>} : memref<1x8x32xbf16, #tpu.memory_space<vmem>>, vector<1x8x4xbf16>,
    %50 = vector.extract_strided_slice %1 {offsets = [0, 8], sizes = [8, 4], strides = [1, 1]} : vector<8x32xbf16> to vector<8x4xbf16>
    %51 = vector.extract_strided_slice %3 {offsets = [0, 8], sizes = [8, 4], strides = [1, 1]} : vector<8x32xbf16> to vector<8x4xbf16>
    %52 = vector.extract_strided_slice %5 {offsets = [0, 8], sizes = [8, 4], strides = [1, 1]} : vector<8x32xbf16> to vector<8x4xbf16>
    %cst_22 = arith.constant dense<0.000000e+00> : vector<8x8xf32>
    %53 = tpu.matmul %50, %51, %cst_22 {dimension_numbers = #tpu.dot_dimension_numbers<[1], [1], [0], [0], [0, 0, 1, 0], [], []>} : vector<8x4xbf16>, vector<8x4xbf16>, vector<8x8xf32> -> vector<8x8xf32>
    %cst_23 = arith.constant 5.000000e-01 : f32
    %54 = vector.broadcast %cst_23 : f32 to vector<8x8xf32>
    %55 = arith.mulf %53, %54 : vector<8x8xf32>
    %cst_24 = arith.constant dense<0xFF800000> : vector<8xf32>
    %56 = vector.multi_reduction <maximumf>, %55, %cst_24 [1] : vector<8x8xf32> to vector<8xf32>
    %57 = vector.shape_cast %56 : vector<8xf32> to vector<8x1xf32>
    %58 = vector.broadcast %57 : vector<8x1xf32> to vector<8x8xf32>
    %59 = arith.subf %55, %58 : vector<8x8xf32>
    %60 = math.exp %59 : vector<8x8xf32>
    %cst_25 = arith.constant dense<0.000000e+00> : vector<8xf32>
    %61 = vector.multi_reduction <add>, %60, %cst_25 [1] : vector<8x8xf32> to vector<8xf32>
    %62 = vector.shape_cast %61 : vector<8xf32> to vector<8x1xf32>
    %63 = tpu.reciprocal %62 {approx = true} : vector<8x1xf32> -> vector<8x1xf32>
    %64 = vector.broadcast %63 : vector<8x1xf32> to vector<8x8xf32>
    %65 = arith.mulf %60, %64 : vector<8x8xf32>
    %66 = arith.truncf %65 : vector<8x8xf32> to vector<8x8xbf16>
    %cst_26 = arith.constant dense<0.000000e+00> : vector<8x4xf32>
    %67 = tpu.matmul %66, %52, %cst_26 {dimension_numbers = #tpu.dot_dimension_numbers<[1], [0], [0], [1], [0, 0, 1, 1], [], []>} : vector<8x8xbf16>, vector<8x4xbf16>, vector<8x4xf32> -> vector<8x4xf32>
    %68 = arith.truncf %67 : vector<8x4xf32> to vector<8x4xbf16>
    %c0_27 = arith.constant 0 : index
    %c0_28 = arith.constant 0 : index
    %c8 = arith.constant 8 : index
    %69 = vector.load %arg4[%c0_27, %c0_28, %c8] : memref<1x8x32xbf16, #tpu.memory_space<vmem>>, vector<1x8x4xbf16>
    %70 = vector.shape_cast %69 : vector<1x8x4xbf16> to vector<8x4xbf16>
    %71 = vector.shape_cast %68 : vector<8x4xbf16> to vector<1x8x4xbf16>
    tpu.vector_store %arg4[%c0_27, %c0_28, %c8], %71 {strides = array<i32>} : memref<1x8x32xbf16, #tpu.memory_space<vmem>>, vector<1x8x4xbf16>,
    %72 = vector.extract_strided_slice %1 {offsets = [0, 12], sizes = [8, 4], strides = [1, 1]} : vector<8x32xbf16> to vector<8x4xbf16>
    %73 = vector.extract_strided_slice %3 {offsets = [0, 12], sizes = [8, 4], strides = [1, 1]} : vector<8x32xbf16> to vector<8x4xbf16>
    %74 = vector.extract_strided_slice %5 {offsets = [0, 12], sizes = [8, 4], strides = [1, 1]} : vector<8x32xbf16> to vector<8x4xbf16>
    %cst_29 = arith.constant dense<0.000000e+00> : vector<8x8xf32>
    %75 = tpu.matmul %72, %73, %cst_29 {dimension_numbers = #tpu.dot_dimension_numbers<[1], [1], [0], [0], [0, 0, 1, 0], [], []>} : vector<8x4xbf16>, vector<8x4xbf16>, vector<8x8xf32> -> vector<8x8xf32>
    %cst_30 = arith.constant 5.000000e-01 : f32
    %76 = vector.broadcast %cst_30 : f32 to vector<8x8xf32>
    %77 = arith.mulf %75, %76 : vector<8x8xf32>
    %cst_31 = arith.constant dense<0xFF800000> : vector<8xf32>
    %78 = vector.multi_reduction <maximumf>, %77, %cst_31 [1] : vector<8x8xf32> to vector<8xf32>
    %79 = vector.shape_cast %78 : vector<8xf32> to vector<8x1xf32>
    %80 = vector.broadcast %79 : vector<8x1xf32> to vector<8x8xf32>
    %81 = arith.subf %77, %80 : vector<8x8xf32>
    %82 = math.exp %81 : vector<8x8xf32>
    %cst_32 = arith.constant dense<0.000000e+00> : vector<8xf32>
    %83 = vector.multi_reduction <add>, %82, %cst_32 [1] : vector<8x8xf32> to vector<8xf32>
    %84 = vector.shape_cast %83 : vector<8xf32> to vector<8x1xf32>
    %85 = tpu.reciprocal %84 {approx = true} : vector<8x1xf32> -> vector<8x1xf32>
    %86 = vector.broadcast %85 : vector<8x1xf32> to vector<8x8xf32>
    %87 = arith.mulf %82, %86 : vector<8x8xf32>
    %88 = arith.truncf %87 : vector<8x8xf32> to vector<8x8xbf16>
    %cst_33 = arith.constant dense<0.000000e+00> : vector<8x4xf32>
    %89 = tpu.matmul %88, %74, %cst_33 {dimension_numbers = #tpu.dot_dimension_numbers<[1], [0], [0], [1], [0, 0, 1, 1], [], []>} : vector<8x8xbf16>, vector<8x4xbf16>, vector<8x4xf32> -> vector<8x4xf32>
    %90 = arith.truncf %89 : vector<8x4xf32> to vector<8x4xbf16>
    %c0_34 = arith.constant 0 : index
    %c0_35 = arith.constant 0 : index
    %c12 = arith.constant 12 : index
    %91 = vector.load %arg4[%c0_34, %c0_35, %c12] : memref<1x8x32xbf16, #tpu.memory_space<vmem>>, vector<1x8x4xbf16>
    %92 = vector.shape_cast %91 : vector<1x8x4xbf16> to vector<8x4xbf16>
    %93 = vector.shape_cast %90 : vector<8x4xbf16> to vector<1x8x4xbf16>
    tpu.vector_store %arg4[%c0_34, %c0_35, %c12], %93 {strides = array<i32>} : memref<1x8x32xbf16, #tpu.memory_space<vmem>>, vector<1x8x4xbf16>,
    %94 = vector.extract_strided_slice %1 {offsets = [0, 16], sizes = [8, 4], strides = [1, 1]} : vector<8x32xbf16> to vector<8x4xbf16>
    %95 = vector.extract_strided_slice %3 {offsets = [0, 16], sizes = [8, 4], strides = [1, 1]} : vector<8x32xbf16> to vector<8x4xbf16>
    %96 = vector.extract_strided_slice %5 {offsets = [0, 16], sizes = [8, 4], strides = [1, 1]} : vector<8x32xbf16> to vector<8x4xbf16>
    %cst_36 = arith.constant dense<0.000000e+00> : vector<8x8xf32>
    %97 = tpu.matmul %94, %95, %cst_36 {dimension_numbers = #tpu.dot_dimension_numbers<[1], [1], [0], [0], [0, 0, 1, 0], [], []>} : vector<8x4xbf16>, vector<8x4xbf16>, vector<8x8xf32> -> vector<8x8xf32>
    %cst_37 = arith.constant 5.000000e-01 : f32
    %98 = vector.broadcast %cst_37 : f32 to vector<8x8xf32>
    %99 = arith.mulf %97, %98 : vector<8x8xf32>
    %cst_38 = arith.constant dense<0xFF800000> : vector<8xf32>
    %100 = vector.multi_reduction <maximumf>, %99, %cst_38 [1] : vector<8x8xf32> to vector<8xf32>
    %101 = vector.shape_cast %100 : vector<8xf32> to vector<8x1xf32>
    %102 = vector.broadcast %101 : vector<8x1xf32> to vector<8x8xf32>
    %103 = arith.subf %99, %102 : vector<8x8xf32>
    %104 = math.exp %103 : vector<8x8xf32>
    %cst_39 = arith.constant dense<0.000000e+00> : vector<8xf32>
    %105 = vector.multi_reduction <add>, %104, %cst_39 [1] : vector<8x8xf32> to vector<8xf32>
    %106 = vector.shape_cast %105 : vector<8xf32> to vector<8x1xf32>
    %107 = tpu.reciprocal %106 {approx = true} : vector<8x1xf32> -> vector<8x1xf32>
    %108 = vector.broadcast %107 : vector<8x1xf32> to vector<8x8xf32>
    %109 = arith.mulf %104, %108 : vector<8x8xf32>
    %110 = arith.truncf %109 : vector<8x8xf32> to vector<8x8xbf16>
    %cst_40 = arith.constant dense<0.000000e+00> : vector<8x4xf32>
    %111 = tpu.matmul %110, %96, %cst_40 {dimension_numbers = #tpu.dot_dimension_numbers<[1], [0], [0], [1], [0, 0, 1, 1], [], []>} : vector<8x8xbf16>, vector<8x4xbf16>, vector<8x4xf32> -> vector<8x4xf32>
    %112 = arith.truncf %111 : vector<8x4xf32> to vector<8x4xbf16>
    %c0_41 = arith.constant 0 : index
    %c0_42 = arith.constant 0 : index
    %c16 = arith.constant 16 : index
    %113 = vector.load %arg4[%c0_41, %c0_42, %c16] : memref<1x8x32xbf16, #tpu.memory_space<vmem>>, vector<1x8x4xbf16>
    %114 = vector.shape_cast %113 : vector<1x8x4xbf16> to vector<8x4xbf16>
    %115 = vector.shape_cast %112 : vector<8x4xbf16> to vector<1x8x4xbf16>
    tpu.vector_store %arg4[%c0_41, %c0_42, %c16], %115 {strides = array<i32>} : memref<1x8x32xbf16, #tpu.memory_space<vmem>>, vector<1x8x4xbf16>,
    %116 = vector.extract_strided_slice %1 {offsets = [0, 20], sizes = [8, 4], strides = [1, 1]} : vector<8x32xbf16> to vector<8x4xbf16>
    %117 = vector.extract_strided_slice %3 {offsets = [0, 20], sizes = [8, 4], strides = [1, 1]} : vector<8x32xbf16> to vector<8x4xbf16>
    %118 = vector.extract_strided_slice %5 {offsets = [0, 20], sizes = [8, 4], strides = [1, 1]} : vector<8x32xbf16> to vector<8x4xbf16>
    %cst_43 = arith.constant dense<0.000000e+00> : vector<8x8xf32>
    %119 = tpu.matmul %116, %117, %cst_43 {dimension_numbers = #tpu.dot_dimension_numbers<[1], [1], [0], [0], [0, 0, 1, 0], [], []>} : vector<8x4xbf16>, vector<8x4xbf16>, vector<8x8xf32> -> vector<8x8xf32>
    %cst_44 = arith.constant 5.000000e-01 : f32
    %120 = vector.broadcast %cst_44 : f32 to vector<8x8xf32>
    %121 = arith.mulf %119, %120 : vector<8x8xf32>
    %cst_45 = arith.constant dense<0xFF800000> : vector<8xf32>
    %122 = vector.multi_reduction <maximumf>, %121, %cst_45 [1] : vector<8x8xf32> to vector<8xf32>
    %123 = vector.shape_cast %122 : vector<8xf32> to vector<8x1xf32>
    %124 = vector.broadcast %123 : vector<8x1xf32> to vector<8x8xf32>
    %125 = arith.subf %121, %124 : vector<8x8xf32>
    %126 = math.exp %125 : vector<8x8xf32>
    %cst_46 = arith.constant dense<0.000000e+00> : vector<8xf32>
    %127 = vector.multi_reduction <add>, %126, %cst_46 [1] : vector<8x8xf32> to vector<8xf32>
    %128 = vector.shape_cast %127 : vector<8xf32> to vector<8x1xf32>
    %129 = tpu.reciprocal %128 {approx = true} : vector<8x1xf32> -> vector<8x1xf32>
    %130 = vector.broadcast %129 : vector<8x1xf32> to vector<8x8xf32>
    %131 = arith.mulf %126, %130 : vector<8x8xf32>
    %132 = arith.truncf %131 : vector<8x8xf32> to vector<8x8xbf16>
    %cst_47 = arith.constant dense<0.000000e+00> : vector<8x4xf32>
    %133 = tpu.matmul %132, %118, %cst_47 {dimension_numbers = #tpu.dot_dimension_numbers<[1], [0], [0], [1], [0, 0, 1, 1], [], []>} : vector<8x8xbf16>, vector<8x4xbf16>, vector<8x4xf32> -> vector<8x4xf32>
    %134 = arith.truncf %133 : vector<8x4xf32> to vector<8x4xbf16>
    %c0_48 = arith.constant 0 : index
    %c0_49 = arith.constant 0 : index
    %c20 = arith.constant 20 : index
    %135 = vector.load %arg4[%c0_48, %c0_49, %c20] : memref<1x8x32xbf16, #tpu.memory_space<vmem>>, vector<1x8x4xbf16>
    %136 = vector.shape_cast %135 : vector<1x8x4xbf16> to vector<8x4xbf16>
    %137 = vector.shape_cast %134 : vector<8x4xbf16> to vector<1x8x4xbf16>
    tpu.vector_store %arg4[%c0_48, %c0_49, %c20], %137 {strides = array<i32>} : memref<1x8x32xbf16, #tpu.memory_space<vmem>>, vector<1x8x4xbf16>,
    %138 = vector.extract_strided_slice %1 {offsets = [0, 24], sizes = [8, 4], strides = [1, 1]} : vector<8x32xbf16> to vector<8x4xbf16>
    %139 = vector.extract_strided_slice %3 {offsets = [0, 24], sizes = [8, 4], strides = [1, 1]} : vector<8x32xbf16> to vector<8x4xbf16>
    %140 = vector.extract_strided_slice %5 {offsets = [0, 24], sizes = [8, 4], strides = [1, 1]} : vector<8x32xbf16> to vector<8x4xbf16>
    %cst_50 = arith.constant dense<0.000000e+00> : vector<8x8xf32>
    %141 = tpu.matmul %138, %139, %cst_50 {dimension_numbers = #tpu.dot_dimension_numbers<[1], [1], [0], [0], [0, 0, 1, 0], [], []>} : vector<8x4xbf16>, vector<8x4xbf16>, vector<8x8xf32> -> vector<8x8xf32>
    %cst_51 = arith.constant 5.000000e-01 : f32
    %142 = vector.broadcast %cst_51 : f32 to vector<8x8xf32>
    %143 = arith.mulf %141, %142 : vector<8x8xf32>
    %cst_52 = arith.constant dense<0xFF800000> : vector<8xf32>
    %144 = vector.multi_reduction <maximumf>, %143, %cst_52 [1] : vector<8x8xf32> to vector<8xf32>
    %145 = vector.shape_cast %144 : vector<8xf32> to vector<8x1xf32>
    %146 = vector.broadcast %145 : vector<8x1xf32> to vector<8x8xf32>
    %147 = arith.subf %143, %146 : vector<8x8xf32>
    %148 = math.exp %147 : vector<8x8xf32>
    %cst_53 = arith.constant dense<0.000000e+00> : vector<8xf32>
    %149 = vector.multi_reduction <add>, %148, %cst_53 [1] : vector<8x8xf32> to vector<8xf32>
    %150 = vector.shape_cast %149 : vector<8xf32> to vector<8x1xf32>
    %151 = tpu.reciprocal %150 {approx = true} : vector<8x1xf32> -> vector<8x1xf32>
    %152 = vector.broadcast %151 : vector<8x1xf32> to vector<8x8xf32>
    %153 = arith.mulf %148, %152 : vector<8x8xf32>
    %154 = arith.truncf %153 : vector<8x8xf32> to vector<8x8xbf16>
    %cst_54 = arith.constant dense<0.000000e+00> : vector<8x4xf32>
    %155 = tpu.matmul %154, %140, %cst_54 {dimension_numbers = #tpu.dot_dimension_numbers<[1], [0], [0], [1], [0, 0, 1, 1], [], []>} : vector<8x8xbf16>, vector<8x4xbf16>, vector<8x4xf32> -> vector<8x4xf32>
    %156 = arith.truncf %155 : vector<8x4xf32> to vector<8x4xbf16>
    %c0_55 = arith.constant 0 : index
    %c0_56 = arith.constant 0 : index
    %c24 = arith.constant 24 : index
    %157 = vector.load %arg4[%c0_55, %c0_56, %c24] : memref<1x8x32xbf16, #tpu.memory_space<vmem>>, vector<1x8x4xbf16>
    %158 = vector.shape_cast %157 : vector<1x8x4xbf16> to vector<8x4xbf16>
    %159 = vector.shape_cast %156 : vector<8x4xbf16> to vector<1x8x4xbf16>
    tpu.vector_store %arg4[%c0_55, %c0_56, %c24], %159 {strides = array<i32>} : memref<1x8x32xbf16, #tpu.memory_space<vmem>>, vector<1x8x4xbf16>,
    %160 = vector.extract_strided_slice %1 {offsets = [0, 28], sizes = [8, 4], strides = [1, 1]} : vector<8x32xbf16> to vector<8x4xbf16>
    %161 = vector.extract_strided_slice %3 {offsets = [0, 28], sizes = [8, 4], strides = [1, 1]} : vector<8x32xbf16> to vector<8x4xbf16>
    %162 = vector.extract_strided_slice %5 {offsets = [0, 28], sizes = [8, 4], strides = [1, 1]} : vector<8x32xbf16> to vector<8x4xbf16>
    %cst_57 = arith.constant dense<0.000000e+00> : vector<8x8xf32>
    %163 = tpu.matmul %160, %161, %cst_57 {dimension_numbers = #tpu.dot_dimension_numbers<[1], [1], [0], [0], [0, 0, 1, 0], [], []>} : vector<8x4xbf16>, vector<8x4xbf16>, vector<8x8xf32> -> vector<8x8xf32>
    %cst_58 = arith.constant 5.000000e-01 : f32
    %164 = vector.broadcast %cst_58 : f32 to vector<8x8xf32>
    %165 = arith.mulf %163, %164 : vector<8x8xf32>
    %cst_59 = arith.constant dense<0xFF800000> : vector<8xf32>
    %166 = vector.multi_reduction <maximumf>, %165, %cst_59 [1] : vector<8x8xf32> to vector<8xf32>
    %167 = vector.shape_cast %166 : vector<8xf32> to vector<8x1xf32>
    %168 = vector.broadcast %167 : vector<8x1xf32> to vector<8x8xf32>
    %169 = arith.subf %165, %168 : vector<8x8xf32>
    %170 = math.exp %169 : vector<8x8xf32>
    %cst_60 = arith.constant dense<0.000000e+00> : vector<8xf32>
    %171 = vector.multi_reduction <add>, %170, %cst_60 [1] : vector<8x8xf32> to vector<8xf32>
    %172 = vector.shape_cast %171 : vector<8xf32> to vector<8x1xf32>
    %173 = tpu.reciprocal %172 {approx = true} : vector<8x1xf32> -> vector<8x1xf32>
    %174 = vector.broadcast %173 : vector<8x1xf32> to vector<8x8xf32>
    %175 = arith.mulf %170, %174 : vector<8x8xf32>
    %176 = arith.truncf %175 : vector<8x8xf32> to vector<8x8xbf16>
    %cst_61 = arith.constant dense<0.000000e+00> : vector<8x4xf32>
    %177 = tpu.matmul %176, %162, %cst_61 {dimension_numbers = #tpu.dot_dimension_numbers<[1], [0], [0], [1], [0, 0, 1, 1], [], []>} : vector<8x8xbf16>, vector<8x4xbf16>, vector<8x4xf32> -> vector<8x4xf32>
    %178 = arith.truncf %177 : vector<8x4xf32> to vector<8x4xbf16>
    %c0_62 = arith.constant 0 : index
    %c0_63 = arith.constant 0 : index
    %c28 = arith.constant 28 : index
    %179 = vector.load %arg4[%c0_62, %c0_63, %c28] : memref<1x8x32xbf16, #tpu.memory_space<vmem>>, vector<1x8x4xbf16>
    %180 = vector.shape_cast %179 : vector<1x8x4xbf16> to vector<8x4xbf16>
    %181 = vector.shape_cast %178 : vector<8x4xbf16> to vector<1x8x4xbf16>
    tpu.vector_store %arg4[%c0_62, %c0_63, %c28], %181 {strides = array<i32>} : memref<1x8x32xbf16, #tpu.memory_space<vmem>>, vector<1x8x4xbf16>,
    return
  }
  func.func @transform_0(%arg0: i32) -> (i32, i32, i32) {
    %c0_i32 = arith.constant 0 : i32
    %c0_i32_0 = arith.constant 0 : i32
    %c0_i32_1 = arith.constant 0 : i32
    return %arg0, %c0_i32, %c0_i32_0 : i32, i32, i32
  }
  func.func @transform_1(%arg0: i32) -> (i32, i32, i32) {
    %c0_i32 = arith.constant 0 : i32
    %c0_i32_0 = arith.constant 0 : i32
    %c0_i32_1 = arith.constant 0 : i32
    return %arg0, %c0_i32, %c0_i32_0 : i32, i32, i32
  }
  func.func @transform_2(%arg0: i32) -> (i32, i32, i32) {
    %c0_i32 = arith.constant 0 : i32
    %c0_i32_0 = arith.constant 0 : i32
    %c0_i32_1 = arith.constant 0 : i32
    return %arg0, %c0_i32, %c0_i32_0 : i32, i32, i32
  }
  func.func @transform_3(%arg0: i32) -> (i32, i32, i32) {
    %c0_i32 = arith.constant 0 : i32
    %c0_i32_0 = arith.constant 0 : i32
    %c0_i32_1 = arith.constant 0 : i32
    return %arg0, %c0_i32, %c0_i32_0 : i32, i32, i32
  }
}

module attributes {stable_mosaic.version = 11 : i64} {
  func.func @_ffn_add_ln_kernel(%arg0: i32, %arg1: i32, %arg2: memref<16x32xbf16, #tpu.memory_space<vmem>>, %arg3: memref<32x128xbf16, #tpu.memory_space<vmem>>, %arg4: memref<1x128xbf16, #tpu.memory_space<vmem>>, %arg5: memref<128x32xbf16, #tpu.memory_space<vmem>>, %arg6: memref<1x32xbf16, #tpu.memory_space<vmem>>, %arg7: memref<1x32xbf16, #tpu.memory_space<vmem>>, %arg8: memref<1x32xbf16, #tpu.memory_space<vmem>>, %arg9: memref<16x32xbf16, #tpu.memory_space<vmem>>, %arg10: memref<16x32xf32, #tpu.memory_space<vmem>>) attributes {dimension_semantics = [#tpu.dimension_semantics<parallel>, #tpu.dimension_semantics<arbitrary>], iteration_bounds = array<i64: 1, 1>, scalar_prefetch = 0 : i64, scratch_operands = 1 : i64, tpu.core_type = #tpu.core_type<tc>, window_params = [{transform_indices = @transform_0, window_bounds = array<i64: 16, 32>}, {transform_indices = @transform_1, window_bounds = array<i64: 32, 128>}, {transform_indices = @transform_2, window_bounds = array<i64: 1, 128>}, {transform_indices = @transform_3, window_bounds = array<i64: 128, 32>}, {pipeline_mode = #tpu.pipeline_mode<synchronous>, transform_indices = @transform_4, window_bounds = array<i64: 1, 32>}, {pipeline_mode = #tpu.pipeline_mode<synchronous>, transform_indices = @transform_5, window_bounds = array<i64: 1, 32>}, {pipeline_mode = #tpu.pipeline_mode<synchronous>, transform_indices = @transform_6, window_bounds = array<i64: 1, 32>}, {transform_indices = @transform_7, window_bounds = array<i64: 16, 32>}]} {
    %c0_i32 = arith.constant 0 : i32
    %0 = arith.cmpi eq, %arg1, %c0_i32 : i32
    %1 = arith.extui %0 : i1 to i32
    %c0_i32_0 = arith.constant 0 : i32
    %2 = arith.cmpi ne, %1, %c0_i32_0 : i32
    scf.if %2 {
      %cst_16 = arith.constant 0.000000e+00 : f32
      %21 = vector.broadcast %cst_16 : f32 to vector<16x32xf32>
      %c0_17 = arith.constant 0 : index
      %c0_18 = arith.constant 0 : index
      %22 = vector.load %arg10[%c0_17, %c0_18] : memref<16x32xf32, #tpu.memory_space<vmem>>, vector<16x32xf32>
      tpu.vector_store %arg10[%c0_17, %c0_18], %21 {strides = array<i32>} : memref<16x32xf32, #tpu.memory_space<vmem>>, vector<16x32xf32>,
    } else {
    }
    %c0 = arith.constant 0 : index
    %c0_1 = arith.constant 0 : index
    %3 = vector.load %arg2[%c0, %c0_1] : memref<16x32xbf16, #tpu.memory_space<vmem>>, vector<16x32xbf16>
    %c0_2 = arith.constant 0 : index
    %c0_3 = arith.constant 0 : index
    %4 = vector.load %arg3[%c0_2, %c0_3] : memref<32x128xbf16, #tpu.memory_space<vmem>>, vector<32x128xbf16>
    %cst = arith.constant dense<0.000000e+00> : vector<16x128xf32>
    %5 = tpu.matmul %3, %4, %cst {dimension_numbers = #tpu.dot_dimension_numbers<[1], [0], [0], [1], [0, 0, 1, 1], [], []>} : vector<16x32xbf16>, vector<32x128xbf16>, vector<16x128xf32> -> vector<16x128xf32>
    %c0_4 = arith.constant 0 : index
    %c0_5 = arith.constant 0 : index
    %6 = vector.load %arg4[%c0_4, %c0_5] : memref<1x128xbf16, #tpu.memory_space<vmem>>, vector<1x128xbf16>
    %7 = arith.extf %6 : vector<1x128xbf16> to vector<1x128xf32>
    %8 = vector.broadcast %7 : vector<1x128xf32> to vector<16x128xf32>
    %9 = arith.addf %5, %8 : vector<16x128xf32>
    %cst_6 = arith.constant 0.000000e+00 : f32
    %10 = vector.broadcast %cst_6 : f32 to vector<16x128xf32>
    %11 = arith.maximumf %9, %10 : vector<16x128xf32>
    %c0_7 = arith.constant 0 : index
    %c0_8 = arith.constant 0 : index
    %12 = vector.load %arg10[%c0_7, %c0_8] : memref<16x32xf32, #tpu.memory_space<vmem>>, vector<16x32xf32>
    %13 = arith.truncf %11 : vector<16x128xf32> to vector<16x128xbf16>
    %c0_9 = arith.constant 0 : index
    %c0_10 = arith.constant 0 : index
    %14 = vector.load %arg5[%c0_9, %c0_10] : memref<128x32xbf16, #tpu.memory_space<vmem>>, vector<128x32xbf16>
    %cst_11 = arith.constant dense<0.000000e+00> : vector<16x32xf32>
    %15 = tpu.matmul %13, %14, %cst_11 {dimension_numbers = #tpu.dot_dimension_numbers<[1], [0], [0], [1], [0, 0, 1, 1], [], []>} : vector<16x128xbf16>, vector<128x32xbf16>, vector<16x32xf32> -> vector<16x32xf32>
    %16 = arith.addf %12, %15 : vector<16x32xf32>
    %c0_12 = arith.constant 0 : index
    %c0_13 = arith.constant 0 : index
    %17 = vector.load %arg10[%c0_12, %c0_13] : memref<16x32xf32, #tpu.memory_space<vmem>>, vector<16x32xf32>
    tpu.vector_store %arg10[%c0_12, %c0_13], %16 {strides = array<i32>} : memref<16x32xf32, #tpu.memory_space<vmem>>, vector<16x32xf32>,
    %c0_i32_14 = arith.constant 0 : i32
    %18 = arith.cmpi eq, %arg1, %c0_i32_14 : i32
    %19 = arith.extui %18 : i1 to i32
    %c0_i32_15 = arith.constant 0 : i32
    %20 = arith.cmpi ne, %19, %c0_i32_15 : i32
    scf.if %20 {
      %c0_16 = arith.constant 0 : index
      %c0_17 = arith.constant 0 : index
      %21 = vector.load %arg10[%c0_16, %c0_17] : memref<16x32xf32, #tpu.memory_space<vmem>>, vector<16x32xf32>
      %c0_18 = arith.constant 0 : index
      %c0_19 = arith.constant 0 : index
      %22 = vector.load %arg6[%c0_18, %c0_19] : memref<1x32xbf16, #tpu.memory_space<vmem>>, vector<1x32xbf16>
      %23 = arith.extf %22 : vector<1x32xbf16> to vector<1x32xf32>
      %24 = vector.broadcast %23 : vector<1x32xf32> to vector<16x32xf32>
      %25 = arith.addf %21, %24 : vector<16x32xf32>
      %c0_20 = arith.constant 0 : index
      %c0_21 = arith.constant 0 : index
      %26 = vector.load %arg2[%c0_20, %c0_21] : memref<16x32xbf16, #tpu.memory_space<vmem>>, vector<16x32xbf16>
      %27 = arith.extf %26 : vector<16x32xbf16> to vector<16x32xf32>
      %28 = arith.addf %25, %27 : vector<16x32xf32>
      %cst_22 = arith.constant dense<0.000000e+00> : vector<16xf32>
      %29 = vector.multi_reduction <add>, %28, %cst_22 [1] : vector<16x32xf32> to vector<16xf32>
      %30 = vector.shape_cast %29 : vector<16xf32> to vector<16x1xf32>
      %cst_23 = arith.constant 3.200000e+01 : f32
      %31 = vector.broadcast %cst_23 : f32 to vector<16x1xf32>
      %32 = arith.divf %30, %31 : vector<16x1xf32>
      %33 = vector.broadcast %32 : vector<16x1xf32> to vector<16x32xf32>
      %34 = arith.subf %28, %33 : vector<16x32xf32>
      %35 = arith.mulf %34, %34 : vector<16x32xf32>
      %cst_24 = arith.constant dense<0.000000e+00> : vector<16xf32>
      %36 = vector.multi_reduction <add>, %35, %cst_24 [1] : vector<16x32xf32> to vector<16xf32>
      %37 = vector.shape_cast %36 : vector<16xf32> to vector<16x1xf32>
      %cst_25 = arith.constant 3.200000e+01 : f32
      %38 = vector.broadcast %cst_25 : f32 to vector<16x1xf32>
      %39 = arith.divf %37, %38 : vector<16x1xf32>
      %40 = vector.broadcast %32 : vector<16x1xf32> to vector<16x32xf32>
      %41 = arith.subf %28, %40 : vector<16x32xf32>
      %cst_26 = arith.constant 9.99999974E-6 : f32
      %42 = vector.broadcast %cst_26 : f32 to vector<16x1xf32>
      %43 = arith.addf %39, %42 : vector<16x1xf32>
      %44 = math.rsqrt %43 : vector<16x1xf32>
      %45 = vector.broadcast %44 : vector<16x1xf32> to vector<16x32xf32>
      %46 = arith.mulf %41, %45 : vector<16x32xf32>
      %c0_27 = arith.constant 0 : index
      %c0_28 = arith.constant 0 : index
      %47 = vector.load %arg7[%c0_27, %c0_28] : memref<1x32xbf16, #tpu.memory_space<vmem>>, vector<1x32xbf16>
      %48 = arith.extf %47 : vector<1x32xbf16> to vector<1x32xf32>
      %49 = vector.broadcast %48 : vector<1x32xf32> to vector<16x32xf32>
      %50 = arith.mulf %46, %49 : vector<16x32xf32>
      %c0_29 = arith.constant 0 : index
      %c0_30 = arith.constant 0 : index
      %51 = vector.load %arg8[%c0_29, %c0_30] : memref<1x32xbf16, #tpu.memory_space<vmem>>, vector<1x32xbf16>
      %52 = arith.extf %51 : vector<1x32xbf16> to vector<1x32xf32>
      %53 = vector.broadcast %52 : vector<1x32xf32> to vector<16x32xf32>
      %54 = arith.addf %50, %53 : vector<16x32xf32>
      %55 = arith.truncf %54 : vector<16x32xf32> to vector<16x32xbf16>
      %c0_31 = arith.constant 0 : index
      %c0_32 = arith.constant 0 : index
      %56 = vector.load %arg9[%c0_31, %c0_32] : memref<16x32xbf16, #tpu.memory_space<vmem>>, vector<16x32xbf16>
      tpu.vector_store %arg9[%c0_31, %c0_32], %55 {strides = array<i32>} : memref<16x32xbf16, #tpu.memory_space<vmem>>, vector<16x32xbf16>,
    } else {
    }
    return
  }
  func.func @transform_0(%arg0: i32, %arg1: i32) -> (i32, i32) {
    %c0_i32 = arith.constant 0 : i32
    %c0_i32_0 = arith.constant 0 : i32
    return %arg0, %c0_i32 : i32, i32
  }
  func.func @transform_1(%arg0: i32, %arg1: i32) -> (i32, i32) {
    %c0_i32 = arith.constant 0 : i32
    %c0_i32_0 = arith.constant 0 : i32
    return %c0_i32, %arg1 : i32, i32
  }
  func.func @transform_2(%arg0: i32, %arg1: i32) -> (i32, i32) {
    %c0_i32 = arith.constant 0 : i32
    %c0_i32_0 = arith.constant 0 : i32
    return %c0_i32, %arg1 : i32, i32
  }
  func.func @transform_3(%arg0: i32, %arg1: i32) -> (i32, i32) {
    %c0_i32 = arith.constant 0 : i32
    %c0_i32_0 = arith.constant 0 : i32
    return %arg1, %c0_i32 : i32, i32
  }
  func.func @transform_4(%arg0: i32, %arg1: i32) -> (i32, i32) {
    %c0_i32 = arith.constant 0 : i32
    %c0_i32_0 = arith.constant 0 : i32
    %c0_i32_1 = arith.constant 0 : i32
    return %c0_i32, %c0_i32_0 : i32, i32
  }
  func.func @transform_5(%arg0: i32, %arg1: i32) -> (i32, i32) {
    %c0_i32 = arith.constant 0 : i32
    %c0_i32_0 = arith.constant 0 : i32
    %c0_i32_1 = arith.constant 0 : i32
    return %c0_i32, %c0_i32_0 : i32, i32
  }
  func.func @transform_6(%arg0: i32, %arg1: i32) -> (i32, i32) {
    %c0_i32 = arith.constant 0 : i32
    %c0_i32_0 = arith.constant 0 : i32
    %c0_i32_1 = arith.constant 0 : i32
    return %c0_i32, %c0_i32_0 : i32, i32
  }
  func.func @transform_7(%arg0: i32, %arg1: i32) -> (i32, i32) {
    %c0_i32 = arith.constant 0 : i32
    %c0_i32_0 = arith.constant 0 : i32
    return %arg0, %c0_i32 : i32, i32
  }
}

module attributes {stable_mosaic.version = 11 : i64} {
  func.func @_linear_add_ln_kernel(%arg0: i32, %arg1: i32, %arg2: memref<16x32xbf16, #tpu.memory_space<vmem>>, %arg3: memref<32x32xbf16, #tpu.memory_space<vmem>>, %arg4: memref<1x32xbf16, #tpu.memory_space<vmem>>, %arg5: memref<16x32xbf16, #tpu.memory_space<vmem>>, %arg6: memref<1x32xbf16, #tpu.memory_space<vmem>>, %arg7: memref<1x32xbf16, #tpu.memory_space<vmem>>, %arg8: memref<16x32xbf16, #tpu.memory_space<vmem>>, %arg9: memref<16x32xf32, #tpu.memory_space<vmem>>) attributes {dimension_semantics = [#tpu.dimension_semantics<parallel>, #tpu.dimension_semantics<arbitrary>], iteration_bounds = array<i64: 1, 1>, scalar_prefetch = 0 : i64, scratch_operands = 1 : i64, tpu.core_type = #tpu.core_type<tc>, window_params = [{transform_indices = @transform_0, window_bounds = array<i64: 16, 32>}, {transform_indices = @transform_1, window_bounds = array<i64: 32, 32>}, {pipeline_mode = #tpu.pipeline_mode<synchronous>, transform_indices = @transform_2, window_bounds = array<i64: 1, 32>}, {transform_indices = @transform_3, window_bounds = array<i64: 16, 32>}, {pipeline_mode = #tpu.pipeline_mode<synchronous>, transform_indices = @transform_4, window_bounds = array<i64: 1, 32>}, {pipeline_mode = #tpu.pipeline_mode<synchronous>, transform_indices = @transform_5, window_bounds = array<i64: 1, 32>}, {transform_indices = @transform_6, window_bounds = array<i64: 16, 32>}]} {
    %c0_i32 = arith.constant 0 : i32
    %0 = arith.cmpi eq, %arg1, %c0_i32 : i32
    %1 = arith.extui %0 : i1 to i32
    %c0_i32_0 = arith.constant 0 : i32
    %2 = arith.cmpi ne, %1, %c0_i32_0 : i32
    scf.if %2 {
      %cst_10 = arith.constant 0.000000e+00 : f32
      %12 = vector.broadcast %cst_10 : f32 to vector<16x32xf32>
      %c0_11 = arith.constant 0 : index
      %c0_12 = arith.constant 0 : index
      %13 = vector.load %arg9[%c0_11, %c0_12] : memref<16x32xf32, #tpu.memory_space<vmem>>, vector<16x32xf32>
      tpu.vector_store %arg9[%c0_11, %c0_12], %12 {strides = array<i32>} : memref<16x32xf32, #tpu.memory_space<vmem>>, vector<16x32xf32>,
    } else {
    }
    %c0 = arith.constant 0 : index
    %c0_1 = arith.constant 0 : index
    %3 = vector.load %arg9[%c0, %c0_1] : memref<16x32xf32, #tpu.memory_space<vmem>>, vector<16x32xf32>
    %c0_2 = arith.constant 0 : index
    %c0_3 = arith.constant 0 : index
    %4 = vector.load %arg2[%c0_2, %c0_3] : memref<16x32xbf16, #tpu.memory_space<vmem>>, vector<16x32xbf16>
    %c0_4 = arith.constant 0 : index
    %c0_5 = arith.constant 0 : index
    %5 = vector.load %arg3[%c0_4, %c0_5] : memref<32x32xbf16, #tpu.memory_space<vmem>>, vector<32x32xbf16>
    %cst = arith.constant dense<0.000000e+00> : vector<16x32xf32>
    %6 = tpu.matmul %4, %5, %cst {dimension_numbers = #tpu.dot_dimension_numbers<[1], [0], [0], [1], [0, 0, 1, 1], [], []>} : vector<16x32xbf16>, vector<32x32xbf16>, vector<16x32xf32> -> vector<16x32xf32>
    %7 = arith.addf %3, %6 : vector<16x32xf32>
    %c0_6 = arith.constant 0 : index
    %c0_7 = arith.constant 0 : index
    %8 = vector.load %arg9[%c0_6, %c0_7] : memref<16x32xf32, #tpu.memory_space<vmem>>, vector<16x32xf32>
    tpu.vector_store %arg9[%c0_6, %c0_7], %7 {strides = array<i32>} : memref<16x32xf32, #tpu.memory_space<vmem>>, vector<16x32xf32>,
    %c0_i32_8 = arith.constant 0 : i32
    %9 = arith.cmpi eq, %arg1, %c0_i32_8 : i32
    %10 = arith.extui %9 : i1 to i32
    %c0_i32_9 = arith.constant 0 : i32
    %11 = arith.cmpi ne, %10, %c0_i32_9 : i32
    scf.if %11 {
      %c0_10 = arith.constant 0 : index
      %c0_11 = arith.constant 0 : index
      %12 = vector.load %arg9[%c0_10, %c0_11] : memref<16x32xf32, #tpu.memory_space<vmem>>, vector<16x32xf32>
      %c0_12 = arith.constant 0 : index
      %c0_13 = arith.constant 0 : index
      %13 = vector.load %arg4[%c0_12, %c0_13] : memref<1x32xbf16, #tpu.memory_space<vmem>>, vector<1x32xbf16>
      %14 = arith.extf %13 : vector<1x32xbf16> to vector<1x32xf32>
      %15 = vector.broadcast %14 : vector<1x32xf32> to vector<16x32xf32>
      %16 = arith.addf %12, %15 : vector<16x32xf32>
      %c0_14 = arith.constant 0 : index
      %c0_15 = arith.constant 0 : index
      %17 = vector.load %arg5[%c0_14, %c0_15] : memref<16x32xbf16, #tpu.memory_space<vmem>>, vector<16x32xbf16>
      %18 = arith.extf %17 : vector<16x32xbf16> to vector<16x32xf32>
      %19 = arith.addf %16, %18 : vector<16x32xf32>
      %cst_16 = arith.constant dense<0.000000e+00> : vector<16xf32>
      %20 = vector.multi_reduction <add>, %19, %cst_16 [1] : vector<16x32xf32> to vector<16xf32>
      %21 = vector.shape_cast %20 : vector<16xf32> to vector<16x1xf32>
      %cst_17 = arith.constant 3.200000e+01 : f32
      %22 = vector.broadcast %cst_17 : f32 to vector<16x1xf32>
      %23 = arith.divf %21, %22 : vector<16x1xf32>
      %24 = vector.broadcast %23 : vector<16x1xf32> to vector<16x32xf32>
      %25 = arith.subf %19, %24 : vector<16x32xf32>
      %26 = arith.mulf %25, %25 : vector<16x32xf32>
      %cst_18 = arith.constant dense<0.000000e+00> : vector<16xf32>
      %27 = vector.multi_reduction <add>, %26, %cst_18 [1] : vector<16x32xf32> to vector<16xf32>
      %28 = vector.shape_cast %27 : vector<16xf32> to vector<16x1xf32>
      %cst_19 = arith.constant 3.200000e+01 : f32
      %29 = vector.broadcast %cst_19 : f32 to vector<16x1xf32>
      %30 = arith.divf %28, %29 : vector<16x1xf32>
      %31 = vector.broadcast %23 : vector<16x1xf32> to vector<16x32xf32>
      %32 = arith.subf %19, %31 : vector<16x32xf32>
      %cst_20 = arith.constant 9.99999974E-6 : f32
      %33 = vector.broadcast %cst_20 : f32 to vector<16x1xf32>
      %34 = arith.addf %30, %33 : vector<16x1xf32>
      %35 = math.rsqrt %34 : vector<16x1xf32>
      %36 = vector.broadcast %35 : vector<16x1xf32> to vector<16x32xf32>
      %37 = arith.mulf %32, %36 : vector<16x32xf32>
      %c0_21 = arith.constant 0 : index
      %c0_22 = arith.constant 0 : index
      %38 = vector.load %arg6[%c0_21, %c0_22] : memref<1x32xbf16, #tpu.memory_space<vmem>>, vector<1x32xbf16>
      %39 = arith.extf %38 : vector<1x32xbf16> to vector<1x32xf32>
      %40 = vector.broadcast %39 : vector<1x32xf32> to vector<16x32xf32>
      %41 = arith.mulf %37, %40 : vector<16x32xf32>
      %c0_23 = arith.constant 0 : index
      %c0_24 = arith.constant 0 : index
      %42 = vector.load %arg7[%c0_23, %c0_24] : memref<1x32xbf16, #tpu.memory_space<vmem>>, vector<1x32xbf16>
      %43 = arith.extf %42 : vector<1x32xbf16> to vector<1x32xf32>
      %44 = vector.broadcast %43 : vector<1x32xf32> to vector<16x32xf32>
      %45 = arith.addf %41, %44 : vector<16x32xf32>
      %46 = arith.truncf %45 : vector<16x32xf32> to vector<16x32xbf16>
      %c0_25 = arith.constant 0 : index
      %c0_26 = arith.constant 0 : index
      %47 = vector.load %arg8[%c0_25, %c0_26] : memref<16x32xbf16, #tpu.memory_space<vmem>>, vector<16x32xbf16>
      tpu.vector_store %arg8[%c0_25, %c0_26], %46 {strides = array<i32>} : memref<16x32xbf16, #tpu.memory_space<vmem>>, vector<16x32xbf16>,
    } else {
    }
    return
  }
  func.func @transform_0(%arg0: i32, %arg1: i32) -> (i32, i32) {
    %c0_i32 = arith.constant 0 : i32
    return %arg0, %arg1 : i32, i32
  }
  func.func @transform_1(%arg0: i32, %arg1: i32) -> (i32, i32) {
    %c0_i32 = arith.constant 0 : i32
    %c0_i32_0 = arith.constant 0 : i32
    return %arg1, %c0_i32 : i32, i32
  }
  func.func @transform_2(%arg0: i32, %arg1: i32) -> (i32, i32) {
    %c0_i32 = arith.constant 0 : i32
    %c0_i32_0 = arith.constant 0 : i32
    %c0_i32_1 = arith.constant 0 : i32
    return %c0_i32, %c0_i32_0 : i32, i32
  }
  func.func @transform_3(%arg0: i32, %arg1: i32) -> (i32, i32) {
    %c0_i32 = arith.constant 0 : i32
    %c0_i32_0 = arith.constant 0 : i32
    return %arg0, %c0_i32 : i32, i32
  }
  func.func @transform_4(%arg0: i32, %arg1: i32) -> (i32, i32) {
    %c0_i32 = arith.constant 0 : i32
    %c0_i32_0 = arith.constant 0 : i32
    %c0_i32_1 = arith.constant 0 : i32
    return %c0_i32, %c0_i32_0 : i32, i32
  }
  func.func @transform_5(%arg0: i32, %arg1: i32) -> (i32, i32) {
    %c0_i32 = arith.constant 0 : i32
    %c0_i32_0 = arith.constant 0 : i32
    %c0_i32_1 = arith.constant 0 : i32
    return %c0_i32, %c0_i32_0 : i32, i32
  }
  func.func @transform_6(%arg0: i32, %arg1: i32) -> (i32, i32) {
    %c0_i32 = arith.constant 0 : i32
    %c0_i32_0 = arith.constant 0 : i32
    return %arg0, %c0_i32 : i32, i32
  }
}

module attributes {stable_mosaic.version = 11 : i64} {
  func.func @_linear_kernel(%arg0: i32, %arg1: i32, %arg2: i32, %arg3: memref<16x32xbf16, #tpu.memory_space<vmem>>, %arg4: memref<32x64xbf16, #tpu.memory_space<vmem>>, %arg5: memref<1x64xbf16, #tpu.memory_space<vmem>>, %arg6: memref<16x64xbf16, #tpu.memory_space<vmem>>, %arg7: memref<16x64xf32, #tpu.memory_space<vmem>>) attributes {dimension_semantics = [#tpu.dimension_semantics<parallel>, #tpu.dimension_semantics<parallel>, #tpu.dimension_semantics<arbitrary>], iteration_bounds = array<i64: 1, 1, 1>, scalar_prefetch = 0 : i64, scratch_operands = 1 : i64, tpu.core_type = #tpu.core_type<tc>, window_params = [{transform_indices = @transform_0, window_bounds = array<i64: 16, 32>}, {transform_indices = @transform_1, window_bounds = array<i64: 32, 64>}, {transform_indices = @transform_2, window_bounds = array<i64: 1, 64>}, {transform_indices = @transform_3, window_bounds = array<i64: 16, 64>}]} {
    %c0_i32 = arith.constant 0 : i32
    %0 = arith.cmpi eq, %arg2, %c0_i32 : i32
    %1 = arith.extui %0 : i1 to i32
    %c0_i32_0 = arith.constant 0 : i32
    %2 = arith.cmpi ne, %1, %c0_i32_0 : i32
    scf.if %2 {
      %cst_10 = arith.constant 0.000000e+00 : f32
      %12 = vector.broadcast %cst_10 : f32 to vector<16x64xf32>
      %c0_11 = arith.constant 0 : index
      %c0_12 = arith.constant 0 : index
      %13 = vector.load %arg7[%c0_11, %c0_12] : memref<16x64xf32, #tpu.memory_space<vmem>>, vector<16x64xf32>
      tpu.vector_store %arg7[%c0_11, %c0_12], %12 {strides = array<i32>} : memref<16x64xf32, #tpu.memory_space<vmem>>, vector<16x64xf32>,
    } else {
    }
    %c0 = arith.constant 0 : index
    %c0_1 = arith.constant 0 : index
    %3 = vector.load %arg7[%c0, %c0_1] : memref<16x64xf32, #tpu.memory_space<vmem>>, vector<16x64xf32>
    %c0_2 = arith.constant 0 : index
    %c0_3 = arith.constant 0 : index
    %4 = vector.load %arg3[%c0_2, %c0_3] : memref<16x32xbf16, #tpu.memory_space<vmem>>, vector<16x32xbf16>
    %c0_4 = arith.constant 0 : index
    %c0_5 = arith.constant 0 : index
    %5 = vector.load %arg4[%c0_4, %c0_5] : memref<32x64xbf16, #tpu.memory_space<vmem>>, vector<32x64xbf16>
    %cst = arith.constant dense<0.000000e+00> : vector<16x64xf32>
    %6 = tpu.matmul %4, %5, %cst {dimension_numbers = #tpu.dot_dimension_numbers<[1], [0], [0], [1], [0, 0, 1, 1], [], []>} : vector<16x32xbf16>, vector<32x64xbf16>, vector<16x64xf32> -> vector<16x64xf32>
    %7 = arith.addf %3, %6 : vector<16x64xf32>
    %c0_6 = arith.constant 0 : index
    %c0_7 = arith.constant 0 : index
    %8 = vector.load %arg7[%c0_6, %c0_7] : memref<16x64xf32, #tpu.memory_space<vmem>>, vector<16x64xf32>
    tpu.vector_store %arg7[%c0_6, %c0_7], %7 {strides = array<i32>} : memref<16x64xf32, #tpu.memory_space<vmem>>, vector<16x64xf32>,
    %c0_i32_8 = arith.constant 0 : i32
    %9 = arith.cmpi eq, %arg2, %c0_i32_8 : i32
    %10 = arith.extui %9 : i1 to i32
    %c0_i32_9 = arith.constant 0 : i32
    %11 = arith.cmpi ne, %10, %c0_i32_9 : i32
    scf.if %11 {
      %c0_10 = arith.constant 0 : index
      %c0_11 = arith.constant 0 : index
      %12 = vector.load %arg7[%c0_10, %c0_11] : memref<16x64xf32, #tpu.memory_space<vmem>>, vector<16x64xf32>
      %c0_12 = arith.constant 0 : index
      %c0_13 = arith.constant 0 : index
      %13 = vector.load %arg5[%c0_12, %c0_13] : memref<1x64xbf16, #tpu.memory_space<vmem>>, vector<1x64xbf16>
      %14 = arith.extf %13 : vector<1x64xbf16> to vector<1x64xf32>
      %15 = vector.broadcast %14 : vector<1x64xf32> to vector<16x64xf32>
      %16 = arith.addf %12, %15 : vector<16x64xf32>
      %17 = arith.truncf %16 : vector<16x64xf32> to vector<16x64xbf16>
      %c0_14 = arith.constant 0 : index
      %c0_15 = arith.constant 0 : index
      %18 = vector.load %arg6[%c0_14, %c0_15] : memref<16x64xbf16, #tpu.memory_space<vmem>>, vector<16x64xbf16>
      tpu.vector_store %arg6[%c0_14, %c0_15], %17 {strides = array<i32>} : memref<16x64xbf16, #tpu.memory_space<vmem>>, vector<16x64xbf16>,
    } else {
    }
    return
  }
  func.func @transform_0(%arg0: i32, %arg1: i32, %arg2: i32) -> (i32, i32) {
    %c0_i32 = arith.constant 0 : i32
    return %arg0, %arg2 : i32, i32
  }
  func.func @transform_1(%arg0: i32, %arg1: i32, %arg2: i32) -> (i32, i32) {
    %c0_i32 = arith.constant 0 : i32
    return %arg2, %arg1 : i32, i32
  }
  func.func @transform_2(%arg0: i32, %arg1: i32, %arg2: i32) -> (i32, i32) {
    %c0_i32 = arith.constant 0 : i32
    %c0_i32_0 = arith.constant 0 : i32
    return %c0_i32, %arg1 : i32, i32
  }
  func.func @transform_3(%arg0: i32, %arg1: i32, %arg2: i32) -> (i32, i32) {
    %c0_i32 = arith.constant 0 : i32
    return %arg0, %arg1 : i32, i32
  }
}

module attributes {stable_mosaic.version = 11 : i64} {
  func.func @_linear_kernel(%arg0: i32, %arg1: i32, %arg2: i32, %arg3: memref<16x32xbf16, #tpu.memory_space<vmem>>, %arg4: memref<32x32xbf16, #tpu.memory_space<vmem>>, %arg5: memref<1x32xbf16, #tpu.memory_space<vmem>>, %arg6: memref<16x32xbf16, #tpu.memory_space<vmem>>, %arg7: memref<16x32xf32, #tpu.memory_space<vmem>>) attributes {dimension_semantics = [#tpu.dimension_semantics<parallel>, #tpu.dimension_semantics<parallel>, #tpu.dimension_semantics<arbitrary>], iteration_bounds = array<i64: 1, 1, 1>, scalar_prefetch = 0 : i64, scratch_operands = 1 : i64, tpu.core_type = #tpu.core_type<tc>, window_params = [{transform_indices = @transform_0, window_bounds = array<i64: 16, 32>}, {transform_indices = @transform_1, window_bounds = array<i64: 32, 32>}, {transform_indices = @transform_2, window_bounds = array<i64: 1, 32>}, {transform_indices = @transform_3, window_bounds = array<i64: 16, 32>}]} {
    %c0_i32 = arith.constant 0 : i32
    %0 = arith.cmpi eq, %arg2, %c0_i32 : i32
    %1 = arith.extui %0 : i1 to i32
    %c0_i32_0 = arith.constant 0 : i32
    %2 = arith.cmpi ne, %1, %c0_i32_0 : i32
    scf.if %2 {
      %cst_10 = arith.constant 0.000000e+00 : f32
      %12 = vector.broadcast %cst_10 : f32 to vector<16x32xf32>
      %c0_11 = arith.constant 0 : index
      %c0_12 = arith.constant 0 : index
      %13 = vector.load %arg7[%c0_11, %c0_12] : memref<16x32xf32, #tpu.memory_space<vmem>>, vector<16x32xf32>
      tpu.vector_store %arg7[%c0_11, %c0_12], %12 {strides = array<i32>} : memref<16x32xf32, #tpu.memory_space<vmem>>, vector<16x32xf32>,
    } else {
    }
    %c0 = arith.constant 0 : index
    %c0_1 = arith.constant 0 : index
    %3 = vector.load %arg7[%c0, %c0_1] : memref<16x32xf32, #tpu.memory_space<vmem>>, vector<16x32xf32>
    %c0_2 = arith.constant 0 : index
    %c0_3 = arith.constant 0 : index
    %4 = vector.load %arg3[%c0_2, %c0_3] : memref<16x32xbf16, #tpu.memory_space<vmem>>, vector<16x32xbf16>
    %c0_4 = arith.constant 0 : index
    %c0_5 = arith.constant 0 : index
    %5 = vector.load %arg4[%c0_4, %c0_5] : memref<32x32xbf16, #tpu.memory_space<vmem>>, vector<32x32xbf16>
    %cst = arith.constant dense<0.000000e+00> : vector<16x32xf32>
    %6 = tpu.matmul %4, %5, %cst {dimension_numbers = #tpu.dot_dimension_numbers<[1], [0], [0], [1], [0, 0, 1, 1], [], []>} : vector<16x32xbf16>, vector<32x32xbf16>, vector<16x32xf32> -> vector<16x32xf32>
    %7 = arith.addf %3, %6 : vector<16x32xf32>
    %c0_6 = arith.constant 0 : index
    %c0_7 = arith.constant 0 : index
    %8 = vector.load %arg7[%c0_6, %c0_7] : memref<16x32xf32, #tpu.memory_space<vmem>>, vector<16x32xf32>
    tpu.vector_store %arg7[%c0_6, %c0_7], %7 {strides = array<i32>} : memref<16x32xf32, #tpu.memory_space<vmem>>, vector<16x32xf32>,
    %c0_i32_8 = arith.constant 0 : i32
    %9 = arith.cmpi eq, %arg2, %c0_i32_8 : i32
    %10 = arith.extui %9 : i1 to i32
    %c0_i32_9 = arith.constant 0 : i32
    %11 = arith.cmpi ne, %10, %c0_i32_9 : i32
    scf.if %11 {
      %c0_10 = arith.constant 0 : index
      %c0_11 = arith.constant 0 : index
      %12 = vector.load %arg7[%c0_10, %c0_11] : memref<16x32xf32, #tpu.memory_space<vmem>>, vector<16x32xf32>
      %c0_12 = arith.constant 0 : index
      %c0_13 = arith.constant 0 : index
      %13 = vector.load %arg5[%c0_12, %c0_13] : memref<1x32xbf16, #tpu.memory_space<vmem>>, vector<1x32xbf16>
      %14 = arith.extf %13 : vector<1x32xbf16> to vector<1x32xf32>
      %15 = vector.broadcast %14 : vector<1x32xf32> to vector<16x32xf32>
      %16 = arith.addf %12, %15 : vector<16x32xf32>
      %17 = arith.truncf %16 : vector<16x32xf32> to vector<16x32xbf16>
      %c0_14 = arith.constant 0 : index
      %c0_15 = arith.constant 0 : index
      %18 = vector.load %arg6[%c0_14, %c0_15] : memref<16x32xbf16, #tpu.memory_space<vmem>>, vector<16x32xbf16>
      tpu.vector_store %arg6[%c0_14, %c0_15], %17 {strides = array<i32>} : memref<16x32xbf16, #tpu.memory_space<vmem>>, vector<16x32xbf16>,
    } else {
    }
    return
  }
  func.func @transform_0(%arg0: i32, %arg1: i32, %arg2: i32) -> (i32, i32) {
    %c0_i32 = arith.constant 0 : i32
    return %arg0, %arg2 : i32, i32
  }
  func.func @transform_1(%arg0: i32, %arg1: i32, %arg2: i32) -> (i32, i32) {
    %c0_i32 = arith.constant 0 : i32
    return %arg2, %arg1 : i32, i32
  }
  func.func @transform_2(%arg0: i32, %arg1: i32, %arg2: i32) -> (i32, i32) {
    %c0_i32 = arith.constant 0 : i32
    %c0_i32_0 = arith.constant 0 : i32
    return %c0_i32, %arg1 : i32, i32
  }
  func.func @transform_3(%arg0: i32, %arg1: i32, %arg2: i32) -> (i32, i32) {
    %c0_i32 = arith.constant 0 : i32
    return %arg0, %arg1 : i32, i32
  }
}

module attributes {stable_mosaic.version = 11 : i64} {
  func.func @_mha_kernel(%arg0: i32, %arg1: memref<1x8x32xbf16, #tpu.memory_space<vmem>>, %arg2: memref<1x8x32xbf16, #tpu.memory_space<vmem>>, %arg3: memref<1x8x32xbf16, #tpu.memory_space<vmem>>, %arg4: memref<1x8x32xbf16, #tpu.memory_space<vmem>>) attributes {dimension_semantics = [#tpu.dimension_semantics<parallel>], iteration_bounds = array<i64: 2>, scalar_prefetch = 0 : i64, scratch_operands = 0 : i64, tpu.core_type = #tpu.core_type<tc>, window_params = [{transform_indices = @transform_0, window_bounds = array<i64: 1, 8, 32>}, {transform_indices = @transform_1, window_bounds = array<i64: 1, 8, 32>}, {transform_indices = @transform_2, window_bounds = array<i64: 1, 8, 32>}, {transform_indices = @transform_3, window_bounds = array<i64: 1, 8, 32>}]} {
    %c0 = arith.constant 0 : index
    %c0_0 = arith.constant 0 : index
    %c0_1 = arith.constant 0 : index
    %0 = vector.load %arg1[%c0, %c0_0, %c0_1] : memref<1x8x32xbf16, #tpu.memory_space<vmem>>, vector<1x8x32xbf16>
    %1 = vector.shape_cast %0 : vector<1x8x32xbf16> to vector<8x32xbf16>
    %c0_2 = arith.constant 0 : index
    %c0_3 = arith.constant 0 : index
    %c0_4 = arith.constant 0 : index
    %2 = vector.load %arg2[%c0_2, %c0_3, %c0_4] : memref<1x8x32xbf16, #tpu.memory_space<vmem>>, vector<1x8x32xbf16>
    %3 = vector.shape_cast %2 : vector<1x8x32xbf16> to vector<8x32xbf16>
    %c0_5 = arith.constant 0 : index
    %c0_6 = arith.constant 0 : index
    %c0_7 = arith.constant 0 : index
    %4 = vector.load %arg3[%c0_5, %c0_6, %c0_7] : memref<1x8x32xbf16, #tpu.memory_space<vmem>>, vector<1x8x32xbf16>
    %5 = vector.shape_cast %4 : vector<1x8x32xbf16> to vector<8x32xbf16>
    %6 = tpu.iota {dimensions = array<i32: 0>} : vector<8x8xi32>
    %7 = tpu.iota {dimensions = array<i32: 1>} : vector<8x8xi32>
    %8 = arith.cmpi sle, %7, %6 : vector<8x8xi32>
    %cst = arith.constant 0.000000e+00 : f32
    %cst_8 = arith.constant -1.000000e+30 : f32
    %9 = vector.broadcast %cst : f32 to vector<8x8xf32>
    %10 = vector.broadcast %cst_8 : f32 to vector<8x8xf32>
    %11 = arith.select %8, %9, %10 : vector<8x8xi1>, vector<8x8xf32>
    %12 = vector.extract_strided_slice %1 {offsets = [0, 0], sizes = [8, 4], strides = [1, 1]} : vector<8x32xbf16> to vector<8x4xbf16>
    %13 = vector.extract_strided_slice %3 {offsets = [0, 0], sizes = [8, 4], strides = [1, 1]} : vector<8x32xbf16> to vector<8x4xbf16>
    %14 = vector.extract_strided_slice %5 {offsets = [0, 0], sizes = [8, 4], strides = [1, 1]} : vector<8x32xbf16> to vector<8x4xbf16>
    %cst_9 = arith.constant dense<0.000000e+00> : vector<8x8xf32>
    %15 = tpu.matmul %12, %13, %cst_9 {dimension_numbers = #tpu.dot_dimension_numbers<[1], [1], [0], [0], [0, 0, 1, 0], [], []>} : vector<8x4xbf16>, vector<8x4xbf16>, vector<8x8xf32> -> vector<8x8xf32>
    %cst_10 = arith.constant 5.000000e-01 : f32
    %16 = vector.broadcast %cst_10 : f32 to vector<8x8xf32>
    %17 = arith.mulf %15, %16 : vector<8x8xf32>
    %18 = arith.addf %17, %11 : vector<8x8xf32>
    %cst_11 = arith.constant dense<0xFF800000> : vector<8xf32>
    %19 = vector.multi_reduction <maximumf>, %18, %cst_11 [1] : vector<8x8xf32> to vector<8xf32>
    %20 = vector.shape_cast %19 : vector<8xf32> to vector<8x1xf32>
    %21 = vector.broadcast %20 : vector<8x1xf32> to vector<8x8xf32>
    %22 = arith.subf %18, %21 : vector<8x8xf32>
    %23 = math.exp %22 : vector<8x8xf32>
    %cst_12 = arith.constant dense<0.000000e+00> : vector<8xf32>
    %24 = vector.multi_reduction <add>, %23, %cst_12 [1] : vector<8x8xf32> to vector<8xf32>
    %25 = vector.shape_cast %24 : vector<8xf32> to vector<8x1xf32>
    %26 = tpu.reciprocal %25 {approx = true} : vector<8x1xf32> -> vector<8x1xf32>
    %27 = vector.broadcast %26 : vector<8x1xf32> to vector<8x8xf32>
    %28 = arith.mulf %23, %27 : vector<8x8xf32>
    %29 = arith.truncf %28 : vector<8x8xf32> to vector<8x8xbf16>
    %cst_13 = arith.constant dense<0.000000e+00> : vector<8x4xf32>
    %30 = tpu.matmul %29, %14, %cst_13 {dimension_numbers = #tpu.dot_dimension_numbers<[1], [0], [0], [1], [0, 0, 1, 1], [], []>} : vector<8x8xbf16>, vector<8x4xbf16>, vector<8x4xf32> -> vector<8x4xf32>
    %31 = arith.truncf %30 : vector<8x4xf32> to vector<8x4xbf16>
    %c0_14 = arith.constant 0 : index
    %c0_15 = arith.constant 0 : index
    %c0_16 = arith.constant 0 : index
    %32 = vector.load %arg4[%c0_14, %c0_15, %c0_16] : memref<1x8x32xbf16, #tpu.memory_space<vmem>>, vector<1x8x4xbf16>
    %33 = vector.shape_cast %32 : vector<1x8x4xbf16> to vector<8x4xbf16>
    %34 = vector.shape_cast %31 : vector<8x4xbf16> to vector<1x8x4xbf16>
    tpu.vector_store %arg4[%c0_14, %c0_15, %c0_16], %34 {strides = array<i32>} : memref<1x8x32xbf16, #tpu.memory_space<vmem>>, vector<1x8x4xbf16>,
    %35 = vector.extract_strided_slice %1 {offsets = [0, 4], sizes = [8, 4], strides = [1, 1]} : vector<8x32xbf16> to vector<8x4xbf16>
    %36 = vector.extract_strided_slice %3 {offsets = [0, 4], sizes = [8, 4], strides = [1, 1]} : vector<8x32xbf16> to vector<8x4xbf16>
    %37 = vector.extract_strided_slice %5 {offsets = [0, 4], sizes = [8, 4], strides = [1, 1]} : vector<8x32xbf16> to vector<8x4xbf16>
    %cst_17 = arith.constant dense<0.000000e+00> : vector<8x8xf32>
    %38 = tpu.matmul %35, %36, %cst_17 {dimension_numbers = #tpu.dot_dimension_numbers<[1], [1], [0], [0], [0, 0, 1, 0], [], []>} : vector<8x4xbf16>, vector<8x4xbf16>, vector<8x8xf32> -> vector<8x8xf32>
    %cst_18 = arith.constant 5.000000e-01 : f32
    %39 = vector.broadcast %cst_18 : f32 to vector<8x8xf32>
    %40 = arith.mulf %38, %39 : vector<8x8xf32>
    %41 = arith.addf %40, %11 : vector<8x8xf32>
    %cst_19 = arith.constant dense<0xFF800000> : vector<8xf32>
    %42 = vector.multi_reduction <maximumf>, %41, %cst_19 [1] : vector<8x8xf32> to vector<8xf32>
    %43 = vector.shape_cast %42 : vector<8xf32> to vector<8x1xf32>
    %44 = vector.broadcast %43 : vector<8x1xf32> to vector<8x8xf32>
    %45 = arith.subf %41, %44 : vector<8x8xf32>
    %46 = math.exp %45 : vector<8x8xf32>
    %cst_20 = arith.constant dense<0.000000e+00> : vector<8xf32>
    %47 = vector.multi_reduction <add>, %46, %cst_20 [1] : vector<8x8xf32> to vector<8xf32>
    %48 = vector.shape_cast %47 : vector<8xf32> to vector<8x1xf32>
    %49 = tpu.reciprocal %48 {approx = true} : vector<8x1xf32> -> vector<8x1xf32>
    %50 = vector.broadcast %49 : vector<8x1xf32> to vector<8x8xf32>
    %51 = arith.mulf %46, %50 : vector<8x8xf32>
    %52 = arith.truncf %51 : vector<8x8xf32> to vector<8x8xbf16>
    %cst_21 = arith.constant dense<0.000000e+00> : vector<8x4xf32>
    %53 = tpu.matmul %52, %37, %cst_21 {dimension_numbers = #tpu.dot_dimension_numbers<[1], [0], [0], [1], [0, 0, 1, 1], [], []>} : vector<8x8xbf16>, vector<8x4xbf16>, vector<8x4xf32> -> vector<8x4xf32>
    %54 = arith.truncf %53 : vector<8x4xf32> to vector<8x4xbf16>
    %c0_22 = arith.constant 0 : index
    %c0_23 = arith.constant 0 : index
    %c4 = arith.constant 4 : index
    %55 = vector.load %arg4[%c0_22, %c0_23, %c4] : memref<1x8x32xbf16, #tpu.memory_space<vmem>>, vector<1x8x4xbf16>
    %56 = vector.shape_cast %55 : vector<1x8x4xbf16> to vector<8x4xbf16>
    %57 = vector.shape_cast %54 : vector<8x4xbf16> to vector<1x8x4xbf16>
    tpu.vector_store %arg4[%c0_22, %c0_23, %c4], %57 {strides = array<i32>} : memref<1x8x32xbf16, #tpu.memory_space<vmem>>, vector<1x8x4xbf16>,
    %58 = vector.extract_strided_slice %1 {offsets = [0, 8], sizes = [8, 4], strides = [1, 1]} : vector<8x32xbf16> to vector<8x4xbf16>
    %59 = vector.extract_strided_slice %3 {offsets = [0, 8], sizes = [8, 4], strides = [1, 1]} : vector<8x32xbf16> to vector<8x4xbf16>
    %60 = vector.extract_strided_slice %5 {offsets = [0, 8], sizes = [8, 4], strides = [1, 1]} : vector<8x32xbf16> to vector<8x4xbf16>
    %cst_24 = arith.constant dense<0.000000e+00> : vector<8x8xf32>
    %61 = tpu.matmul %58, %59, %cst_24 {dimension_numbers = #tpu.dot_dimension_numbers<[1], [1], [0], [0], [0, 0, 1, 0], [], []>} : vector<8x4xbf16>, vector<8x4xbf16>, vector<8x8xf32> -> vector<8x8xf32>
    %cst_25 = arith.constant 5.000000e-01 : f32
    %62 = vector.broadcast %cst_25 : f32 to vector<8x8xf32>
    %63 = arith.mulf %61, %62 : vector<8x8xf32>
    %64 = arith.addf %63, %11 : vector<8x8xf32>
    %cst_26 = arith.constant dense<0xFF800000> : vector<8xf32>
    %65 = vector.multi_reduction <maximumf>, %64, %cst_26 [1] : vector<8x8xf32> to vector<8xf32>
    %66 = vector.shape_cast %65 : vector<8xf32> to vector<8x1xf32>
    %67 = vector.broadcast %66 : vector<8x1xf32> to vector<8x8xf32>
    %68 = arith.subf %64, %67 : vector<8x8xf32>
    %69 = math.exp %68 : vector<8x8xf32>
    %cst_27 = arith.constant dense<0.000000e+00> : vector<8xf32>
    %70 = vector.multi_reduction <add>, %69, %cst_27 [1] : vector<8x8xf32> to vector<8xf32>
    %71 = vector.shape_cast %70 : vector<8xf32> to vector<8x1xf32>
    %72 = tpu.reciprocal %71 {approx = true} : vector<8x1xf32> -> vector<8x1xf32>
    %73 = vector.broadcast %72 : vector<8x1xf32> to vector<8x8xf32>
    %74 = arith.mulf %69, %73 : vector<8x8xf32>
    %75 = arith.truncf %74 : vector<8x8xf32> to vector<8x8xbf16>
    %cst_28 = arith.constant dense<0.000000e+00> : vector<8x4xf32>
    %76 = tpu.matmul %75, %60, %cst_28 {dimension_numbers = #tpu.dot_dimension_numbers<[1], [0], [0], [1], [0, 0, 1, 1], [], []>} : vector<8x8xbf16>, vector<8x4xbf16>, vector<8x4xf32> -> vector<8x4xf32>
    %77 = arith.truncf %76 : vector<8x4xf32> to vector<8x4xbf16>
    %c0_29 = arith.constant 0 : index
    %c0_30 = arith.constant 0 : index
    %c8 = arith.constant 8 : index
    %78 = vector.load %arg4[%c0_29, %c0_30, %c8] : memref<1x8x32xbf16, #tpu.memory_space<vmem>>, vector<1x8x4xbf16>
    %79 = vector.shape_cast %78 : vector<1x8x4xbf16> to vector<8x4xbf16>
    %80 = vector.shape_cast %77 : vector<8x4xbf16> to vector<1x8x4xbf16>
    tpu.vector_store %arg4[%c0_29, %c0_30, %c8], %80 {strides = array<i32>} : memref<1x8x32xbf16, #tpu.memory_space<vmem>>, vector<1x8x4xbf16>,
    %81 = vector.extract_strided_slice %1 {offsets = [0, 12], sizes = [8, 4], strides = [1, 1]} : vector<8x32xbf16> to vector<8x4xbf16>
    %82 = vector.extract_strided_slice %3 {offsets = [0, 12], sizes = [8, 4], strides = [1, 1]} : vector<8x32xbf16> to vector<8x4xbf16>
    %83 = vector.extract_strided_slice %5 {offsets = [0, 12], sizes = [8, 4], strides = [1, 1]} : vector<8x32xbf16> to vector<8x4xbf16>
    %cst_31 = arith.constant dense<0.000000e+00> : vector<8x8xf32>
    %84 = tpu.matmul %81, %82, %cst_31 {dimension_numbers = #tpu.dot_dimension_numbers<[1], [1], [0], [0], [0, 0, 1, 0], [], []>} : vector<8x4xbf16>, vector<8x4xbf16>, vector<8x8xf32> -> vector<8x8xf32>
    %cst_32 = arith.constant 5.000000e-01 : f32
    %85 = vector.broadcast %cst_32 : f32 to vector<8x8xf32>
    %86 = arith.mulf %84, %85 : vector<8x8xf32>
    %87 = arith.addf %86, %11 : vector<8x8xf32>
    %cst_33 = arith.constant dense<0xFF800000> : vector<8xf32>
    %88 = vector.multi_reduction <maximumf>, %87, %cst_33 [1] : vector<8x8xf32> to vector<8xf32>
    %89 = vector.shape_cast %88 : vector<8xf32> to vector<8x1xf32>
    %90 = vector.broadcast %89 : vector<8x1xf32> to vector<8x8xf32>
    %91 = arith.subf %87, %90 : vector<8x8xf32>
    %92 = math.exp %91 : vector<8x8xf32>
    %cst_34 = arith.constant dense<0.000000e+00> : vector<8xf32>
    %93 = vector.multi_reduction <add>, %92, %cst_34 [1] : vector<8x8xf32> to vector<8xf32>
    %94 = vector.shape_cast %93 : vector<8xf32> to vector<8x1xf32>
    %95 = tpu.reciprocal %94 {approx = true} : vector<8x1xf32> -> vector<8x1xf32>
    %96 = vector.broadcast %95 : vector<8x1xf32> to vector<8x8xf32>
    %97 = arith.mulf %92, %96 : vector<8x8xf32>
    %98 = arith.truncf %97 : vector<8x8xf32> to vector<8x8xbf16>
    %cst_35 = arith.constant dense<0.000000e+00> : vector<8x4xf32>
    %99 = tpu.matmul %98, %83, %cst_35 {dimension_numbers = #tpu.dot_dimension_numbers<[1], [0], [0], [1], [0, 0, 1, 1], [], []>} : vector<8x8xbf16>, vector<8x4xbf16>, vector<8x4xf32> -> vector<8x4xf32>
    %100 = arith.truncf %99 : vector<8x4xf32> to vector<8x4xbf16>
    %c0_36 = arith.constant 0 : index
    %c0_37 = arith.constant 0 : index
    %c12 = arith.constant 12 : index
    %101 = vector.load %arg4[%c0_36, %c0_37, %c12] : memref<1x8x32xbf16, #tpu.memory_space<vmem>>, vector<1x8x4xbf16>
    %102 = vector.shape_cast %101 : vector<1x8x4xbf16> to vector<8x4xbf16>
    %103 = vector.shape_cast %100 : vector<8x4xbf16> to vector<1x8x4xbf16>
    tpu.vector_store %arg4[%c0_36, %c0_37, %c12], %103 {strides = array<i32>} : memref<1x8x32xbf16, #tpu.memory_space<vmem>>, vector<1x8x4xbf16>,
    %104 = vector.extract_strided_slice %1 {offsets = [0, 16], sizes = [8, 4], strides = [1, 1]} : vector<8x32xbf16> to vector<8x4xbf16>
    %105 = vector.extract_strided_slice %3 {offsets = [0, 16], sizes = [8, 4], strides = [1, 1]} : vector<8x32xbf16> to vector<8x4xbf16>
    %106 = vector.extract_strided_slice %5 {offsets = [0, 16], sizes = [8, 4], strides = [1, 1]} : vector<8x32xbf16> to vector<8x4xbf16>
    %cst_38 = arith.constant dense<0.000000e+00> : vector<8x8xf32>
    %107 = tpu.matmul %104, %105, %cst_38 {dimension_numbers = #tpu.dot_dimension_numbers<[1], [1], [0], [0], [0, 0, 1, 0], [], []>} : vector<8x4xbf16>, vector<8x4xbf16>, vector<8x8xf32> -> vector<8x8xf32>
    %cst_39 = arith.constant 5.000000e-01 : f32
    %108 = vector.broadcast %cst_39 : f32 to vector<8x8xf32>
    %109 = arith.mulf %107, %108 : vector<8x8xf32>
    %110 = arith.addf %109, %11 : vector<8x8xf32>
    %cst_40 = arith.constant dense<0xFF800000> : vector<8xf32>
    %111 = vector.multi_reduction <maximumf>, %110, %cst_40 [1] : vector<8x8xf32> to vector<8xf32>
    %112 = vector.shape_cast %111 : vector<8xf32> to vector<8x1xf32>
    %113 = vector.broadcast %112 : vector<8x1xf32> to vector<8x8xf32>
    %114 = arith.subf %110, %113 : vector<8x8xf32>
    %115 = math.exp %114 : vector<8x8xf32>
    %cst_41 = arith.constant dense<0.000000e+00> : vector<8xf32>
    %116 = vector.multi_reduction <add>, %115, %cst_41 [1] : vector<8x8xf32> to vector<8xf32>
    %117 = vector.shape_cast %116 : vector<8xf32> to vector<8x1xf32>
    %118 = tpu.reciprocal %117 {approx = true} : vector<8x1xf32> -> vector<8x1xf32>
    %119 = vector.broadcast %118 : vector<8x1xf32> to vector<8x8xf32>
    %120 = arith.mulf %115, %119 : vector<8x8xf32>
    %121 = arith.truncf %120 : vector<8x8xf32> to vector<8x8xbf16>
    %cst_42 = arith.constant dense<0.000000e+00> : vector<8x4xf32>
    %122 = tpu.matmul %121, %106, %cst_42 {dimension_numbers = #tpu.dot_dimension_numbers<[1], [0], [0], [1], [0, 0, 1, 1], [], []>} : vector<8x8xbf16>, vector<8x4xbf16>, vector<8x4xf32> -> vector<8x4xf32>
    %123 = arith.truncf %122 : vector<8x4xf32> to vector<8x4xbf16>
    %c0_43 = arith.constant 0 : index
    %c0_44 = arith.constant 0 : index
    %c16 = arith.constant 16 : index
    %124 = vector.load %arg4[%c0_43, %c0_44, %c16] : memref<1x8x32xbf16, #tpu.memory_space<vmem>>, vector<1x8x4xbf16>
    %125 = vector.shape_cast %124 : vector<1x8x4xbf16> to vector<8x4xbf16>
    %126 = vector.shape_cast %123 : vector<8x4xbf16> to vector<1x8x4xbf16>
    tpu.vector_store %arg4[%c0_43, %c0_44, %c16], %126 {strides = array<i32>} : memref<1x8x32xbf16, #tpu.memory_space<vmem>>, vector<1x8x4xbf16>,
    %127 = vector.extract_strided_slice %1 {offsets = [0, 20], sizes = [8, 4], strides = [1, 1]} : vector<8x32xbf16> to vector<8x4xbf16>
    %128 = vector.extract_strided_slice %3 {offsets = [0, 20], sizes = [8, 4], strides = [1, 1]} : vector<8x32xbf16> to vector<8x4xbf16>
    %129 = vector.extract_strided_slice %5 {offsets = [0, 20], sizes = [8, 4], strides = [1, 1]} : vector<8x32xbf16> to vector<8x4xbf16>
    %cst_45 = arith.constant dense<0.000000e+00> : vector<8x8xf32>
    %130 = tpu.matmul %127, %128, %cst_45 {dimension_numbers = #tpu.dot_dimension_numbers<[1], [1], [0], [0], [0, 0, 1, 0], [], []>} : vector<8x4xbf16>, vector<8x4xbf16>, vector<8x8xf32> -> vector<8x8xf32>
    %cst_46 = arith.constant 5.000000e-01 : f32
    %131 = vector.broadcast %cst_46 : f32 to vector<8x8xf32>
    %132 = arith.mulf %130, %131 : vector<8x8xf32>
    %133 = arith.addf %132, %11 : vector<8x8xf32>
    %cst_47 = arith.constant dense<0xFF800000> : vector<8xf32>
    %134 = vector.multi_reduction <maximumf>, %133, %cst_47 [1] : vector<8x8xf32> to vector<8xf32>
    %135 = vector.shape_cast %134 : vector<8xf32> to vector<8x1xf32>
    %136 = vector.broadcast %135 : vector<8x1xf32> to vector<8x8xf32>
    %137 = arith.subf %133, %136 : vector<8x8xf32>
    %138 = math.exp %137 : vector<8x8xf32>
    %cst_48 = arith.constant dense<0.000000e+00> : vector<8xf32>
    %139 = vector.multi_reduction <add>, %138, %cst_48 [1] : vector<8x8xf32> to vector<8xf32>
    %140 = vector.shape_cast %139 : vector<8xf32> to vector<8x1xf32>
    %141 = tpu.reciprocal %140 {approx = true} : vector<8x1xf32> -> vector<8x1xf32>
    %142 = vector.broadcast %141 : vector<8x1xf32> to vector<8x8xf32>
    %143 = arith.mulf %138, %142 : vector<8x8xf32>
    %144 = arith.truncf %143 : vector<8x8xf32> to vector<8x8xbf16>
    %cst_49 = arith.constant dense<0.000000e+00> : vector<8x4xf32>
    %145 = tpu.matmul %144, %129, %cst_49 {dimension_numbers = #tpu.dot_dimension_numbers<[1], [0], [0], [1], [0, 0, 1, 1], [], []>} : vector<8x8xbf16>, vector<8x4xbf16>, vector<8x4xf32> -> vector<8x4xf32>
    %146 = arith.truncf %145 : vector<8x4xf32> to vector<8x4xbf16>
    %c0_50 = arith.constant 0 : index
    %c0_51 = arith.constant 0 : index
    %c20 = arith.constant 20 : index
    %147 = vector.load %arg4[%c0_50, %c0_51, %c20] : memref<1x8x32xbf16, #tpu.memory_space<vmem>>, vector<1x8x4xbf16>
    %148 = vector.shape_cast %147 : vector<1x8x4xbf16> to vector<8x4xbf16>
    %149 = vector.shape_cast %146 : vector<8x4xbf16> to vector<1x8x4xbf16>
    tpu.vector_store %arg4[%c0_50, %c0_51, %c20], %149 {strides = array<i32>} : memref<1x8x32xbf16, #tpu.memory_space<vmem>>, vector<1x8x4xbf16>,
    %150 = vector.extract_strided_slice %1 {offsets = [0, 24], sizes = [8, 4], strides = [1, 1]} : vector<8x32xbf16> to vector<8x4xbf16>
    %151 = vector.extract_strided_slice %3 {offsets = [0, 24], sizes = [8, 4], strides = [1, 1]} : vector<8x32xbf16> to vector<8x4xbf16>
    %152 = vector.extract_strided_slice %5 {offsets = [0, 24], sizes = [8, 4], strides = [1, 1]} : vector<8x32xbf16> to vector<8x4xbf16>
    %cst_52 = arith.constant dense<0.000000e+00> : vector<8x8xf32>
    %153 = tpu.matmul %150, %151, %cst_52 {dimension_numbers = #tpu.dot_dimension_numbers<[1], [1], [0], [0], [0, 0, 1, 0], [], []>} : vector<8x4xbf16>, vector<8x4xbf16>, vector<8x8xf32> -> vector<8x8xf32>
    %cst_53 = arith.constant 5.000000e-01 : f32
    %154 = vector.broadcast %cst_53 : f32 to vector<8x8xf32>
    %155 = arith.mulf %153, %154 : vector<8x8xf32>
    %156 = arith.addf %155, %11 : vector<8x8xf32>
    %cst_54 = arith.constant dense<0xFF800000> : vector<8xf32>
    %157 = vector.multi_reduction <maximumf>, %156, %cst_54 [1] : vector<8x8xf32> to vector<8xf32>
    %158 = vector.shape_cast %157 : vector<8xf32> to vector<8x1xf32>
    %159 = vector.broadcast %158 : vector<8x1xf32> to vector<8x8xf32>
    %160 = arith.subf %156, %159 : vector<8x8xf32>
    %161 = math.exp %160 : vector<8x8xf32>
    %cst_55 = arith.constant dense<0.000000e+00> : vector<8xf32>
    %162 = vector.multi_reduction <add>, %161, %cst_55 [1] : vector<8x8xf32> to vector<8xf32>
    %163 = vector.shape_cast %162 : vector<8xf32> to vector<8x1xf32>
    %164 = tpu.reciprocal %163 {approx = true} : vector<8x1xf32> -> vector<8x1xf32>
    %165 = vector.broadcast %164 : vector<8x1xf32> to vector<8x8xf32>
    %166 = arith.mulf %161, %165 : vector<8x8xf32>
    %167 = arith.truncf %166 : vector<8x8xf32> to vector<8x8xbf16>
    %cst_56 = arith.constant dense<0.000000e+00> : vector<8x4xf32>
    %168 = tpu.matmul %167, %152, %cst_56 {dimension_numbers = #tpu.dot_dimension_numbers<[1], [0], [0], [1], [0, 0, 1, 1], [], []>} : vector<8x8xbf16>, vector<8x4xbf16>, vector<8x4xf32> -> vector<8x4xf32>
    %169 = arith.truncf %168 : vector<8x4xf32> to vector<8x4xbf16>
    %c0_57 = arith.constant 0 : index
    %c0_58 = arith.constant 0 : index
    %c24 = arith.constant 24 : index
    %170 = vector.load %arg4[%c0_57, %c0_58, %c24] : memref<1x8x32xbf16, #tpu.memory_space<vmem>>, vector<1x8x4xbf16>
    %171 = vector.shape_cast %170 : vector<1x8x4xbf16> to vector<8x4xbf16>
    %172 = vector.shape_cast %169 : vector<8x4xbf16> to vector<1x8x4xbf16>
    tpu.vector_store %arg4[%c0_57, %c0_58, %c24], %172 {strides = array<i32>} : memref<1x8x32xbf16, #tpu.memory_space<vmem>>, vector<1x8x4xbf16>,
    %173 = vector.extract_strided_slice %1 {offsets = [0, 28], sizes = [8, 4], strides = [1, 1]} : vector<8x32xbf16> to vector<8x4xbf16>
    %174 = vector.extract_strided_slice %3 {offsets = [0, 28], sizes = [8, 4], strides = [1, 1]} : vector<8x32xbf16> to vector<8x4xbf16>
    %175 = vector.extract_strided_slice %5 {offsets = [0, 28], sizes = [8, 4], strides = [1, 1]} : vector<8x32xbf16> to vector<8x4xbf16>
    %cst_59 = arith.constant dense<0.000000e+00> : vector<8x8xf32>
    %176 = tpu.matmul %173, %174, %cst_59 {dimension_numbers = #tpu.dot_dimension_numbers<[1], [1], [0], [0], [0, 0, 1, 0], [], []>} : vector<8x4xbf16>, vector<8x4xbf16>, vector<8x8xf32> -> vector<8x8xf32>
    %cst_60 = arith.constant 5.000000e-01 : f32
    %177 = vector.broadcast %cst_60 : f32 to vector<8x8xf32>
    %178 = arith.mulf %176, %177 : vector<8x8xf32>
    %179 = arith.addf %178, %11 : vector<8x8xf32>
    %cst_61 = arith.constant dense<0xFF800000> : vector<8xf32>
    %180 = vector.multi_reduction <maximumf>, %179, %cst_61 [1] : vector<8x8xf32> to vector<8xf32>
    %181 = vector.shape_cast %180 : vector<8xf32> to vector<8x1xf32>
    %182 = vector.broadcast %181 : vector<8x1xf32> to vector<8x8xf32>
    %183 = arith.subf %179, %182 : vector<8x8xf32>
    %184 = math.exp %183 : vector<8x8xf32>
    %cst_62 = arith.constant dense<0.000000e+00> : vector<8xf32>
    %185 = vector.multi_reduction <add>, %184, %cst_62 [1] : vector<8x8xf32> to vector<8xf32>
    %186 = vector.shape_cast %185 : vector<8xf32> to vector<8x1xf32>
    %187 = tpu.reciprocal %186 {approx = true} : vector<8x1xf32> -> vector<8x1xf32>
    %188 = vector.broadcast %187 : vector<8x1xf32> to vector<8x8xf32>
    %189 = arith.mulf %184, %188 : vector<8x8xf32>
    %190 = arith.truncf %189 : vector<8x8xf32> to vector<8x8xbf16>
    %cst_63 = arith.constant dense<0.000000e+00> : vector<8x4xf32>
    %191 = tpu.matmul %190, %175, %cst_63 {dimension_numbers = #tpu.dot_dimension_numbers<[1], [0], [0], [1], [0, 0, 1, 1], [], []>} : vector<8x8xbf16>, vector<8x4xbf16>, vector<8x4xf32> -> vector<8x4xf32>
    %192 = arith.truncf %191 : vector<8x4xf32> to vector<8x4xbf16>
    %c0_64 = arith.constant 0 : index
    %c0_65 = arith.constant 0 : index
    %c28 = arith.constant 28 : index
    %193 = vector.load %arg4[%c0_64, %c0_65, %c28] : memref<1x8x32xbf16, #tpu.memory_space<vmem>>, vector<1x8x4xbf16>
    %194 = vector.shape_cast %193 : vector<1x8x4xbf16> to vector<8x4xbf16>
    %195 = vector.shape_cast %192 : vector<8x4xbf16> to vector<1x8x4xbf16>
    tpu.vector_store %arg4[%c0_64, %c0_65, %c28], %195 {strides = array<i32>} : memref<1x8x32xbf16, #tpu.memory_space<vmem>>, vector<1x8x4xbf16>,
    return
  }
  func.func @transform_0(%arg0: i32) -> (i32, i32, i32) {
    %c0_i32 = arith.constant 0 : i32
    %c0_i32_0 = arith.constant 0 : i32
    %c0_i32_1 = arith.constant 0 : i32
    return %arg0, %c0_i32, %c0_i32_0 : i32, i32, i32
  }
  func.func @transform_1(%arg0: i32) -> (i32, i32, i32) {
    %c0_i32 = arith.constant 0 : i32
    %c0_i32_0 = arith.constant 0 : i32
    %c0_i32_1 = arith.constant 0 : i32
    return %arg0, %c0_i32, %c0_i32_0 : i32, i32, i32
  }
  func.func @transform_2(%arg0: i32) -> (i32, i32, i32) {
    %c0_i32 = arith.constant 0 : i32
    %c0_i32_0 = arith.constant 0 : i32
    %c0_i32_1 = arith.constant 0 : i32
    return %arg0, %c0_i32, %c0_i32_0 : i32, i32, i32
  }
  func.func @transform_3(%arg0: i32) -> (i32, i32, i32) {
    %c0_i32 = arith.constant 0 : i32
    %c0_i32_0 = arith.constant 0 : i32
    %c0_i32_1 = arith.constant 0 : i32
    return %arg0, %c0_i32, %c0_i32_0 : i32, i32, i32
  }
}

module attributes {stable_mosaic.version = 11 : i64} {
  func.func @_linear_kernel(%arg0: i32, %arg1: i32, %arg2: i32, %arg3: memref<16x32xbf16, #tpu.memory_space<vmem>>, %arg4: memref<32x32xbf16, #tpu.memory_space<vmem>>, %arg5: memref<1x32xbf16, #tpu.memory_space<vmem>>, %arg6: memref<16x32xf32, #tpu.memory_space<vmem>>, %arg7: memref<16x32xf32, #tpu.memory_space<vmem>>) attributes {dimension_semantics = [#tpu.dimension_semantics<parallel>, #tpu.dimension_semantics<parallel>, #tpu.dimension_semantics<arbitrary>], iteration_bounds = array<i64: 1, 1, 1>, scalar_prefetch = 0 : i64, scratch_operands = 1 : i64, tpu.core_type = #tpu.core_type<tc>, window_params = [{transform_indices = @transform_0, window_bounds = array<i64: 16, 32>}, {transform_indices = @transform_1, window_bounds = array<i64: 32, 32>}, {transform_indices = @transform_2, window_bounds = array<i64: 1, 32>}, {transform_indices = @transform_3, window_bounds = array<i64: 16, 32>}]} {
    %c0_i32 = arith.constant 0 : i32
    %0 = arith.cmpi eq, %arg2, %c0_i32 : i32
    %1 = arith.extui %0 : i1 to i32
    %c0_i32_0 = arith.constant 0 : i32
    %2 = arith.cmpi ne, %1, %c0_i32_0 : i32
    scf.if %2 {
      %cst_10 = arith.constant 0.000000e+00 : f32
      %12 = vector.broadcast %cst_10 : f32 to vector<16x32xf32>
      %c0_11 = arith.constant 0 : index
      %c0_12 = arith.constant 0 : index
      %13 = vector.load %arg7[%c0_11, %c0_12] : memref<16x32xf32, #tpu.memory_space<vmem>>, vector<16x32xf32>
      tpu.vector_store %arg7[%c0_11, %c0_12], %12 {strides = array<i32>} : memref<16x32xf32, #tpu.memory_space<vmem>>, vector<16x32xf32>,
    } else {
    }
    %c0 = arith.constant 0 : index
    %c0_1 = arith.constant 0 : index
    %3 = vector.load %arg7[%c0, %c0_1] : memref<16x32xf32, #tpu.memory_space<vmem>>, vector<16x32xf32>
    %c0_2 = arith.constant 0 : index
    %c0_3 = arith.constant 0 : index
    %4 = vector.load %arg3[%c0_2, %c0_3] : memref<16x32xbf16, #tpu.memory_space<vmem>>, vector<16x32xbf16>
    %c0_4 = arith.constant 0 : index
    %c0_5 = arith.constant 0 : index
    %5 = vector.load %arg4[%c0_4, %c0_5] : memref<32x32xbf16, #tpu.memory_space<vmem>>, vector<32x32xbf16>
    %cst = arith.constant dense<0.000000e+00> : vector<16x32xf32>
    %6 = tpu.matmul %4, %5, %cst {dimension_numbers = #tpu.dot_dimension_numbers<[1], [0], [0], [1], [0, 0, 1, 1], [], []>} : vector<16x32xbf16>, vector<32x32xbf16>, vector<16x32xf32> -> vector<16x32xf32>
    %7 = arith.addf %3, %6 : vector<16x32xf32>
    %c0_6 = arith.constant 0 : index
    %c0_7 = arith.constant 0 : index
    %8 = vector.load %arg7[%c0_6, %c0_7] : memref<16x32xf32, #tpu.memory_space<vmem>>, vector<16x32xf32>
    tpu.vector_store %arg7[%c0_6, %c0_7], %7 {strides = array<i32>} : memref<16x32xf32, #tpu.memory_space<vmem>>, vector<16x32xf32>,
    %c0_i32_8 = arith.constant 0 : i32
    %9 = arith.cmpi eq, %arg2, %c0_i32_8 : i32
    %10 = arith.extui %9 : i1 to i32
    %c0_i32_9 = arith.constant 0 : i32
    %11 = arith.cmpi ne, %10, %c0_i32_9 : i32
    scf.if %11 {
      %c0_10 = arith.constant 0 : index
      %c0_11 = arith.constant 0 : index
      %12 = vector.load %arg7[%c0_10, %c0_11] : memref<16x32xf32, #tpu.memory_space<vmem>>, vector<16x32xf32>
      %c0_12 = arith.constant 0 : index
      %c0_13 = arith.constant 0 : index
      %13 = vector.load %arg5[%c0_12, %c0_13] : memref<1x32xbf16, #tpu.memory_space<vmem>>, vector<1x32xbf16>
      %14 = arith.extf %13 : vector<1x32xbf16> to vector<1x32xf32>
      %15 = vector.broadcast %14 : vector<1x32xf32> to vector<16x32xf32>
      %16 = arith.addf %12, %15 : vector<16x32xf32>
      %cst_14 = arith.constant dense<0xFF800000> : vector<16xf32>
      %17 = vector.multi_reduction <maximumf>, %16, %cst_14 [1] : vector<16x32xf32> to vector<16xf32>
      %18 = vector.shape_cast %17 : vector<16xf32> to vector<16x1xf32>
      %19 = vector.broadcast %18 : vector<16x1xf32> to vector<16x32xf32>
      %20 = arith.subf %16, %19 : vector<16x32xf32>
      %21 = math.exp %20 : vector<16x32xf32>
      %cst_15 = arith.constant dense<0.000000e+00> : vector<16xf32>
      %22 = vector.multi_reduction <add>, %21, %cst_15 [1] : vector<16x32xf32> to vector<16xf32>
      %23 = vector.shape_cast %22 : vector<16xf32> to vector<16x1xf32>
      %24 = tpu.reciprocal %23 : vector<16x1xf32> -> vector<16x1xf32>
      %25 = vector.broadcast %24 : vector<16x1xf32> to vector<16x32xf32>
      %26 = arith.mulf %21, %25 : vector<16x32xf32>
      %c0_16 = arith.constant 0 : index
      %c0_17 = arith.constant 0 : index
      %27 = vector.load %arg6[%c0_16, %c0_17] : memref<16x32xf32, #tpu.memory_space<vmem>>, vector<16x32xf32>
      tpu.vector_store %arg6[%c0_16, %c0_17], %26 {strides = array<i32>} : memref<16x32xf32, #tpu.memory_space<vmem>>, vector<16x32xf32>,
    } else {
    }
    return
  }
  func.func @transform_0(%arg0: i32, %arg1: i32, %arg2: i32) -> (i32, i32) {
    %c0_i32 = arith.constant 0 : i32
    return %arg0, %arg2 : i32, i32
  }
  func.func @transform_1(%arg0: i32, %arg1: i32, %arg2: i32) -> (i32, i32) {
    %c0_i32 = arith.constant 0 : i32
    return %arg2, %arg1 : i32, i32
  }
  func.func @transform_2(%arg0: i32, %arg1: i32, %arg2: i32) -> (i32, i32) {
    %c0_i32 = arith.constant 0 : i32
    %c0_i32_0 = arith.constant 0 : i32
    return %c0_i32, %arg1 : i32, i32
  }
  func.func @transform_3(%arg0: i32, %arg1: i32, %arg2: i32) -> (i32, i32) {
    %c0_i32 = arith.constant 0 : i32
    return %arg0, %arg1 : i32, i32
  }
}

</mosaic_0001>

<bundles_post_ra>
// kernel: transformer_forward.25
= control target key start
LH: loop header
LB: loop body
LE: loop exit
PB: predicated region body
PF: predicated region fallthrough
CT: control target
= control target key end

     0   :  { %vm19_vm0 = vcmask 785408   ;;  %v149_v0 = vmov 0.0   ;;  %vm150_vm1 = vmmov 0   ;;  %vm47_vm2 = vcmask 261120   ;;  %s193_s1 = inlined_call_operand.vmem [shape: bf16[32,96], index: 1, kind: input, shape index: {}]   ;;  %s194_s0 = inlined_call_operand.vmem [shape: bf16[16,32], index: 0, kind: input, shape index: {}]   ;;  %s195_s2 = inlined_call_operand.vmem [shape: bf16[1,96], index: 2, kind: input, shape index: {}]   ;;  %s196_s3 = inlined_call_operand.vmem [shape: bf16[16,96], index: 3, kind: output, shape index: {}]  }
   0x1   :  { %136 = vmatprep.subr.bf16.mxu0 %v149_v0  ;;  %v146_v1 = vld [vmem:[%s193_s1] sm:$0xff]   ;;  %140 = vmatprep.mubr.msk.bf16.mxu0 %vm150_vm1, %v149_v0  ;;  %20 = vst.msk [vmem:[#allocation2] sm:$0xff] %vm19_vm0, %v149_v0  ;;  %21 = vst.msk [vmem:[#allocation2 + $0x8] sm:$0xff] %vm19_vm0, %v149_v0  ;;  %v147_v2 = vld [vmem:[%s193_s1 + $0x8] sm:$0xff]   ;;  %v104_v4 = vlaneseq  ;;  %vm118_vm3 = vcmask 781312  }
   0x2   :  { %137 = vmatpush3.bf16.msra.mxu0 %v146_v1  ;;  %v148_v3 = vld [vmem:[%s194_s0] sm:$0xff]  }
   0x3   :  { %138 = vmatprep.subr.bf16.mxu0 %v149_v0  ;;  %v105_v6 = vshrl.u32 %v104_v4, 7  ;;  %v102_v8 = vld [vmem:[%s195_s2] sm:$0x1] }
   0x4   :  { %v103_v13 = vunpack.c.l.bf16 %v102_v8 }
   0x5   :  { %v106_v14 = vsub.s32 0, %v105_v6 }
   0x6   :  { %139 = vmatpush3.bf16.msra.mxu0 %v147_v2 }
   0x7   :  { %v107_v17 = vrot.slane %v103_v13, %v106_v14 }
   0x8   :  { %v22_v5 = vld [vmem:[#allocation2] sm:$0xff]  ;;  %v23_v9 = vld [vmem:[#allocation2 + $0x8] sm:$0xff] }
   0x9   :  { %141 = vmatmul.mubr.msk.bf16.vlgmr.msra.gmra.mrb[0].mxu0 %vm47_vm2, %v148_v3 }
  0xdc   :  { %v85_v7 = vpop.f32.mrb[0].mxu0 }
  0xdd   :  { %v92_v10 = vadd.f32 %v85_v7, %v22_v5  ;;  %v142_v11 = vpop.f32.mrb[1].mxu0 }
  0xde   :  { %v88_v12 = vpop.f32.mrb[2].mxu0 }
  0xdf   :  { %95 = vst.msk [vmem:[#allocation2] sm:$0xff] %vm19_vm0, %v92_v10  ;;  %v93_v15 = vadd.f32 %v88_v12, %v23_v9  ;;  %v143_v16 = vpop.f32.mrb[3].mxu0 }
  0xe1   :  { %96 = vst.msk [vmem:[#allocation2 + $0x8] sm:$0xff] %vm19_vm0, %v93_v15 }
  0xe6   :  { %v100_v18 = vld [vmem:[#allocation2] sm:$0xff] }
  0xe7   :  { %v108_v19 = vadd.f32 %v107_v17, %v100_v18 }
  0xe8   :  { %v101_v20 = vld [vmem:[#allocation2 + $0x8] sm:$0xff] }
  0xe9   :  { %v131_v21 = vpack.c.bf16 %v108_v19, %v108_v19  ;;  %v109_v22 = vadd.f32 %v107_v17, %v101_v20 }
  0xeb   :  { %119 = vst.msk [vmem:[%s196_s3] sm:$0xf] %vm118_vm3, %v131_v21  ;;  %v132_v23 = vpack.c.bf16 %v109_v22, %v109_v22 }
  0xed   :  { %120 = vst.msk [vmem:[%s196_s3 + $0x4] sm:$0xf] %vm118_vm3, %v132_v23 }

// kernel: transformer_forward.26
= control target key start
LH: loop header
LB: loop body
LE: loop exit
PB: predicated region body
PF: predicated region fallthrough
CT: control target
= control target key end

     0   :  { %s1516_s12 = smov 0   ;;  %s1689_s0 = inlined_call_operand.vmem [shape: bf16[2,8,32], index: 0, kind: input, shape index: {}]   ;;  %s1690_s1 = inlined_call_operand.vmem [shape: bf16[2,8,32], index: 1, kind: input, shape index: {}]   ;;  %s1691_s2 = inlined_call_operand.vmem [shape: bf16[2,8,32], index: 2, kind: input, shape index: {}]   ;;  %s1692_s3 = inlined_call_operand.vmem [shape: bf16[2,8,32], index: 3, kind: output, shape index: {}]  }
   0x1 LB: > { %s1241_s13 = sadd.s32 4294967295, %s1478_s12   ;;  %p1245_p0 = scmp.ge.s32.totalorder %s1478_s12, 1  ;;  %s1478_s12 = sphi %s1516_s12, %s13_s12  }
   0x2   : > { %p154_p1 = scmp.lt.s32.totalorder %s1478_s12, 3 }
   0x4   : > { %p155_p2 = pnand %p1245_p0, %p154_p1 }
   0x5   : > { %p184_p3 = scmp.lt.s32.totalorder (!%p155_p2), %s1241_s13, 1  ;;  %v1480_v0 = vmov (!%p155_p2), 0.0   ;;  %vm1481_vm0 = vmmov (!%p155_p2), 0   ;;  %vm204_vm1 = vcmask (!%p155_p2), 31744   ;;  %vm252_vm2 = vcmask (!%p155_p2), 64512   ;;  %s1482_s21 = smov (!%p155_p2), 124  }
   0x6   : > { %158 = sbr.rel (%p155_p2) target bundleno = 1508 (0x5e4), region = 32  ;;  %1317 = vmatprep.subr.bf16.mxu0 (!%p155_p2), %v1480_v0  ;;  %1319 = vmatprep.mubr.msk.bf16.mxu0 (!%p155_p2), %vm1481_vm0, %v1480_v0  ;;  %s1483_s22 = smov (!%p155_p2), 120   ;;  %vm268_vm3 = vcmask (!%p155_p2), 1043456   ;;  %vm313_vm4 = vcmask (!%p155_p2), 27648   ;;  %vm442_vm5 = vcmask (!%p155_p2), 60448   ;;  %vm562_vm6 = vcmask (!%p155_p2), 93248  }
   0x7   : > { %1323 = vmatprep.subr.bf16.mxu1 (!%p155_p2), %v1480_v0  ;;  %1325 = vmatprep.mubr.msk.bf16.mxu1 (!%p155_p2), %vm1481_vm0, %v1480_v0  ;;  %s1484_s23 = smov (!%p155_p2), 116   ;;  %s1485_s24 = smov (!%p155_p2), 112   ;;  %vm682_vm7 = vcmask (!%p155_p2), 126048   ;;  %vm802_vm8 = vcmask (!%p155_p2), 158848   ;;  %vm922_vm9 = vcmask (!%p155_p2), 191648   ;;  %vm1042_vm10 = vcmask (!%p155_p2), 224448  }
   0x8   : > { %s1486_s25 = smov (!%p155_p2), 108   ;;  %s1487_s26 = smov (!%p155_p2), 104   ;;  %vm1162_vm11 = vcmask (!%p155_p2), 257248  }
   0x9   : > { %s1488_s27 = smov (!%p155_p2), 100   ;;  %s1489_s7 = smov (!%p155_p2), 4  }
   0xa   : > { %s1490_s8 = smov (!%p155_p2), 8   ;;  %s1491_s9 = smov (!%p155_p2), 12  }
   0xb   : > { %s1492_s10 = smov (!%p155_p2), 16   ;;  %s1493_s11 = smov (!%p155_p2), 20  }
   0xd   : > { %s1694_s13 = smov (!%p184_p3, %s1241_s13), 1 }
   0xe   : > { %s1530_s14 = sshll.u32 %s1694_s13, 2  ;;  %s1494_s13 = smov 24  }
   0xf   : > { %s191_s17 = scalar_lea.vmem %s1690_s1, %s1530_s14  ;;  %s187_s20 = scalar_lea.vmem %s1689_s0, %s1530_s14 }
  0x10   : > { %v202_v1 = vld [vmem:[%s191_s17] sm:$0xf]  ;;  %s195_s30 = scalar_lea.vmem %s1691_s2, %s1530_s14  ;;  %s1609_s6 = scalar_lea.vmem %s1692_s3, %s1530_s14 }
  0x11   : > { %v209_v2 = vsel %vm204_vm1, %v202_v1, 0  ;;  %v201_v3 = vld [vmem:[%s187_s20] sm:$0xf]  ;;  %v1253_v10 = vcombine.low %v202_v1, %v202_v1  ;;  %s1495_s14 = smov 28  }
  0x12   : > { %1318 = vmatpush3.bf16.xpose.msra.mxu0 %v209_v2  ;;  %v1252_v11 = vcombine.low %v201_v3, %v201_v3  ;;  %v1561_v17 = vld [vmem:[%s195_s30] sm:$0xf] }
  0x13   : > { %1335 = vmatprep.subr.bf16.mxu0 %v1480_v0  ;;  %323 = vrot.lane.b32.xlu1 %v1253_v10, %s1482_s21  ;;  %v270_v18 = vsel %vm268_vm3, %v1561_v17, 0 }
  0x14   : > { %1324 = vmatpush3.bf16.msra.mxu1 %v270_v18 }
  0x15   : > { %1329 = vmatprep.subr.bf16.mxu1 %v1480_v0 }
  0x17   : > { %318 = vrot.lane.b32.xlu1 %v1252_v11, %s1482_s21 }
  0x19   : > { %1320 = vmatmul.mubr.msk.bf16.vlgmr.msra.gmra.mrb[0].mxu0 %vm204_vm1, %v201_v3 }
  0x1a   : > { %1337 = vmatprep.mubr.msk.bf16.mxu0 %vm1481_vm0, %v1480_v0 }
  0x1b   : > { %444 = vrot.lane.b32.xlu1 %v1252_v11, %s1483_s22 }
  0x1f   : > { %566 = vrot.lane.b32.xlu1 %v1253_v10, %s1484_s23 }
  0x23   : > { %564 = vrot.lane.b32.xlu1 %v1252_v11, %s1484_s23 }
  0x27   : > { %686 = vrot.lane.b32.xlu1 %v1253_v10, %s1485_s24 }
  0x2b   : > { %684 = vrot.lane.b32.xlu1 %v1252_v11, %s1485_s24 }
  0x2f   : > { %806 = vrot.lane.b32.xlu1 %v1253_v10, %s1486_s25 }
  0x33   : > { %926 = vrot.lane.b32.xlu1 %v1253_v10, %s1487_s26 }
  0x37   : > { %1046 = vrot.lane.b32.xlu1 %v1253_v10, %s1488_s27 }
  0x85   : > { %v324_v20 = vpop.permute.xlu1 %323 }
  0x86   : > { %v329_v25 = vsel %vm204_vm1, %v324_v20, 0 }
  0x89   : > { %v319_v21 = vpop.permute.xlu1 %318 }
  0x8d   : > { %v445_v24 = vpop.permute.xlu1 %444 }
  0x91   : > { %v567_v28 = vpop.permute.xlu1 %566 }
  0x92   : > { %v572_v31 = vsel %vm204_vm1, %v567_v28, 0 }
  0x95   : > { %v565_v30 = vpop.permute.xlu1 %564 }
  0x99   : > { %v687_v32 = vpop.permute.xlu1 %686 }
  0x9a   : > { %v692_v34 = vsel %vm204_vm1, %v687_v32, 0 }
  0x9d   : > { %v685_v33 = vpop.permute.xlu1 %684 }
  0xa1   : > { %v807_v35 = vpop.permute.xlu1 %806 }
  0xa2   : > { %v812_v36 = vsel %vm204_vm1, %v807_v35, 0 }
  0xa5   : > { %v927_v37 = vpop.permute.xlu1 %926 }
  0xa6   : > { %v932_v39 = vsel %vm204_vm1, %v927_v37, 0 }
  0xa9   : > { %v1047_v40 = vpop.permute.xlu1 %1046 }
  0xaa   : > { %v1052_v42 = vsel %vm204_vm1, %v1047_v40, 0 }
  0xec   : > { %v245_v4 = vpop.f32.mrb[0].mxu0 }
  0xed   : > { %v251_v5 = vmul.f32 0.5, %v245_v4  ;;  %v1321_v6 = vpop.f32.mrb[1].mxu0 }
  0xee   : > { %v248_v7 = vpop.f32.mrb[2].mxu0 }
  0xef   : > { %v1322_v8 = vpop.f32.mrb[3].mxu0  ;;  %v253_v9 = vsel %vm252_vm2, %v251_v5, -inf }
  0xf0   : > { %254 = vmax.xlane.f32.xlu0 %v253_v9 }
 0x17d   : > { %v255_v12 = vpop.xlane.xlu0 %254 }
 0x17e   : > { %v256_v13 = vsub.f32 %v251_v5, %v255_v12 }
 0x180   : > { %v257_v14 = vmul.f32 1.442695, %v256_v13 }
 0x182   : > { %1440 = vpow2.f32 %v257_v14 }
 0x18c   : > { %v1441_v15 = vpop.eup %1440 }
 0x18d   : > { %v259_v16 = vsel %vm252_vm2, %v1441_v15, 0.0 }
 0x18e   : > { %260 = vadd.xlane.f32.xlu0 %v259_v16 }
 0x1a4   : > { %446 = vrot.lane.b32.xlu0 %v1253_v10, %s1483_s22 }
 0x1a8   : > { %804 = vrot.lane.b32.xlu0 %v1252_v11, %s1486_s25 }
 0x1ac   : > { %924 = vrot.lane.b32.xlu0 %v1252_v11, %s1487_s26 }
 0x1b0   : > { %1044 = vrot.lane.b32.xlu0 %v1252_v11, %s1488_s27 }
 0x21b   : > { %v261_v19 = vpop.xlane.xlu0 %260 }
 0x21c   : > { %1442 = vrcp.f32 %v261_v19 }
 0x21f   : > { %v447_v27 = vpop.permute.xlu0 %446 }
 0x220   : > { %v452_v29 = vsel %vm204_vm1, %v447_v27, 0 }
 0x223   : > { %v805_v38 = vpop.permute.xlu0 %804 }
 0x226   : > { %v1443_v22 = vpop.eup %1442 }
 0x227   : > { %v263_v23 = vmul.f32 %v1443_v22, %v1441_v15  ;;  %v925_v41 = vpop.permute.xlu0 %924 }
 0x229   : > { %v264_v26 = vpack.c.bf16 %v263_v23, %v263_v23 }
 0x22b   : > { %1326 = vmatmul.mubr.msk.bf16.vlgmr.msra.gmra.mrb[0].mxu1 %vm252_vm2, %v264_v26  ;;  %v1045_v43 = vpop.permute.xlu0 %1044 }
 0x22c   : > { %1330 = vmatpush3.bf16.xpose.msra.mxu1 %v329_v25  ;;  %1331 = vmatprep.mubr.msk.bf16.mxu1 %vm1481_vm0, %v1480_v0 }
 0x22d   : > { %1341 = vmatprep.subr.bf16.mxu1 %v1480_v0 }
 0x233   : > { %1332 = vmatmul.mubr.msk.bf16.vlgmr.msra.gmra.mrb[4].mxu1 %vm204_vm1, %v319_v21 }
 0x234   : > { %1342 = vmatpush3.bf16.xpose.msra.mxu1 %v452_v29  ;;  %1343 = vmatprep.mubr.msk.bf16.mxu1 %vm1481_vm0, %v1480_v0  ;;  %v1255_v29 = vcombine.low %v1561_v17, %v1561_v17 }
 0x235   : > { %1353 = vmatprep.subr.bf16.mxu1 %v1480_v0 }
 0x23b   : > { %1344 = vmatmul.mubr.msk.bf16.vlgmr.msra.gmra.mrb[8].mxu1 %vm204_vm1, %v445_v24 }
 0x23c   : > { %1354 = vmatpush3.bf16.xpose.msra.mxu1 %v572_v31  ;;  %1355 = vmatprep.mubr.msk.bf16.mxu1 %vm1481_vm0, %v1480_v0 }
 0x23d   : > { %1365 = vmatprep.subr.bf16.mxu1 %v1480_v0 }
 0x243   : > { %1356 = vmatmul.mubr.msk.bf16.vlgmr.msra.gmra.mrb[12].mxu1 %vm204_vm1, %v565_v30 }
 0x244   : > { %1366 = vmatpush3.bf16.xpose.msra.mxu1 %v692_v34  ;;  %1367 = vmatprep.mubr.msk.bf16.mxu1 %vm1481_vm0, %v1480_v0 }
 0x245   : > { %1377 = vmatprep.subr.bf16.mxu1 %v1480_v0 }
 0x24b   : > { %1368 = vmatmul.mubr.msk.bf16.vlgmr.msra.gmra.mrb[16].mxu1 %vm204_vm1, %v685_v33 }
 0x24c   : > { %1378 = vmatpush3.bf16.xpose.msra.mxu1 %v812_v36  ;;  %1379 = vmatprep.mubr.msk.bf16.mxu1 %vm1481_vm0, %v1480_v0 }
 0x24d   : > { %1389 = vmatprep.subr.bf16.mxu1 %v1480_v0 }
 0x253   : > { %1380 = vmatmul.mubr.msk.bf16.vlgmr.msra.gmra.mrb[20].mxu1 %vm204_vm1, %v805_v38 }
 0x254   : > { %1390 = vmatpush3.bf16.xpose.msra.mxu1 %v932_v39  ;;  %1391 = vmatprep.mubr.msk.bf16.mxu1 %vm1481_vm0, %v1480_v0 }
 0x255   : > { %1401 = vmatprep.subr.bf16.mxu1 %v1480_v0 }
 0x25b   : > { %1392 = vmatmul.mubr.msk.bf16.vlgmr.msra.gmra.mrb[24].mxu1 %vm204_vm1, %v925_v41 }
 0x25c   : > { %1402 = vmatpush3.bf16.xpose.msra.mxu1 %v1052_v42  ;;  %1403 = vmatprep.mubr.msk.bf16.mxu1 %vm1481_vm0, %v1480_v0 }
 0x263   : > { %1404 = vmatmul.mubr.msk.bf16.vlgmr.msra.gmra.mrb[28].mxu1 %vm204_vm1, %v1045_v43 }
 0x2fe   : > { %v306_v44 = vpop.f32.mrb[0].mxu1 }
 0x2ff   : > { %v312_v45 = vpack.c.bf16 %v306_v44, %v306_v44  ;;  %v1327_v46 = vpop.f32.mrb[1].mxu1 }
 0x300   : > { %v309_v47 = vpop.f32.mrb[2].mxu1 }
 0x301   : > { %314 = vst.msk [vmem:[%s1609_s6] sm:$0xf] %vm313_vm4, %v312_v45  ;;  %v1328_v48 = vpop.f32.mrb[3].mxu1 }
 0x306   : > { %v365_v49 = vpop.f32.mrb[4].mxu1 }
 0x307   : > { %v371_v50 = vmul.f32 0.5, %v365_v49  ;;  %v1333_v51 = vpop.f32.mrb[5].mxu1 }
 0x308   : > { %v368_v52 = vpop.f32.mrb[6].mxu1 }
 0x309   : > { %v1334_v53 = vpop.f32.mrb[7].mxu1  ;;  %v372_v54 = vsel %vm252_vm2, %v371_v50, -inf }
 0x30a   : > { %373 = vmax.xlane.f32.xlu1 %v372_v54 }
 0x30e   : > { %v488_v55 = vpop.f32.mrb[8].mxu1 }
 0x30f   : > { %v494_v56 = vmul.f32 0.5, %v488_v55  ;;  %v1345_v57 = vpop.f32.mrb[9].mxu1 }
 0x310   : > { %v491_v58 = vpop.f32.mrb[10].mxu1 }
 0x311   : > { %v1346_v59 = vpop.f32.mrb[11].mxu1  ;;  %v495_v60 = vsel %vm252_vm2, %v494_v56, -inf }
 0x312   : > { %496 = vmax.xlane.f32.xlu0 %v495_v60 }
 0x316   : > { %v608_v61 = vpop.f32.mrb[12].mxu1 }
 0x317   : > { %v614_v62 = vmul.f32 0.5, %v608_v61  ;;  %v1357_v63 = vpop.f32.mrb[13].mxu1 }
 0x318   : > { %v611_v1 = vpop.f32.mrb[14].mxu1 }
 0x319   : > { %v615_v2 = vsel %vm252_vm2, %v614_v62, -inf  ;;  %v1358_v3 = vpop.f32.mrb[15].mxu1 }
 0x31a   : > { %616 = vmax.xlane.f32.xlu0 %v615_v2 }
 0x31e   : > { %v728_v4 = vpop.f32.mrb[16].mxu1 }
 0x31f   : > { %v734_v5 = vmul.f32 0.5, %v728_v4  ;;  %v1369_v6 = vpop.f32.mrb[17].mxu1 }
 0x320   : > { %v731_v7 = vpop.f32.mrb[18].mxu1 }
 0x321   : > { %v735_v8 = vsel %vm252_vm2, %v734_v5, -inf  ;;  %v1370_v9 = vpop.f32.mrb[19].mxu1 }
 0x322   : > { %736 = vmax.xlane.f32.xlu1 %v735_v8 }
 0x326   : > { %v848_v10 = vpop.f32.mrb[20].mxu1 }
 0x327   : > { %v854_v11 = vmul.f32 0.5, %v848_v10  ;;  %v1381_v12 = vpop.f32.mrb[21].mxu1 }
 0x328   : > { %v851_v13 = vpop.f32.mrb[22].mxu1 }
 0x329   : > { %v855_v14 = vsel %vm252_vm2, %v854_v11, -inf  ;;  %v1382_v15 = vpop.f32.mrb[23].mxu1 }
 0x32a   : > { %856 = vmax.xlane.f32.xlu0 %v855_v14 }
 0x32e   : > { %v968_v16 = vpop.f32.mrb[24].mxu1 }
 0x32f   : > { %v974_v18 = vmul.f32 0.5, %v968_v16  ;;  %v1393_v19 = vpop.f32.mrb[25].mxu1 }
 0x330   : > { %v971_v20 = vpop.f32.mrb[26].mxu1 }
 0x331   : > { %v975_v21 = vsel %vm252_vm2, %v974_v18, -inf  ;;  %v1394_v22 = vpop.f32.mrb[27].mxu1 }
 0x332   : > { %976 = vmax.xlane.f32.xlu1 %v975_v21 }
 0x336   : > { %v1088_v23 = vpop.f32.mrb[28].mxu1 }
 0x337   : > { %v1094_v24 = vmul.f32 0.5, %v1088_v23  ;;  %v1405_v25 = vpop.f32.mrb[29].mxu1 }
 0x338   : > { %v1091_v26 = vpop.f32.mrb[30].mxu1 }
 0x339   : > { %v1095_v27 = vsel %vm252_vm2, %v1094_v24, -inf  ;;  %v1406_v28 = vpop.f32.mrb[31].mxu1 }
 0x33a   : > { %1096 = vmax.xlane.f32.xlu0 %v1095_v27 }
 0x343   : > { %387 = vrot.lane.b32.xlu1 %v1255_v29, %s1482_s21 }
 0x350   : > { %507 = vrot.lane.b32.xlu0 %v1255_v29, %s1483_s22 }
 0x397   : > { %v374_v30 = vpop.xlane.xlu1 %373 }
 0x398   : > { %v375_v31 = vsub.f32 %v371_v50, %v374_v30 }
 0x39a   : > { %v376_v32 = vmul.f32 1.442695, %v375_v31 }
 0x39c   : > { %1444 = vpow2.f32 %v376_v32 }
 0x39f   : > { %v497_v33 = vpop.xlane.xlu0 %496 }
 0x3a0   : > { %v498_v34 = vsub.f32 %v494_v56, %v497_v33 }
 0x3a2   : > { %v499_v35 = vmul.f32 1.442695, %v498_v34 }
 0x3a4   : > { %1446 = vpow2.f32 %v499_v35 }
 0x3a6   : > { %v1445_v36 = vpop.eup %1444 }
 0x3a7   : > { %v617_v37 = vpop.xlane.xlu0 %616  ;;  %v378_v38 = vsel %vm252_vm2, %v1445_v36, 0.0 }
 0x3a8   : > { %v618_v39 = vsub.f32 %v614_v62, %v617_v37  ;;  %379 = vadd.xlane.f32.xlu1 %v378_v38 }
 0x3aa   : > { %v619_v40 = vmul.f32 1.442695, %v618_v39 }
 0x3ac   : > { %1448 = vpow2.f32 %v619_v40 }
 0x3ae   : > { %v1447_v17 = vpop.eup %1446 }
 0x3af   : > { %v501_v41 = vsel %vm252_vm2, %v1447_v17, 0.0  ;;  %v737_v44 = vpop.xlane.xlu1 %736 }
 0x3b0   : > { %502 = vadd.xlane.f32.xlu0 %v501_v41  ;;  %v738_v48 = vsub.f32 %v734_v5, %v737_v44 }
 0x3b2   : > { %v739_v50 = vmul.f32 1.442695, %v738_v48 }
 0x3b4   : > { %1450 = vpow2.f32 %v739_v50 }
 0x3b6   : > { %v1625_v42 = vpop.eup %1448 }
 0x3b7   : > { %v621_v43 = vsel %vm252_vm2, %v1625_v42, 0.0  ;;  %v857_v49 = vpop.xlane.xlu0 %856 }
 0x3b8   : > { %622 = vadd.xlane.f32.xlu1 %v621_v43  ;;  %v858_v51 = vsub.f32 %v854_v11, %v857_v49 }
 0x3ba   : > { %v859_v54 = vmul.f32 1.442695, %v858_v51 }
 0x3bc   : > { %1452 = vpow2.f32 %v859_v54 }
 0x3be   : > { %v1451_v58 = vpop.eup %1450 }
 0x3bf   : > { %v977_v45 = vpop.xlane.xlu1 %976  ;;  %v741_v59 = vsel %vm252_vm2, %v1451_v58, 0.0 }
 0x3c0   : > { %v978_v53 = vsub.f32 %v974_v18, %v977_v45 }
 0x3c2   : > { %v979_v56 = vmul.f32 1.442695, %v978_v53 }
 0x3c3   : > { %v388_v46 = vpop.permute.xlu1 %387 }
 0x3c4   : > { %v393_v47 = vsel %vm268_vm3, %v388_v46, 0  ;;  %1454 = vpow2.f32 %v979_v56 }
 0x3c5   : > { %1336 = vmatpush3.bf16.msra.mxu0 %v393_v47 }
 0x3c6   : > { %627 = vrot.lane.b32.xlu0 %v1255_v29, %s1484_s23  ;;  %1347 = vmatprep.subr.bf16.mxu0 %v1480_v0  ;;  %v1453_v60 = vpop.eup %1452 }
 0x3c7   : > { %v1097_v52 = vpop.xlane.xlu0 %1096  ;;  %v861_v62 = vsel %vm252_vm2, %v1453_v60, 0.0 }
 0x3c8   : > { %v1098_v55 = vsub.f32 %v1094_v24, %v1097_v52 }
 0x3c9   : > { %747 = vrot.lane.b32.xlu1 %v1255_v29, %s1485_s24 }
 0x3ca   : > { %v1099_v57 = vmul.f32 1.442695, %v1098_v55 }
 0x3cb   : > { %v508_v4 = vpop.permute.xlu0 %507 }
 0x3cc   : > { %1456 = vpow2.f32 %v1099_v57  ;;  %v513_v9 = vsel %vm268_vm3, %v508_v4, 0 }
 0x3ce   : > { %v1634_v61 = vpop.eup %1454 }
 0x3cf   : > { %v981_v1 = vsel %vm252_vm2, %v1634_v61, 0.0 }
 0x3d6   : > { %v1637_v63 = vpop.eup %1456 }
 0x3d7   : > { %v1101_v2 = vsel %vm252_vm2, %v1637_v63, 0.0 }
 0x3e5   : > { %742 = vadd.xlane.f32.xlu0 %v741_v59 }
 0x3e9   : > { %862 = vadd.xlane.f32.xlu0 %v861_v62 }
 0x3ed   : > { %982 = vadd.xlane.f32.xlu1 %v981_v1  ;;  %1102 = vadd.xlane.f32.xlu0 %v1101_v2 }
 0x3fe   : > { %987 = vrot.lane.b32.xlu1 %v1255_v29, %s1487_s26 }
 0x402   : > { %1107 = vrot.lane.b32.xlu1 %v1255_v29, %s1488_s27 }
 0x403   : > { %867 = vrot.lane.b32.xlu0 %v1255_v29, %s1486_s25 }
 0x435   : > { %v380_v3 = vpop.xlane.xlu1 %379 }
 0x436   : > { %1458 = vrcp.f32 %v380_v3 }
 0x43d   : > { %v503_v5 = vpop.xlane.xlu0 %502 }
 0x43e   : > { %1460 = vrcp.f32 %v503_v5 }
 0x440   : > { %v1459_v6 = vpop.eup %1458 }
 0x441   : > { %v382_v7 = vmul.f32 %v1459_v6, %v1445_v36  ;;  %v628_v13 = vpop.permute.xlu0 %627 }
 0x442   : > { %v633_v15 = vsel %vm268_vm3, %v628_v13, 0 }
 0x443   : > { %v383_v8 = vpack.c.bf16 %v382_v7, %v382_v7 }
 0x445   : > { %1338 = vmatmul.mubr.msk.bf16.vlgmr.msra.gmra.mrb[4].mxu0 %vm252_vm2, %v383_v8  ;;  %v623_v10 = vpop.xlane.xlu1 %622 }
 0x446   : > { %1462 = vrcp.f32 %v623_v10  ;;  %1348 = vmatpush3.bf16.msra.mxu0 %v513_v9  ;;  %1349 = vmatprep.mubr.msk.bf16.mxu0 %vm1481_vm0, %v1480_v0 }
 0x447   : > { %1359 = vmatprep.subr.bf16.mxu0 %v1480_v0 }
 0x448   : > { %v1461_v11 = vpop.eup %1460 }
 0x449   : > { %v505_v12 = vmul.f32 %v1461_v11, %v1447_v17  ;;  %v748_v19 = vpop.permute.xlu1 %747 }
 0x44a   : > { %v753_v21 = vsel %vm268_vm3, %v748_v19, 0 }
 0x44b   : > { %v506_v14 = vpack.c.bf16 %v505_v12, %v505_v12 }
 0x44d   : > { %1350 = vmatmul.mubr.msk.bf16.vlgmr.msra.gmra.mrb[8].mxu0 %vm252_vm2, %v506_v14 }
 0x44e   : > { %1360 = vmatpush3.bf16.msra.mxu0 %v633_v15  ;;  %1361 = vmatprep.mubr.msk.bf16.mxu0 %vm1481_vm0, %v1480_v0 }
 0x44f   : > { %1371 = vmatprep.subr.bf16.mxu0 %v1480_v0 }
 0x450   : > { %v1463_v16 = vpop.eup %1462 }
 0x451   : > { %v625_v18 = vmul.f32 %v1463_v16, %v1625_v42 }
 0x453   : > { %v626_v20 = vpack.c.bf16 %v625_v18, %v625_v18 }
 0x455   : > { %1362 = vmatmul.mubr.msk.bf16.vlgmr.msra.gmra.mrb[12].mxu0 %vm252_vm2, %v626_v20 }
 0x456   : > { %1372 = vmatpush3.bf16.msra.mxu0 %v753_v21  ;;  %1373 = vmatprep.mubr.msk.bf16.mxu0 %vm1481_vm0, %v1480_v0 }
 0x457   : > { %1383 = vmatprep.subr.bf16.mxu0 %v1480_v0 }
 0x472   : > { %v743_v22 = vpop.xlane.xlu0 %742 }
 0x473   : > { %1464 = vrcp.f32 %v743_v22 }
 0x476   : > { %v863_v23 = vpop.xlane.xlu0 %862 }
 0x477   : > { %1466 = vrcp.f32 %v863_v23 }
 0x47a   : > { %v1103_v24 = vpop.xlane.xlu0 %1102  ;;  %v983_v25 = vpop.xlane.xlu1 %982 }
 0x47b   : > { %1468 = vrcp.f32 %v983_v25 }
 0x47c   : > { %1470 = vrcp.f32 %v1103_v24 }
 0x47d   : > { %v1465_v26 = vpop.eup %1464 }
 0x47e   : > { %v745_v27 = vmul.f32 %v1465_v26, %v1451_v58  ;;  %v868_v28 = vpop.permute.xlu0 %867  ;;  %v988_v33 = vpop.permute.xlu1 %987 }
 0x47f   : > { %v873_v29 = vsel %vm268_vm3, %v868_v28, 0  ;;  %v993_v34 = vsel %vm268_vm3, %v988_v33, 0 }
 0x480   : > { %v746_v30 = vpack.c.bf16 %v745_v27, %v745_v27 }
 0x481   : > { %v1467_v31 = vpop.eup %1466 }
 0x482   : > { %1374 = vmatmul.mubr.msk.bf16.vlgmr.msra.gmra.mrb[16].mxu0 %vm252_vm2, %v746_v30  ;;  %v865_v32 = vmul.f32 %v1467_v31, %v1453_v60  ;;  %v1108_v38 = vpop.permute.xlu1 %1107 }
 0x483   : > { %1384 = vmatpush3.bf16.msra.mxu0 %v873_v29  ;;  %1385 = vmatprep.mubr.msk.bf16.mxu0 %vm1481_vm0, %v1480_v0  ;;  %v1113_v39 = vsel %vm268_vm3, %v1108_v38, 0 }
 0x484   : > { %1395 = vmatprep.subr.bf16.mxu0 %v1480_v0  ;;  %v866_v35 = vpack.c.bf16 %v865_v32, %v865_v32 }
 0x485   : > { %v1469_v36 = vpop.eup %1468 }
 0x486   : > { %v985_v37 = vmul.f32 %v1469_v36, %v1634_v61  ;;  %v1471_v17 = vpop.eup %1470 }
 0x487   : > { %v1105_v41 = vmul.f32 %v1471_v17, %v1637_v63 }
 0x488   : > { %v986_v40 = vpack.c.bf16 %v985_v37, %v985_v37 }
 0x489   : > { %v1106_v42 = vpack.c.bf16 %v1105_v41, %v1105_v41 }
 0x48a   : > { %1386 = vmatmul.mubr.msk.bf16.vlgmr.msra.gmra.mrb[20].mxu0 %vm252_vm2, %v866_v35 }
 0x48b   : > { %1396 = vmatpush3.bf16.msra.mxu0 %v993_v34  ;;  %1397 = vmatprep.mubr.msk.bf16.mxu0 %vm1481_vm0, %v1480_v0 }
 0x48c   : > { %1407 = vmatprep.subr.bf16.mxu0 %v1480_v0 }
 0x492   : > { %1398 = vmatmul.mubr.msk.bf16.vlgmr.msra.gmra.mrb[24].mxu0 %vm252_vm2, %v986_v40 }
 0x493   : > { %1408 = vmatpush3.bf16.msra.mxu0 %v1113_v39  ;;  %1409 = vmatprep.mubr.msk.bf16.mxu0 %vm1481_vm0, %v1480_v0 }
 0x49a   : > { %1410 = vmatmul.mubr.msk.bf16.vlgmr.msra.gmra.mrb[28].mxu0 %vm252_vm2, %v1106_v42 }
 0x518   : > { %v429_v43 = vpop.f32.mrb[4].mxu0 }
 0x519   : > { %v1278_v44 = vpack.c.bf16 %v429_v43, %v429_v43  ;;  %v1339_v45 = vpop.f32.mrb[5].mxu0 }
 0x51a   : > { %v432_v46 = vpop.f32.mrb[6].mxu0 }
 0x51b   : > { %439 = vrot.lane.b32.xlu1 %v1278_v44, %s1489_s7  ;;  %v1340_v47 = vpop.f32.mrb[7].mxu0 }
 0x520   : > { %v549_v48 = vpop.f32.mrb[8].mxu0 }
 0x521   : > { %v1279_v49 = vpack.c.bf16 %v549_v48, %v549_v48  ;;  %v1351_v50 = vpop.f32.mrb[9].mxu0 }
 0x522   : > { %v552_v51 = vpop.f32.mrb[10].mxu0 }
 0x523   : > { %559 = vrot.lane.b32.xlu1 %v1279_v49, %s1490_s8  ;;  %v1352_v52 = vpop.f32.mrb[11].mxu0 }
 0x528   : > { %v669_v0 = vpop.f32.mrb[12].mxu0 }
 0x529   : > { %v1280_v53 = vpack.c.bf16 %v669_v0, %v669_v0  ;;  %v1363_v54 = vpop.f32.mrb[13].mxu0 }
 0x52a   : > { %v672_v55 = vpop.f32.mrb[14].mxu0 }
 0x52b   : > { %679 = vrot.lane.b32.xlu0 %v1280_v53, %s1491_s9  ;;  %v1364_v56 = vpop.f32.mrb[15].mxu0 }
 0x555   : > { %v789_v57 = vpop.f32.mrb[16].mxu0 }
 0x556   : > { %v1281_v58 = vpack.c.bf16 %v789_v57, %v789_v57  ;;  %v1375_v59 = vpop.f32.mrb[17].mxu0 }
 0x557   : > { %v792_v60 = vpop.f32.mrb[18].mxu0 }
 0x558   : > { %799 = vrot.lane.b32.xlu1 %v1281_v58, %s1492_s10  ;;  %v1376_v61 = vpop.f32.mrb[19].mxu0 }
 0x55d   : > { %v909_v62 = vpop.f32.mrb[20].mxu0 }
 0x55e   : > { %v1282_v63 = vpack.c.bf16 %v909_v62, %v909_v62  ;;  %v1387_v1 = vpop.f32.mrb[21].mxu0 }
 0x55f   : > { %v912_v2 = vpop.f32.mrb[22].mxu0 }
 0x560   : > { %919 = vrot.lane.b32.xlu0 %v1282_v63, %s1493_s11  ;;  %v1388_v3 = vpop.f32.mrb[23].mxu0 }
 0x565   : > { %v1029_v4 = vpop.f32.mrb[24].mxu0 }
 0x566   : > { %v1283_v5 = vpack.c.bf16 %v1029_v4, %v1029_v4  ;;  %v1399_v6 = vpop.f32.mrb[25].mxu0 }
 0x567   : > { %v1032_v7 = vpop.f32.mrb[26].mxu0 }
 0x568   : > { %1039 = vrot.lane.b32.xlu1 %v1283_v5, %s1494_s13  ;;  %v1400_v8 = vpop.f32.mrb[27].mxu0 }
 0x56d   : > { %v1149_v9 = vpop.f32.mrb[28].mxu0 }
 0x56e   : > { %v1284_v10 = vpack.c.bf16 %v1149_v9, %v1149_v9  ;;  %v1411_v11 = vpop.f32.mrb[29].mxu0 }
 0x56f   : > { %v1152_v12 = vpop.f32.mrb[30].mxu0 }
 0x570   : > { %1159 = vrot.lane.b32.xlu0 %v1284_v10, %s1495_s14  ;;  %v1412_v13 = vpop.f32.mrb[31].mxu0 }
 0x58d   : > { %v440_v14 = vpop.permute.xlu1 %439 }
 0x58e   : > { %443 = vst.msk [vmem:[%s1609_s6] sm:$0xf] %vm442_vm5, %v440_v14 }
 0x595   : > { %v560_v15 = vpop.permute.xlu1 %559 }
 0x596   : > { %563 = vst.msk [vmem:[%s1609_s6] sm:$0xf] %vm562_vm6, %v560_v15 }
 0x59d   : > { %v680_v16 = vpop.permute.xlu0 %679 }
 0x59e   : > { %683 = vst.msk [vmem:[%s1609_s6] sm:$0xf] %vm682_vm7, %v680_v16 }
 0x5ca   : > { %v800_v18 = vpop.permute.xlu1 %799 }
 0x5cb   : > { %803 = vst.msk [vmem:[%s1609_s6] sm:$0xf] %vm802_vm8, %v800_v18 }
 0x5d2   : > { %v920_v19 = vpop.permute.xlu0 %919 }
 0x5d3   : > { %923 = vst.msk [vmem:[%s1609_s6] sm:$0xf] %vm922_vm9, %v920_v19 }
 0x5da   : > { %v1040_v20 = vpop.permute.xlu1 %1039 }
 0x5db   : > { %1043 = vst.msk [vmem:[%s1609_s6] sm:$0xf] %vm1042_vm10, %v1040_v20 }
 0x5e2   : > { %v1160_v21 = vpop.permute.xlu0 %1159 }
 0x5e3   : > { %1163 = vst.msk [vmem:[%s1609_s6] sm:$0xf] %vm1162_vm11, %v1160_v21 }
 0x5e4 PF: > { %s13_s12 = sadd.s32 1, %s1478_s12  }
 0x5e5   : > { %p10_p4 = scmp.ge.s32.totalorder %s13_s12, 4  }
 0x5e7   :  { %12 = sbr.rel (!%p10_p4) target bundleno = 1 (0x1), region = 68 }

// kernel: transformer_forward.27
= control target key start
LH: loop header
LB: loop body
LE: loop exit
PB: predicated region body
PF: predicated region fallthrough
CT: control target
= control target key end

     0   :  { %vm28_vm0 = vcmask 261120   ;;  %v214_v0 = vmov 0.0   ;;  %vm215_vm1 = vmmov 0   ;;  %v112_v4 = vlaneseq  ;;  %s287_s1 = inlined_call_operand.vmem [shape: bf16[32,32], index: 1, kind: input, shape index: {}]   ;;  %s288_s0 = inlined_call_operand.vmem [shape: bf16[16,32], index: 0, kind: input, shape index: {}]   ;;  %s289_s2 = inlined_call_operand.vmem [shape: bf16[1,32], index: 2, kind: input, shape index: {}]   ;;  %s290_s3 = inlined_call_operand.vmem [shape: bf16[16,32], index: 3, kind: input, shape index: {}]   ;;  %s291_s4 = inlined_call_operand.vmem [shape: bf16[1,32], index: 4, kind: input, shape index: {}]   ;;  %s292_s5 = inlined_call_operand.vmem [shape: bf16[1,32], index: 5, kind: input, shape index: {}]   ;;  %s293_s6 = inlined_call_operand.vmem [shape: bf16[16,32], index: 6, kind: output, shape index: {}]  }
   0x1   :  { %197 = vmatprep.subr.bf16.mxu0 %v214_v0  ;;  %v207_v1 = vld [vmem:[%s287_s1] sm:$0xff]   ;;  %201 = vmatprep.mubr.msk.bf16.mxu0 %vm215_vm1, %v214_v0  ;;  %29 = vst.msk [vmem:[#allocation2] sm:$0xff] %vm28_vm0, %v214_v0  ;;  %30 = vst.msk [vmem:[#allocation2 + $0x8] sm:$0xff] %vm28_vm0, %v214_v0  ;;  %v208_v2 = vld [vmem:[%s287_s1 + $0x8] sm:$0xff]   ;;  %vm175_vm2 = vcmask 257024  }
   0x2   :  { %198 = vmatpush3.bf16.msra.mxu0 %v207_v1  ;;  %v209_v3 = vld [vmem:[%s288_s0] sm:$0xff]   ;;  %v113_v6 = vshrl.u32 %v112_v4, 7 }
   0x3   :  { %199 = vmatprep.subr.bf16.mxu0 %v214_v0  ;;  %v110_v9 = vld [vmem:[%s289_s2] sm:$0x1] }
   0x4   :  { %v111_v15 = vunpack.c.l.bf16 %v110_v9  ;;  %v114_v16 = vsub.s32 0, %v113_v6  ;;  %v191_v17 = vld [vmem:[%s290_s3] sm:$0xff]  }
   0x5   :  { %v192_v19 = vunpack.c.l.bf16 %v191_v17  ;;  %v193_v22 = vunpack.c.h.bf16 %v191_v17  ;;  %v151_v44 = vld [vmem:[%s291_s4] sm:$0x1] }
   0x6   :  { %200 = vmatpush3.bf16.msra.mxu0 %v208_v2  ;;  %v115_v18 = vrot.slane %v111_v15, %v114_v16  ;;  %v159_v46 = vld [vmem:[%s292_s5] sm:$0x1]  ;;  %v152_v47 = vunpack.c.l.bf16 %v151_v44 }
   0x7   :  { %v160_v48 = vunpack.c.l.bf16 %v159_v46 }
   0x8   :  { %v31_v5 = vld [vmem:[#allocation2] sm:$0xff]  ;;  %v32_v8 = vld [vmem:[#allocation2 + $0x8] sm:$0xff]  ;;  %v156_v49 = vrot.slane %v152_v47, %v114_v16 }
   0x9   :  { %202 = vmatmul.mubr.msk.bf16.vlgmr.msra.gmra.mrb[0].mxu0 %vm28_vm0, %v209_v3  ;;  %v164_v51 = vrot.slane %v160_v48, %v114_v16 }
  0xdc   :  { %v94_v7 = vpop.f32.mrb[0].mxu0 }
  0xdd   :  { %v101_v10 = vadd.f32 %v94_v7, %v31_v5  ;;  %v203_v11 = vpop.f32.mrb[1].mxu0 }
  0xde   :  { %v97_v12 = vpop.f32.mrb[2].mxu0 }
  0xdf   :  { %103 = vst.msk [vmem:[#allocation2] sm:$0xff] %vm28_vm0, %v101_v10  ;;  %v102_v13 = vadd.f32 %v97_v12, %v32_v8  ;;  %v204_v14 = vpop.f32.mrb[3].mxu0 }
  0xe1   :  { %104 = vst.msk [vmem:[#allocation2 + $0x8] sm:$0xff] %vm28_vm0, %v102_v13 }
  0xe6   :  { %v108_v20 = vld [vmem:[#allocation2] sm:$0xff] }
  0xe7   :  { %v116_v21 = vadd.f32 %v115_v18, %v108_v20 }
  0xe8   :  { %v109_v23 = vld [vmem:[#allocation2 + $0x8] sm:$0xff] }
  0xe9   :  { %v122_v24 = vadd.f32 %v192_v19, %v116_v21  ;;  %v117_v25 = vadd.f32 %v115_v18, %v109_v23 }
  0xeb   :  { %v124_v26 = vsel %vm28_vm0, %v122_v24, 0.0  ;;  %v123_v27 = vadd.f32 %v193_v22, %v117_v25 }
  0xec   :  { %125 = vadd.xlane.f32.xlu0 %v124_v26 }
  0xed   :  { %v127_v28 = vsel %vm28_vm0, %v123_v27, 0.0 }
  0xf0   :  { %128 = vadd.xlane.f32.xlu0 %v127_v28 }
 0x179   :  { %v126_v29 = vpop.xlane.xlu0 %125 }
 0x17a   :  { %v131_v30 = vmul.f32 0.03125, %v126_v29 }
 0x17c   :  { %v133_v31 = vsub.f32 %v122_v24, %v131_v30 }
 0x17d   :  { %v129_v32 = vpop.xlane.xlu0 %128 }
 0x17e   :  { %v132_v33 = vmul.f32 0.03125, %v129_v32  ;;  %v135_v34 = vmul.f32 %v133_v31, %v133_v31 }
 0x180   :  { %v134_v35 = vsub.f32 %v123_v27, %v132_v33  ;;  %v137_v36 = vsel %vm28_vm0, %v135_v34, 0.0 }
 0x181   :  { %138 = vadd.xlane.f32.xlu1 %v137_v36 }
 0x182   :  { %v136_v37 = vmul.f32 %v134_v35, %v134_v35 }
 0x184   :  { %v140_v38 = vsel %vm28_vm0, %v136_v37, 0.0 }
 0x185   :  { %141 = vadd.xlane.f32.xlu1 %v140_v38 }
 0x20e   :  { %v139_v39 = vpop.xlane.xlu1 %138 }
 0x20f   :  { %v143_v40 = vmul.f32 0.03125, %v139_v39 }
 0x211   :  { %v145_v41 = vadd.f32 1e-05, %v143_v40 }
 0x212   :  { %v142_v42 = vpop.xlane.xlu1 %141 }
 0x213   :  { %210 = vrsqrt.f32 %v145_v41  ;;  %v144_v43 = vmul.f32 0.03125, %v142_v42 }
 0x215   :  { %v146_v45 = vadd.f32 1e-05, %v144_v43 }
 0x217   :  { %212 = vrsqrt.f32 %v146_v45 }
 0x21d   :  { %v211_v50 = vpop.eup %210 }
 0x21e   :  { %v149_v52 = vmul.f32 %v211_v50, %v133_v31 }
 0x220   :  { %v157_v53 = vmul.f32 %v156_v49, %v149_v52 }
 0x221   :  { %v213_v54 = vpop.eup %212 }
 0x222   :  { %v165_v55 = vadd.f32 %v164_v51, %v157_v53  ;;  %v150_v56 = vmul.f32 %v213_v54, %v134_v35 }
 0x224   :  { %v188_v57 = vpack.c.bf16 %v165_v55, %v165_v55  ;;  %v158_v58 = vmul.f32 %v156_v49, %v150_v56 }
 0x226   :  { %176 = vst.msk [vmem:[%s293_s6] sm:$0xf] %vm175_vm2, %v188_v57  ;;  %v166_v59 = vadd.f32 %v164_v51, %v158_v58 }
 0x228   :  { %v189_v60 = vpack.c.bf16 %v166_v59, %v166_v59 }
 0x22a   :  { %177 = vst.msk [vmem:[%s293_s6 + $0x4] sm:$0xf] %vm175_vm2, %v189_v60 }

// kernel: transformer_forward.28
= control target key start
LH: loop header
LB: loop body
LE: loop exit
PB: predicated region body
PF: predicated region fallthrough
CT: control target
= control target key end

     0   :  { %vm31_vm0 = vcmask 261120   ;;  %v376_v0 = vmov 0.0   ;;  %vm377_vm1 = vmmov 0   ;;  %v42_v12 = vlaneseq  ;;  %s487_s1 = inlined_call_operand.vmem [shape: bf16[32,128], index: 1, kind: input, shape index: {}]   ;;  %s488_s3 = inlined_call_operand.vmem [shape: bf16[128,32], index: 3, kind: input, shape index: {}]   ;;  %s489_s0 = inlined_call_operand.vmem [shape: bf16[16,32], index: 0, kind: input, shape index: {}]   ;;  %s490_s2 = inlined_call_operand.vmem [shape: bf16[1,128], index: 2, kind: input, shape index: {}]   ;;  %s491_s4 = inlined_call_operand.vmem [shape: bf16[1,32], index: 4, kind: input, shape index: {}]   ;;  %s492_s5 = inlined_call_operand.vmem [shape: bf16[1,32], index: 5, kind: input, shape index: {}]   ;;  %s493_s6 = inlined_call_operand.vmem [shape: bf16[1,32], index: 6, kind: input, shape index: {}]   ;;  %s494_s7 = inlined_call_operand.vmem [shape: bf16[16,32], index: 7, kind: output, shape index: {}]  }
   0x1   :  { %331 = vmatprep.subr.bf16.mxu0 %v376_v0  ;;  %v361_v1 = vld [vmem:[%s487_s1] sm:$0xff]   ;;  %335 = vmatprep.mubr.msk.bf16.mxu0 %vm377_vm1, %v376_v0  ;;  %32 = vst.msk [vmem:[#allocation2] sm:$0xff] %vm31_vm0, %v376_v0  ;;  %33 = vst.msk [vmem:[#allocation2 + $0x8] sm:$0xff] %vm31_vm0, %v376_v0  ;;  %v362_v2 = vld [vmem:[%s487_s1 + $0x8] sm:$0xff]   ;;  %vm292_vm2 = vcmask 257024  }
   0x2   :  { %339 = vmatprep.subr.bf16.mxu1 %v376_v0  ;;  %355 = vmatprep.mubr.msk.bf16.mxu1 %vm377_vm1, %v376_v0  ;;  %v364_v3 = vld [vmem:[%s488_s3] sm:$0xff]   ;;  %v365_v5 = vld [vmem:[%s488_s3 + $0x8] sm:$0xff]   ;;  %v366_v6 = vld [vmem:[%s488_s3 + $0x10] sm:$0xff]   ;;  %v43_v13 = vshrl.u32 %v42_v12, 7 }
   0x3   :  { %332 = vmatpush3.bf16.msra.mxu0 %v361_v1  ;;  %v363_v4 = vld [vmem:[%s489_s0] sm:$0xff]   ;;  %340 = vmatpush3.bf16.msra.mxu1 %v364_v3  ;;  %v367_v7 = vld [vmem:[%s488_s3 + $0x18] sm:$0xff]   ;;  %v369_v9 = vld [vmem:[%s488_s3 + $0x28] sm:$0xff]  }
   0x4   :  { %333 = vmatprep.subr.bf16.mxu0 %v376_v0  ;;  %341 = vmatprep.subr.bf16.mxu1 %v376_v0  ;;  %v368_v8 = vld [vmem:[%s488_s3 + $0x20] sm:$0xff]   ;;  %v370_v10 = vld [vmem:[%s488_s3 + $0x30] sm:$0xff]   ;;  %v371_v11 = vld [vmem:[%s488_s3 + $0x38] sm:$0xff]   ;;  %v457_v16 = vsub.s32 0, %v43_v13 }
   0x5   :  { %v40_v14 = vld [vmem:[%s490_s2] sm:$0x1] }
   0x6   :  { %v41_v15 = vunpack.c.l.bf16 %v40_v14  ;;  %v227_v30 = vld [vmem:[%s491_s4] sm:$0x1] }
   0x7   :  { %334 = vmatpush3.bf16.msra.mxu0 %v362_v2  ;;  %342 = vmatpush3.bf16.msra.mxu1 %v365_v5  ;;  %v228_v36 = vunpack.c.l.bf16 %v227_v30  ;;  %v316_v37 = vld [vmem:[%s489_s0] sm:$0xff]  }
   0x8   :  { %343 = vmatprep.subr.bf16.mxu1 %v376_v0  ;;  %v45_v17 = vrot.slane %v41_v15, %v457_v16  ;;  %v110_v27 = vld [vmem:[#allocation2] sm:$0xff]  ;;  %v111_v29 = vld [vmem:[#allocation2 + $0x8] sm:$0xff]  ;;  %v317_v39 = vunpack.c.l.bf16 %v316_v37  ;;  %v318_v42 = vunpack.c.h.bf16 %v316_v37 }
   0x9   :  { %v232_v38 = vrot.slane %v228_v36, %v457_v16  ;;  %v276_v2 = vld [vmem:[%s493_s6] sm:$0x1] }
   0xa   :  { %336 = vmatmul.mubr.msk.bf16.vlgmr.msra.gmra.mrb[0].mxu0 %vm31_vm0, %v363_v4  ;;  %v277_v4 = vunpack.c.l.bf16 %v276_v2 }
   0xb   :  { %344 = vmatpush3.bf16.msra.mxu1 %v366_v6 }
   0xc   :  { %345 = vmatprep.subr.bf16.mxu1 %v376_v0 }
   0xf   :  { %346 = vmatpush3.bf16.msra.mxu1 %v367_v7  ;;  %v281_v7 = vrot.slane %v277_v4, %v457_v16 }
  0x10   :  { %347 = vmatprep.subr.bf16.mxu1 %v376_v0 }
  0x13   :  { %348 = vmatpush3.bf16.msra.mxu1 %v368_v8 }
  0x14   :  { %349 = vmatprep.subr.bf16.mxu1 %v376_v0 }
  0x17   :  { %350 = vmatpush3.bf16.msra.mxu1 %v369_v9 }
  0x18   :  { %351 = vmatprep.subr.bf16.mxu1 %v376_v0 }
  0x1b   :  { %352 = vmatpush3.bf16.msra.mxu1 %v370_v10 }
  0x1c   :  { %353 = vmatprep.subr.bf16.mxu1 %v376_v0  ;;  %v268_v0 = vld [vmem:[%s492_s5] sm:$0x1] }
  0x1d   :  { %v269_v3 = vunpack.c.l.bf16 %v268_v0 }
  0x1f   :  { %354 = vmatpush3.bf16.msra.mxu1 %v371_v11  ;;  %v273_v5 = vrot.slane %v269_v3, %v457_v16 }
  0xdd   :  { %v101_v18 = vpop.f32.mrb[0].mxu0 }
  0xde   :  { %v102_v19 = vadd.f32 %v101_v18, %v45_v17  ;;  %v337_v20 = vpop.f32.mrb[1].mxu0 }
  0xdf   :  { %v104_v21 = vpop.f32.mrb[2].mxu0 }
  0xe0   :  { %v105_v22 = vadd.f32 %v104_v21, %v45_v17  ;;  %v338_v23 = vpop.f32.mrb[3].mxu0  ;;  %v108_v24 = vmax.f32 %v102_v19, 0.0 }
  0xe2   :  { %v109_v25 = vmax.f32 %v105_v22, 0.0 }
  0xe4   :  { %v112_v26 = vpack.c.bf16 %v109_v25, %v108_v24 }
  0xe6   :  { %356 = vmatmul.mubr.bf16.vlgmr.msra.gmra.mrb[0].mxu1 %v112_v26 }
 0x1b9   :  { %v211_v28 = vpop.f32.mrb[0].mxu1 }
 0x1ba   :  { %v218_v31 = vadd.f32 %v211_v28, %v110_v27  ;;  %v357_v32 = vpop.f32.mrb[1].mxu1 }
 0x1bb   :  { %v214_v33 = vpop.f32.mrb[2].mxu1 }
 0x1bc   :  { %220 = vst.msk [vmem:[#allocation2] sm:$0xff] %vm31_vm0, %v218_v31  ;;  %v219_v34 = vadd.f32 %v214_v33, %v111_v29  ;;  %v358_v35 = vpop.f32.mrb[3].mxu1 }
 0x1be   :  { %221 = vst.msk [vmem:[#allocation2 + $0x8] sm:$0xff] %vm31_vm0, %v219_v34 }
 0x1c3   :  { %v225_v40 = vld [vmem:[#allocation2] sm:$0xff] }
 0x1c4   :  { %v233_v41 = vadd.f32 %v232_v38, %v225_v40 }
 0x1c5   :  { %v226_v43 = vld [vmem:[#allocation2 + $0x8] sm:$0xff] }
 0x1c6   :  { %v239_v44 = vadd.f32 %v317_v39, %v233_v41  ;;  %v234_v45 = vadd.f32 %v232_v38, %v226_v43 }
 0x1c8   :  { %v241_v46 = vsel %vm31_vm0, %v239_v44, 0.0  ;;  %v240_v47 = vadd.f32 %v318_v42, %v234_v45 }
 0x1c9   :  { %242 = vadd.xlane.f32.xlu0 %v241_v46 }
 0x1ca   :  { %v244_v48 = vsel %vm31_vm0, %v240_v47, 0.0 }
 0x1cd   :  { %245 = vadd.xlane.f32.xlu0 %v244_v48 }
 0x256   :  { %v243_v49 = vpop.xlane.xlu0 %242 }
 0x257   :  { %v248_v50 = vmul.f32 0.03125, %v243_v49 }
 0x259   :  { %v250_v51 = vsub.f32 %v239_v44, %v248_v50 }
 0x25a   :  { %v246_v52 = vpop.xlane.xlu0 %245 }
 0x25b   :  { %v249_v53 = vmul.f32 0.03125, %v246_v52  ;;  %v252_v54 = vmul.f32 %v250_v51, %v250_v51 }
 0x25d   :  { %v251_v55 = vsub.f32 %v240_v47, %v249_v53  ;;  %v254_v56 = vsel %vm31_vm0, %v252_v54, 0.0 }
 0x25e   :  { %255 = vadd.xlane.f32.xlu1 %v254_v56 }
 0x25f   :  { %v253_v57 = vmul.f32 %v251_v55, %v251_v55 }
 0x261   :  { %v257_v58 = vsel %vm31_vm0, %v253_v57, 0.0 }
 0x262   :  { %258 = vadd.xlane.f32.xlu1 %v257_v58 }
 0x2eb   :  { %v256_v59 = vpop.xlane.xlu1 %255 }
 0x2ec   :  { %v260_v60 = vmul.f32 0.03125, %v256_v59 }
 0x2ee   :  { %v262_v61 = vadd.f32 1e-05, %v260_v60 }
 0x2ef   :  { %v259_v62 = vpop.xlane.xlu1 %258 }
 0x2f0   :  { %372 = vrsqrt.f32 %v262_v61  ;;  %v261_v63 = vmul.f32 0.03125, %v259_v62 }
 0x2f2   :  { %v263_v1 = vadd.f32 1e-05, %v261_v63 }
 0x2f4   :  { %374 = vrsqrt.f32 %v263_v1 }
 0x2fa   :  { %v373_v6 = vpop.eup %372 }
 0x2fb   :  { %v266_v8 = vmul.f32 %v373_v6, %v250_v51 }
 0x2fd   :  { %v274_v9 = vmul.f32 %v273_v5, %v266_v8 }
 0x2fe   :  { %v375_v10 = vpop.eup %374 }
 0x2ff   :  { %v282_v11 = vadd.f32 %v281_v7, %v274_v9  ;;  %v267_v12 = vmul.f32 %v375_v10, %v251_v55 }
 0x301   :  { %v313_v13 = vpack.c.bf16 %v282_v11, %v282_v11  ;;  %v275_v14 = vmul.f32 %v273_v5, %v267_v12 }
 0x303   :  { %293 = vst.msk [vmem:[%s494_s7] sm:$0xf] %vm292_vm2, %v313_v13  ;;  %v283_v15 = vadd.f32 %v281_v7, %v275_v14 }
 0x305   :  { %v314_v17 = vpack.c.bf16 %v283_v15, %v283_v15 }
 0x307   :  { %294 = vst.msk [vmem:[%s494_s7 + $0x4] sm:$0xf] %vm292_vm2, %v314_v17 }

// kernel: transformer_forward.37
= control target key start
LH: loop header
LB: loop body
LE: loop exit
PB: predicated region body
PF: predicated region fallthrough
CT: control target
= control target key end

     0   :  { %vm19_vm0 = vcmask 523264   ;;  %v149_v0 = vmov 0.0   ;;  %vm150_vm1 = vmmov 0   ;;  %vm47_vm2 = vcmask 261120   ;;  %s193_s1 = inlined_call_operand.vmem [shape: bf16[32,64], index: 1, kind: input, shape index: {}]   ;;  %s194_s0 = inlined_call_operand.vmem [shape: bf16[16,32], index: 0, kind: input, shape index: {}]   ;;  %s195_s2 = inlined_call_operand.vmem [shape: bf16[1,64], index: 2, kind: input, shape index: {}]   ;;  %s196_s3 = inlined_call_operand.vmem [shape: bf16[16,64], index: 3, kind: output, shape index: {}]  }
   0x1   :  { %136 = vmatprep.subr.bf16.mxu0 %v149_v0  ;;  %v146_v1 = vld [vmem:[%s193_s1] sm:$0xff]   ;;  %140 = vmatprep.mubr.msk.bf16.mxu0 %vm150_vm1, %v149_v0  ;;  %20 = vst.msk [vmem:[#allocation2] sm:$0xff] %vm19_vm0, %v149_v0  ;;  %21 = vst.msk [vmem:[#allocation2 + $0x8] sm:$0xff] %vm19_vm0, %v149_v0  ;;  %v147_v2 = vld [vmem:[%s193_s1 + $0x8] sm:$0xff]   ;;  %v104_v4 = vlaneseq  ;;  %vm118_vm3 = vcmask 519168  }
   0x2   :  { %137 = vmatpush3.bf16.msra.mxu0 %v146_v1  ;;  %v148_v3 = vld [vmem:[%s194_s0] sm:$0xff]  }
   0x3   :  { %138 = vmatprep.subr.bf16.mxu0 %v149_v0  ;;  %v105_v6 = vshrl.u32 %v104_v4, 7  ;;  %v102_v8 = vld [vmem:[%s195_s2] sm:$0x1] }
   0x4   :  { %v103_v13 = vunpack.c.l.bf16 %v102_v8 }
   0x5   :  { %v106_v14 = vsub.s32 0, %v105_v6 }
   0x6   :  { %139 = vmatpush3.bf16.msra.mxu0 %v147_v2 }
   0x7   :  { %v107_v17 = vrot.slane %v103_v13, %v106_v14 }
   0x8   :  { %v22_v5 = vld [vmem:[#allocation2] sm:$0xff]  ;;  %v23_v9 = vld [vmem:[#allocation2 + $0x8] sm:$0xff] }
   0x9   :  { %141 = vmatmul.mubr.msk.bf16.vlgmr.msra.gmra.mrb[0].mxu0 %vm47_vm2, %v148_v3 }
  0xdc   :  { %v85_v7 = vpop.f32.mrb[0].mxu0 }
  0xdd   :  { %v92_v10 = vadd.f32 %v85_v7, %v22_v5  ;;  %v142_v11 = vpop.f32.mrb[1].mxu0 }
  0xde   :  { %v88_v12 = vpop.f32.mrb[2].mxu0 }
  0xdf   :  { %95 = vst.msk [vmem:[#allocation2] sm:$0xff] %vm19_vm0, %v92_v10  ;;  %v93_v15 = vadd.f32 %v88_v12, %v23_v9  ;;  %v143_v16 = vpop.f32.mrb[3].mxu0 }
  0xe1   :  { %96 = vst.msk [vmem:[#allocation2 + $0x8] sm:$0xff] %vm19_vm0, %v93_v15 }
  0xe6   :  { %v100_v18 = vld [vmem:[#allocation2] sm:$0xff] }
  0xe7   :  { %v108_v19 = vadd.f32 %v107_v17, %v100_v18 }
  0xe8   :  { %v101_v20 = vld [vmem:[#allocation2 + $0x8] sm:$0xff] }
  0xe9   :  { %v131_v21 = vpack.c.bf16 %v108_v19, %v108_v19  ;;  %v109_v22 = vadd.f32 %v107_v17, %v101_v20 }
  0xeb   :  { %119 = vst.msk [vmem:[%s196_s3] sm:$0xf] %vm118_vm3, %v131_v21  ;;  %v132_v23 = vpack.c.bf16 %v109_v22, %v109_v22 }
  0xed   :  { %120 = vst.msk [vmem:[%s196_s3 + $0x4] sm:$0xf] %vm118_vm3, %v132_v23 }

// kernel: transformer_forward.36
= control target key start
LH: loop header
LB: loop body
LE: loop exit
PB: predicated region body
PF: predicated region fallthrough
CT: control target
= control target key end

     0   :  { %vm19_vm0 = vcmask 261120   ;;  %v148_v0 = vmov 0.0   ;;  %vm149_vm1 = vmmov 0   ;;  %v103_v4 = vlaneseq  ;;  %s193_s1 = inlined_call_operand.vmem [shape: bf16[32,32], index: 1, kind: input, shape index: {}]   ;;  %s194_s0 = inlined_call_operand.vmem [shape: bf16[16,32], index: 0, kind: input, shape index: {}]   ;;  %s195_s2 = inlined_call_operand.vmem [shape: bf16[1,32], index: 2, kind: input, shape index: {}]   ;;  %s196_s3 = inlined_call_operand.vmem [shape: bf16[16,32], index: 3, kind: output, shape index: {}]  }
   0x1   :  { %135 = vmatprep.subr.bf16.mxu0 %v148_v0  ;;  %v145_v1 = vld [vmem:[%s193_s1] sm:$0xff]   ;;  %139 = vmatprep.mubr.msk.bf16.mxu0 %vm149_vm1, %v148_v0  ;;  %20 = vst.msk [vmem:[#allocation2] sm:$0xff] %vm19_vm0, %v148_v0  ;;  %21 = vst.msk [vmem:[#allocation2 + $0x8] sm:$0xff] %vm19_vm0, %v148_v0  ;;  %v146_v2 = vld [vmem:[%s193_s1 + $0x8] sm:$0xff]   ;;  %vm117_vm2 = vcmask 257024  }
   0x2   :  { %136 = vmatpush3.bf16.msra.mxu0 %v145_v1  ;;  %v147_v3 = vld [vmem:[%s194_s0] sm:$0xff]   ;;  %v104_v6 = vshrl.u32 %v103_v4, 7 }
   0x3   :  { %137 = vmatprep.subr.bf16.mxu0 %v148_v0  ;;  %v101_v8 = vld [vmem:[%s195_s2] sm:$0x1] }
   0x4   :  { %v102_v13 = vunpack.c.l.bf16 %v101_v8  ;;  %v105_v14 = vsub.s32 0, %v104_v6 }
   0x6   :  { %138 = vmatpush3.bf16.msra.mxu0 %v146_v2  ;;  %v106_v17 = vrot.slane %v102_v13, %v105_v14 }
   0x8   :  { %v22_v5 = vld [vmem:[#allocation2] sm:$0xff]  ;;  %v23_v9 = vld [vmem:[#allocation2 + $0x8] sm:$0xff] }
   0x9   :  { %140 = vmatmul.mubr.msk.bf16.vlgmr.msra.gmra.mrb[0].mxu0 %vm19_vm0, %v147_v3 }
  0xdc   :  { %v85_v7 = vpop.f32.mrb[0].mxu0 }
  0xdd   :  { %v92_v10 = vadd.f32 %v85_v7, %v22_v5  ;;  %v141_v11 = vpop.f32.mrb[1].mxu0 }
  0xde   :  { %v88_v12 = vpop.f32.mrb[2].mxu0 }
  0xdf   :  { %94 = vst.msk [vmem:[#allocation2] sm:$0xff] %vm19_vm0, %v92_v10  ;;  %v93_v15 = vadd.f32 %v88_v12, %v23_v9  ;;  %v142_v16 = vpop.f32.mrb[3].mxu0 }
  0xe1   :  { %95 = vst.msk [vmem:[#allocation2 + $0x8] sm:$0xff] %vm19_vm0, %v93_v15 }
  0xe6   :  { %v99_v18 = vld [vmem:[#allocation2] sm:$0xff] }
  0xe7   :  { %v107_v19 = vadd.f32 %v106_v17, %v99_v18 }
  0xe8   :  { %v100_v20 = vld [vmem:[#allocation2 + $0x8] sm:$0xff] }
  0xe9   :  { %v130_v21 = vpack.c.bf16 %v107_v19, %v107_v19  ;;  %v108_v22 = vadd.f32 %v106_v17, %v100_v20 }
  0xeb   :  { %118 = vst.msk [vmem:[%s196_s3] sm:$0xf] %vm117_vm2, %v130_v21  ;;  %v131_v23 = vpack.c.bf16 %v108_v22, %v108_v22 }
  0xed   :  { %119 = vst.msk [vmem:[%s196_s3 + $0x4] sm:$0xf] %vm117_vm2, %v131_v23 }

// kernel: transformer_forward.49
= control target key start
LH: loop header
LB: loop body
LE: loop exit
PB: predicated region body
PF: predicated region fallthrough
CT: control target
= control target key end

     0   :  { %v205_v1 = vmov 0.0   ;;  %vm206_vm0 = vmmov 0   ;;  %vm20_vm1 = vcmask 261120   ;;  %s265_s0 = inlined_call_operand.vmem [shape: bf16[16,32], index: 0, kind: input, shape index: {}]   ;;  %s266_s1 = inlined_call_operand.vmem [shape: bf16[32,32], index: 1, kind: input, shape index: {}]   ;;  %s267_s2 = inlined_call_operand.vmem [shape: bf16[1,32], index: 2, kind: input, shape index: {}]   ;;  %s268_s3 = inlined_call_operand.hbm [shape: f32[16,32], index: 3, kind: output, shape index: {}]  }
   0x1   :  { %v170_v0 = vld [vmem:[%s266_s1] sm:$0xff]   ;;  %157 = vmatprep.subr.bf16.mxu0 %v205_v1  ;;  %v171_v2 = vld [vmem:[%s266_s1 + $0x8] sm:$0xff]   ;;  %161 = vmatprep.mubr.msk.bf16.mxu0 %vm206_vm0, %v205_v1  ;;  %21 = vst.msk [vmem:[#allocation2] sm:$0xff] %vm20_vm1, %v205_v1  ;;  %22 = vst.msk [vmem:[#allocation2 + $0x8] sm:$0xff] %vm20_vm1, %v205_v1 }
   0x2   :  { %158 = vmatpush3.bf16.msra.mxu0 %v170_v0 }
   0x3   :  { %159 = vmatprep.subr.bf16.mxu0 %v205_v1 }
   0x4   :  { %8 = vsyncpa [#allocation4], 0  ;;  %v172_v3 = vld [vmem:[%s265_s0] sm:$0xff]   ;;  %v104_v4 = vlaneseq  ;;  %s207_s0 = smov [#allocation3]  }
   0x5   :  { %v102_v9 = vld [vmem:[%s267_s2] sm:$0x1]  ;;  %s139_s2 = sshll.u32 %s207_s0, 4  ;;  %s140_s2 = int_to_ptr.vmem [resolvable:$true] %s139_s2 }
   0x6   :  { %160 = vmatpush3.bf16.msra.mxu0 %v171_v2  ;;  %v105_v6 = vshrl.u32 %v104_v4, 7  ;;  %v103_v15 = vunpack.c.l.bf16 %v102_v9  ;;  %s181_s19 = scalar_lea.vmem %s140_s2, 256  ;;  %p186_p1 = scmp.lt.s32.totalorder %s140_s2, %s140_s2 }
   0x7   :  { %p182_p0 = scmp.ne.s32.totalorder %s140_s2, %s181_s19  ;;  %p187_p2 = scmp.lt.s32.totalorder %s181_s19, %s181_s19 }
   0x8   :  { %v23_v5 = vld [vmem:[#allocation2] sm:$0xff]  ;;  %v24_v8 = vld [vmem:[#allocation2 + $0x8] sm:$0xff]  ;;  %v106_v16 = vsub.s32 0, %v105_v6 }
   0x9   :  { %162 = vmatmul.mubr.msk.bf16.vlgmr.msra.gmra.mrb[0].mxu0 %vm20_vm1, %v172_v3  ;;  %p188_p3 = por %p187_p2, %p186_p1 }
   0xa   :  { %v107_v17 = vrot.slane %v103_v15, %v106_v16 }
   0xb   :  { %p189_p4 = pnand %p188_p3, %p182_p0 }
  0xdc   :  { %v86_v7 = vpop.f32.mrb[0].mxu0 }
  0xdd   :  { %v93_v10 = vadd.f32 %v86_v7, %v23_v5  ;;  %v163_v11 = vpop.f32.mrb[1].mxu0 }
  0xde   :  { %v89_v12 = vpop.f32.mrb[2].mxu0 }
  0xdf   :  { %95 = vst.msk [vmem:[#allocation2] sm:$0xff] %vm20_vm1, %v93_v10  ;;  %v94_v13 = vadd.f32 %v89_v12, %v24_v8  ;;  %v164_v14 = vpop.f32.mrb[3].mxu0 }
  0xe1   :  { %96 = vst.msk [vmem:[#allocation2 + $0x8] sm:$0xff] %vm20_vm1, %v94_v13 }
  0xe6   :  { %v100_v18 = vld [vmem:[#allocation2] sm:$0xff] }
  0xe7   :  { %v108_v19 = vadd.f32 %v107_v17, %v100_v18 }
  0xe8   :  { %v101_v20 = vld [vmem:[#allocation2 + $0x8] sm:$0xff] }
  0xe9   :  { %v110_v21 = vsel %vm20_vm1, %v108_v19, -inf  ;;  %v109_v22 = vadd.f32 %v107_v17, %v101_v20 }
  0xea   :  { %111 = vmax.xlane.f32.xlu0 %v110_v21 }
  0xeb   :  { %v113_v23 = vsel %vm20_vm1, %v109_v22, -inf }
  0xee   :  { %114 = vmax.xlane.f32.xlu0 %v113_v23 }
 0x177   :  { %v112_v24 = vpop.xlane.xlu0 %111 }
 0x178   :  { %v116_v25 = vsub.f32 %v108_v19, %v112_v24 }
 0x17a   :  { %v118_v26 = vmul.f32 1.442695, %v116_v25 }
 0x17b   :  { %v115_v27 = vpop.xlane.xlu0 %114 }
 0x17c   :  { %173 = vpow2.f32 %v118_v26  ;;  %v117_v28 = vsub.f32 %v109_v22, %v115_v27 }
 0x17e   :  { %v120_v29 = vmul.f32 1.442695, %v117_v28 }
 0x180   :  { %175 = vpow2.f32 %v120_v29 }
 0x186   :  { %v174_v30 = vpop.eup %173 }
 0x187   :  { %v122_v31 = vsel %vm20_vm1, %v174_v30, 0.0 }
 0x188   :  { %123 = vadd.xlane.f32.xlu1 %v122_v31 }
 0x18a   :  { %v176_v32 = vpop.eup %175 }
 0x18b   :  { %v125_v33 = vsel %vm20_vm1, %v176_v32, 0.0 }
 0x18c   :  { %126 = vadd.xlane.f32.xlu1 %v125_v33 }
 0x215   :  { %v124_v34 = vpop.xlane.xlu1 %123 }
 0x216   :  { %177 = vrcp.f32 %v124_v34 }
 0x219   :  { %v127_v35 = vpop.xlane.xlu1 %126 }
 0x21a   :  { %179 = vrcp.f32 %v127_v35 }
 0x220   :  { %v178_v36 = vpop.eup %177 }
 0x221   :  { %v130_v37 = vmul.f32 %v178_v36, %v174_v30 }
 0x223   :  { %132 = vst.msk [vmem:[#allocation3] sm:$0xff] %vm20_vm1, %v130_v37 }
 0x224   :  { %v180_v38 = vpop.eup %179 }
 0x225   :  { %v131_v39 = vmul.f32 %v180_v38, %v176_v32 }
 0x227   :  { %133 = vst.msk [vmem:[#allocation3 + $0x8] sm:$0xff] %vm20_vm1, %v131_v39 }
 0x228   :  { %192 = shalt.err (!%p189_p4)
}
 0x229   :  { %s193_s22 = scalar_lea.hbm %s268_s3, 256 }
 0x22a   :  { %p194_p5 = scmp.ne.s32.totalorder %s268_s3, %s193_s22  ;;  %p197_p6 = scmp.lt.u32.totalorder %s193_s22, %s268_s3 }
 0x22c   :  { %p199_p7 = pnand %p197_p6, %p194_p5 }
 0x22e   :  { %202 = shalt.err (!%p199_p7)
}
 0x22f   :  { %s208_s27 = smov 128   ;;  %s209_s28 = smov 8  }
 0x230   :  { %145 = dma.vmem_to_hbm [thread:$0]  %s140_s2, 256, %s268_s3, [#allocation4], %s208_s27, %s208_s27, %s209_s28  }
 0x231   :  { %203 = dma.done.wait [#allocation4], 256  }
 0x232   :  { %204 = vsyncadd [#allocation4], 4294967040 }
 0x233   :  { %149 = vsyncpa [#allocation4], 1 }

// kernel: transformer_forward.34
= control target key start
LH: loop header
LB: loop body
LE: loop exit
PB: predicated region body
PF: predicated region fallthrough
CT: control target
= control target key end

     0   :  { %s1532_s12 = smov 0   ;;  %s1715_s0 = inlined_call_operand.vmem [shape: bf16[2,8,32], index: 0, kind: input, shape index: {}]   ;;  %s1716_s1 = inlined_call_operand.vmem [shape: bf16[2,8,32], index: 1, kind: input, shape index: {}]   ;;  %s1717_s2 = inlined_call_operand.vmem [shape: bf16[2,8,32], index: 2, kind: input, shape index: {}]   ;;  %s1718_s3 = inlined_call_operand.vmem [shape: bf16[2,8,32], index: 3, kind: output, shape index: {}]  }
   0x1 LB: > { %s1255_s13 = sadd.s32 4294967295, %s1493_s12   ;;  %p1259_p0 = scmp.ge.s32.totalorder %s1493_s12, 1  ;;  %s1493_s12 = sphi %s1532_s12, %s13_s12  }
   0x2   : > { %p154_p1 = scmp.lt.s32.totalorder %s1493_s12, 3 }
   0x4   : > { %p155_p2 = pnand %p1259_p0, %p154_p1 }
   0x5   : > { %p184_p3 = scmp.lt.s32.totalorder (!%p155_p2), %s1255_s13, 1  ;;  %v1495_v0 = vmov (!%p155_p2), 0.0   ;;  %vm1496_vm0 = vmmov (!%p155_p2), 0   ;;  %vm210_vm1 = vcmask (!%p155_p2), 31744   ;;  %v204_v4 = vlaneseq (!%p155_p2)  ;;  %s1498_s21 = smov (!%p155_p2), 124  }
   0x6   : > { %158 = sbr.rel (%p155_p2) target bundleno = 1512 (0x5e8), region = 32  ;;  %1331 = vmatprep.subr.bf16.mxu0 (!%p155_p2), %v1495_v0  ;;  %1333 = vmatprep.mubr.msk.bf16.mxu0 (!%p155_p2), %vm1496_vm0, %v1495_v0  ;;  %v1497_v8 = vmov (!%p155_p2), -1e+30   ;;  %vm259_vm3 = vcmask (!%p155_p2), 64512   ;;  %s1499_s22 = smov (!%p155_p2), 120   ;;  %vm275_vm4 = vcmask (!%p155_p2), 1043456  }
   0x7   : > { %1337 = vmatprep.subr.bf16.mxu1 (!%p155_p2), %v1495_v0  ;;  %1339 = vmatprep.mubr.msk.bf16.mxu1 (!%p155_p2), %vm1496_vm0, %v1495_v0  ;;  %v205_v5 = vshrl.u32 (!%p155_p2), %v204_v4, 7  ;;  %v207_v6 = vand.u32 (!%p155_p2), 127, %v204_v4  ;;  %s1500_s23 = smov (!%p155_p2), 116   ;;  %s1501_s24 = smov (!%p155_p2), 112   ;;  %vm320_vm5 = vcmask (!%p155_p2), 27648   ;;  %vm450_vm6 = vcmask (!%p155_p2), 60448  }
   0x8   : > { %s1502_s25 = smov (!%p155_p2), 108   ;;  %s1503_s26 = smov (!%p155_p2), 104   ;;  %vm571_vm7 = vcmask (!%p155_p2), 93248   ;;  %vm692_vm8 = vcmask (!%p155_p2), 126048   ;;  %vm813_vm9 = vcmask (!%p155_p2), 158848   ;;  %vm934_vm10 = vcmask (!%p155_p2), 191648  }
   0x9   : > { %vm208_vm2 = vcmp.le.s32.totalorder (!%p155_p2), %v207_v6, %v205_v5  ;;  %s1504_s27 = smov (!%p155_p2), 100   ;;  %s1505_s7 = smov (!%p155_p2), 4   ;;  %vm1055_vm11 = vcmask (!%p155_p2), 224448   ;;  %vm1176_vm12 = vcmask (!%p155_p2), 257248  }
   0xa   : > { %v1561_v9 = vsel (!%p155_p2), %vm208_vm2, 0.0, %v1497_v8  ;;  %s1506_s8 = smov (!%p155_p2), 8   ;;  %s1507_s9 = smov (!%p155_p2), 12  }
   0xb   : > { %s1508_s10 = smov (!%p155_p2), 16   ;;  %s1509_s11 = smov (!%p155_p2), 20  }
   0xd   : > { %s1720_s13 = smov (!%p184_p3, %s1255_s13), 1 }
   0xe   : > { %s1546_s14 = sshll.u32 %s1720_s13, 2  ;;  %s1510_s13 = smov 24  }
   0xf   : > { %s191_s17 = scalar_lea.vmem %s1716_s1, %s1546_s14  ;;  %s187_s20 = scalar_lea.vmem %s1715_s0, %s1546_s14 }
  0x10   : > { %v202_v1 = vld [vmem:[%s191_s17] sm:$0xf]  ;;  %s195_s30 = scalar_lea.vmem %s1717_s2, %s1546_s14  ;;  %s1628_s6 = scalar_lea.vmem %s1718_s3, %s1546_s14 }
  0x11   : > { %v215_v2 = vsel %vm210_vm1, %v202_v1, 0  ;;  %v201_v3 = vld [vmem:[%s187_s20] sm:$0xf]  ;;  %v1267_v16 = vcombine.low %v202_v1, %v202_v1  ;;  %s1511_s14 = smov 28  }
  0x12   : > { %1332 = vmatpush3.bf16.xpose.msra.mxu0 %v215_v2  ;;  %v1266_v17 = vcombine.low %v201_v3, %v201_v3  ;;  %v1580_v23 = vld [vmem:[%s195_s30] sm:$0xf] }
  0x13   : > { %1349 = vmatprep.subr.bf16.mxu0 %v1495_v0  ;;  %330 = vrot.lane.b32.xlu1 %v1267_v16, %s1498_s21  ;;  %v277_v24 = vsel %vm275_vm4, %v1580_v23, 0 }
  0x14   : > { %1338 = vmatpush3.bf16.msra.mxu1 %v277_v24 }
  0x15   : > { %1343 = vmatprep.subr.bf16.mxu1 %v1495_v0 }
  0x17   : > { %325 = vrot.lane.b32.xlu1 %v1266_v17, %s1498_s21 }
  0x19   : > { %1334 = vmatmul.mubr.msk.bf16.vlgmr.msra.gmra.mrb[0].mxu0 %vm210_vm1, %v201_v3 }
  0x1a   : > { %1351 = vmatprep.mubr.msk.bf16.mxu0 %vm1496_vm0, %v1495_v0 }
  0x1b   : > { %452 = vrot.lane.b32.xlu1 %v1266_v17, %s1499_s22 }
  0x1f   : > { %575 = vrot.lane.b32.xlu1 %v1267_v16, %s1500_s23 }
  0x23   : > { %573 = vrot.lane.b32.xlu1 %v1266_v17, %s1500_s23 }
  0x27   : > { %696 = vrot.lane.b32.xlu1 %v1267_v16, %s1501_s24 }
  0x2b   : > { %694 = vrot.lane.b32.xlu1 %v1266_v17, %s1501_s24 }
  0x2f   : > { %817 = vrot.lane.b32.xlu1 %v1267_v16, %s1502_s25 }
  0x33   : > { %938 = vrot.lane.b32.xlu1 %v1267_v16, %s1503_s26 }
  0x37   : > { %1059 = vrot.lane.b32.xlu1 %v1267_v16, %s1504_s27 }
  0x85   : > { %v331_v26 = vpop.permute.xlu1 %330 }
  0x86   : > { %v336_v31 = vsel %vm210_vm1, %v331_v26, 0 }
  0x89   : > { %v326_v27 = vpop.permute.xlu1 %325 }
  0x8d   : > { %v453_v30 = vpop.permute.xlu1 %452 }
  0x91   : > { %v576_v34 = vpop.permute.xlu1 %575 }
  0x92   : > { %v581_v37 = vsel %vm210_vm1, %v576_v34, 0 }
  0x95   : > { %v574_v36 = vpop.permute.xlu1 %573 }
  0x99   : > { %v697_v38 = vpop.permute.xlu1 %696 }
  0x9a   : > { %v702_v40 = vsel %vm210_vm1, %v697_v38, 0 }
  0x9d   : > { %v695_v39 = vpop.permute.xlu1 %694 }
  0xa1   : > { %v818_v41 = vpop.permute.xlu1 %817 }
  0xa2   : > { %v823_v42 = vsel %vm210_vm1, %v818_v41, 0 }
  0xa5   : > { %v939_v43 = vpop.permute.xlu1 %938 }
  0xa6   : > { %v944_v45 = vsel %vm210_vm1, %v939_v43, 0  ;;  %v1269_v43 = vcombine.low %v1580_v23, %v1580_v23 }
  0xa9   : > { %v1060_v46 = vpop.permute.xlu1 %1059 }
  0xaa   : > { %v1065_v48 = vsel %vm210_vm1, %v1060_v46, 0 }
  0xec   : > { %v251_v7 = vpop.f32.mrb[0].mxu0 }
  0xed   : > { %v257_v10 = vmul.f32 0.5, %v251_v7  ;;  %v1335_v11 = vpop.f32.mrb[1].mxu0 }
  0xee   : > { %v254_v12 = vpop.f32.mrb[2].mxu0 }
  0xef   : > { %v1336_v13 = vpop.f32.mrb[3].mxu0  ;;  %v258_v14 = vadd.f32 %v257_v10, %v1561_v9 }
  0xf1   : > { %v260_v15 = vsel %vm259_vm3, %v258_v14, -inf }
  0xf2   : > { %261 = vmax.xlane.f32.xlu0 %v260_v15 }
 0x17f   : > { %v262_v18 = vpop.xlane.xlu0 %261 }
 0x180   : > { %v263_v19 = vsub.f32 %v258_v14, %v262_v18 }
 0x182   : > { %v264_v20 = vmul.f32 1.442695, %v263_v19 }
 0x184   : > { %1455 = vpow2.f32 %v264_v20 }
 0x18e   : > { %v1456_v21 = vpop.eup %1455 }
 0x18f   : > { %v266_v22 = vsel %vm259_vm3, %v1456_v21, 0.0 }
 0x190   : > { %267 = vadd.xlane.f32.xlu0 %v266_v22 }
 0x1a6   : > { %454 = vrot.lane.b32.xlu0 %v1267_v16, %s1499_s22 }
 0x1aa   : > { %815 = vrot.lane.b32.xlu0 %v1266_v17, %s1502_s25 }
 0x1ae   : > { %936 = vrot.lane.b32.xlu0 %v1266_v17, %s1503_s26 }
 0x1b2   : > { %1057 = vrot.lane.b32.xlu0 %v1266_v17, %s1504_s27 }
 0x21d   : > { %v268_v25 = vpop.xlane.xlu0 %267 }
 0x21e   : > { %1457 = vrcp.f32 %v268_v25 }
 0x221   : > { %v455_v33 = vpop.permute.xlu0 %454 }
 0x222   : > { %v460_v35 = vsel %vm210_vm1, %v455_v33, 0 }
 0x225   : > { %v816_v44 = vpop.permute.xlu0 %815 }
 0x228   : > { %v1458_v28 = vpop.eup %1457 }
 0x229   : > { %v270_v29 = vmul.f32 %v1458_v28, %v1456_v21  ;;  %v937_v47 = vpop.permute.xlu0 %936 }
 0x22b   : > { %v271_v32 = vpack.c.bf16 %v270_v29, %v270_v29 }
 0x22d   : > { %1340 = vmatmul.mubr.msk.bf16.vlgmr.msra.gmra.mrb[0].mxu1 %vm259_vm3, %v271_v32  ;;  %v1058_v49 = vpop.permute.xlu0 %1057 }
 0x22e   : > { %1344 = vmatpush3.bf16.xpose.msra.mxu1 %v336_v31  ;;  %1345 = vmatprep.mubr.msk.bf16.mxu1 %vm1496_vm0, %v1495_v0 }
 0x22f   : > { %1355 = vmatprep.subr.bf16.mxu1 %v1495_v0 }
 0x235   : > { %1346 = vmatmul.mubr.msk.bf16.vlgmr.msra.gmra.mrb[4].mxu1 %vm210_vm1, %v326_v27 }
 0x236   : > { %1356 = vmatpush3.bf16.xpose.msra.mxu1 %v460_v35  ;;  %1357 = vmatprep.mubr.msk.bf16.mxu1 %vm1496_vm0, %v1495_v0 }
 0x237   : > { %1367 = vmatprep.subr.bf16.mxu1 %v1495_v0 }
 0x23d   : > { %1358 = vmatmul.mubr.msk.bf16.vlgmr.msra.gmra.mrb[8].mxu1 %vm210_vm1, %v453_v30 }
 0x23e   : > { %1368 = vmatpush3.bf16.xpose.msra.mxu1 %v581_v37  ;;  %1369 = vmatprep.mubr.msk.bf16.mxu1 %vm1496_vm0, %v1495_v0 }
 0x23f   : > { %1379 = vmatprep.subr.bf16.mxu1 %v1495_v0 }
 0x245   : > { %1370 = vmatmul.mubr.msk.bf16.vlgmr.msra.gmra.mrb[12].mxu1 %vm210_vm1, %v574_v36 }
 0x246   : > { %1380 = vmatpush3.bf16.xpose.msra.mxu1 %v702_v40  ;;  %1381 = vmatprep.mubr.msk.bf16.mxu1 %vm1496_vm0, %v1495_v0 }
 0x247   : > { %1391 = vmatprep.subr.bf16.mxu1 %v1495_v0 }
 0x24d   : > { %1382 = vmatmul.mubr.msk.bf16.vlgmr.msra.gmra.mrb[16].mxu1 %vm210_vm1, %v695_v39 }
 0x24e   : > { %1392 = vmatpush3.bf16.xpose.msra.mxu1 %v823_v42  ;;  %1393 = vmatprep.mubr.msk.bf16.mxu1 %vm1496_vm0, %v1495_v0 }
 0x24f   : > { %1403 = vmatprep.subr.bf16.mxu1 %v1495_v0 }
 0x255   : > { %1394 = vmatmul.mubr.msk.bf16.vlgmr.msra.gmra.mrb[20].mxu1 %vm210_vm1, %v816_v44 }
 0x256   : > { %1404 = vmatpush3.bf16.xpose.msra.mxu1 %v944_v45  ;;  %1405 = vmatprep.mubr.msk.bf16.mxu1 %vm1496_vm0, %v1495_v0 }
 0x257   : > { %1415 = vmatprep.subr.bf16.mxu1 %v1495_v0 }
 0x25d   : > { %1406 = vmatmul.mubr.msk.bf16.vlgmr.msra.gmra.mrb[24].mxu1 %vm210_vm1, %v937_v47 }
 0x25e   : > { %1416 = vmatpush3.bf16.xpose.msra.mxu1 %v1065_v48  ;;  %1417 = vmatprep.mubr.msk.bf16.mxu1 %vm1496_vm0, %v1495_v0 }
 0x265   : > { %1418 = vmatmul.mubr.msk.bf16.vlgmr.msra.gmra.mrb[28].mxu1 %vm210_vm1, %v1058_v49 }
 0x300   : > { %v313_v50 = vpop.f32.mrb[0].mxu1 }
 0x301   : > { %v319_v51 = vpack.c.bf16 %v313_v50, %v313_v50  ;;  %v1341_v52 = vpop.f32.mrb[1].mxu1 }
 0x302   : > { %v316_v53 = vpop.f32.mrb[2].mxu1 }
 0x303   : > { %321 = vst.msk [vmem:[%s1628_s6] sm:$0xf] %vm320_vm5, %v319_v51  ;;  %v1342_v54 = vpop.f32.mrb[3].mxu1 }
 0x308   : > { %v372_v55 = vpop.f32.mrb[4].mxu1 }
 0x309   : > { %v378_v56 = vmul.f32 0.5, %v372_v55  ;;  %v1347_v57 = vpop.f32.mrb[5].mxu1 }
 0x30a   : > { %v375_v58 = vpop.f32.mrb[6].mxu1 }
 0x30b   : > { %v1348_v59 = vpop.f32.mrb[7].mxu1  ;;  %v379_v60 = vadd.f32 %v378_v56, %v1561_v9 }
 0x30d   : > { %v380_v61 = vsel %vm259_vm3, %v379_v60, -inf }
 0x30e   : > { %381 = vmax.xlane.f32.xlu1 %v380_v61 }
 0x310   : > { %v496_v62 = vpop.f32.mrb[8].mxu1 }
 0x311   : > { %v502_v63 = vmul.f32 0.5, %v496_v62  ;;  %v1359_v1 = vpop.f32.mrb[9].mxu1 }
 0x312   : > { %v499_v2 = vpop.f32.mrb[10].mxu1 }
 0x313   : > { %v1360_v3 = vpop.f32.mrb[11].mxu1  ;;  %v503_v4 = vadd.f32 %v502_v63, %v1561_v9 }
 0x315   : > { %v504_v5 = vsel %vm259_vm3, %v503_v4, -inf }
 0x316   : > { %505 = vmax.xlane.f32.xlu0 %v504_v5 }
 0x318   : > { %v617_v6 = vpop.f32.mrb[12].mxu1 }
 0x319   : > { %v623_v7 = vmul.f32 0.5, %v617_v6  ;;  %v1371_v8 = vpop.f32.mrb[13].mxu1 }
 0x31a   : > { %v620_v10 = vpop.f32.mrb[14].mxu1 }
 0x31b   : > { %v624_v11 = vadd.f32 %v623_v7, %v1561_v9  ;;  %v1372_v12 = vpop.f32.mrb[15].mxu1 }
 0x31d   : > { %v625_v13 = vsel %vm259_vm3, %v624_v11, -inf }
 0x31e   : > { %626 = vmax.xlane.f32.xlu0 %v625_v13 }
 0x320   : > { %v738_v14 = vpop.f32.mrb[16].mxu1 }
 0x321   : > { %v744_v15 = vmul.f32 0.5, %v738_v14  ;;  %v1383_v16 = vpop.f32.mrb[17].mxu1 }
 0x322   : > { %v741_v17 = vpop.f32.mrb[18].mxu1 }
 0x323   : > { %v745_v18 = vadd.f32 %v744_v15, %v1561_v9  ;;  %v1384_v19 = vpop.f32.mrb[19].mxu1 }
 0x325   : > { %v746_v20 = vsel %vm259_vm3, %v745_v18, -inf }
 0x326   : > { %747 = vmax.xlane.f32.xlu1 %v746_v20 }
 0x328   : > { %v859_v21 = vpop.f32.mrb[20].mxu1 }
 0x329   : > { %v865_v22 = vmul.f32 0.5, %v859_v21  ;;  %v1395_v24 = vpop.f32.mrb[21].mxu1 }
 0x32a   : > { %v862_v25 = vpop.f32.mrb[22].mxu1 }
 0x32b   : > { %v866_v26 = vadd.f32 %v865_v22, %v1561_v9  ;;  %v1396_v27 = vpop.f32.mrb[23].mxu1 }
 0x32d   : > { %v867_v28 = vsel %vm259_vm3, %v866_v26, -inf }
 0x32e   : > { %868 = vmax.xlane.f32.xlu0 %v867_v28 }
 0x330   : > { %v980_v29 = vpop.f32.mrb[24].mxu1 }
 0x331   : > { %v986_v30 = vmul.f32 0.5, %v980_v29  ;;  %v1407_v31 = vpop.f32.mrb[25].mxu1 }
 0x332   : > { %v983_v32 = vpop.f32.mrb[26].mxu1 }
 0x333   : > { %v987_v33 = vadd.f32 %v986_v30, %v1561_v9  ;;  %v1408_v34 = vpop.f32.mrb[27].mxu1 }
 0x335   : > { %v988_v35 = vsel %vm259_vm3, %v987_v33, -inf }
 0x336   : > { %989 = vmax.xlane.f32.xlu1 %v988_v35 }
 0x338   : > { %v1101_v36 = vpop.f32.mrb[28].mxu1 }
 0x339   : > { %v1107_v37 = vmul.f32 0.5, %v1101_v36  ;;  %v1419_v38 = vpop.f32.mrb[29].mxu1 }
 0x33a   : > { %v1104_v39 = vpop.f32.mrb[30].mxu1 }
 0x33b   : > { %v1108_v40 = vadd.f32 %v1107_v37, %v1561_v9  ;;  %v1420_v41 = vpop.f32.mrb[31].mxu1 }
 0x33d   : > { %v1109_v42 = vsel %vm259_vm3, %v1108_v40, -inf }
 0x33e   : > { %1110 = vmax.xlane.f32.xlu0 %v1109_v42 }
 0x347   : > { %395 = vrot.lane.b32.xlu1 %v1269_v43, %s1498_s21 }
 0x354   : > { %516 = vrot.lane.b32.xlu0 %v1269_v43, %s1499_s22 }
 0x39b   : > { %v382_v44 = vpop.xlane.xlu1 %381 }
 0x39c   : > { %v383_v45 = vsub.f32 %v379_v60, %v382_v44 }
 0x39e   : > { %v384_v46 = vmul.f32 1.442695, %v383_v45 }
 0x3a0   : > { %1459 = vpow2.f32 %v384_v46 }
 0x3a3   : > { %v506_v47 = vpop.xlane.xlu0 %505 }
 0x3a4   : > { %v507_v48 = vsub.f32 %v503_v4, %v506_v47 }
 0x3a6   : > { %v508_v49 = vmul.f32 1.442695, %v507_v48 }
 0x3a8   : > { %1461 = vpow2.f32 %v508_v49 }
 0x3aa   : > { %v1460_v9 = vpop.eup %1459 }
 0x3ab   : > { %v627_v50 = vpop.xlane.xlu0 %626  ;;  %v386_v51 = vsel %vm259_vm3, %v1460_v9, 0.0 }
 0x3ac   : > { %v628_v52 = vsub.f32 %v624_v11, %v627_v50  ;;  %387 = vadd.xlane.f32.xlu1 %v386_v51 }
 0x3ae   : > { %v629_v53 = vmul.f32 1.442695, %v628_v52 }
 0x3b0   : > { %1463 = vpow2.f32 %v629_v53 }
 0x3b2   : > { %v1462_v23 = vpop.eup %1461 }
 0x3b3   : > { %v510_v54 = vsel %vm259_vm3, %v1462_v23, 0.0  ;;  %v748_v57 = vpop.xlane.xlu1 %747 }
 0x3b4   : > { %511 = vadd.xlane.f32.xlu0 %v510_v54  ;;  %v749_v61 = vsub.f32 %v745_v18, %v748_v57 }
 0x3b6   : > { %v750_v63 = vmul.f32 1.442695, %v749_v61 }
 0x3b8   : > { %1465 = vpow2.f32 %v750_v63 }
 0x3ba   : > { %v1651_v55 = vpop.eup %1463 }
 0x3bb   : > { %v631_v56 = vsel %vm259_vm3, %v1651_v55, 0.0  ;;  %v869_v62 = vpop.xlane.xlu0 %868 }
 0x3bc   : > { %632 = vadd.xlane.f32.xlu1 %v631_v56  ;;  %v870_v1 = vsub.f32 %v866_v26, %v869_v62 }
 0x3be   : > { %v871_v4 = vmul.f32 1.442695, %v870_v1 }
 0x3c0   : > { %1467 = vpow2.f32 %v871_v4 }
 0x3c2   : > { %v1466_v8 = vpop.eup %1465 }
 0x3c3   : > { %v990_v58 = vpop.xlane.xlu1 %989  ;;  %v752_v10 = vsel %vm259_vm3, %v1466_v8, 0.0 }
 0x3c4   : > { %v991_v3 = vsub.f32 %v987_v33, %v990_v58 }
 0x3c6   : > { %v992_v6 = vmul.f32 1.442695, %v991_v3 }
 0x3c7   : > { %v396_v59 = vpop.permute.xlu1 %395 }
 0x3c8   : > { %v401_v60 = vsel %vm275_vm4, %v396_v59, 0  ;;  %1469 = vpow2.f32 %v992_v6 }
 0x3c9   : > { %1350 = vmatpush3.bf16.msra.mxu0 %v401_v60 }
 0x3ca   : > { %637 = vrot.lane.b32.xlu0 %v1269_v43, %s1500_s23  ;;  %1361 = vmatprep.subr.bf16.mxu0 %v1495_v0  ;;  %v1468_v11 = vpop.eup %1467 }
 0x3cb   : > { %v1111_v2 = vpop.xlane.xlu0 %1110  ;;  %v873_v13 = vsel %vm259_vm3, %v1468_v11, 0.0 }
 0x3cc   : > { %v1112_v5 = vsub.f32 %v1108_v40, %v1111_v2 }
 0x3cd   : > { %758 = vrot.lane.b32.xlu1 %v1269_v43, %s1501_s24 }
 0x3ce   : > { %v1113_v7 = vmul.f32 1.442695, %v1112_v5 }
 0x3cf   : > { %v517_v18 = vpop.permute.xlu0 %516 }
 0x3d0   : > { %1471 = vpow2.f32 %v1113_v7  ;;  %v522_v24 = vsel %vm275_vm4, %v517_v18, 0 }
 0x3d2   : > { %v1660_v12 = vpop.eup %1469 }
 0x3d3   : > { %v994_v15 = vsel %vm259_vm3, %v1660_v12, 0.0 }
 0x3da   : > { %v1663_v14 = vpop.eup %1471 }
 0x3db   : > { %v1115_v16 = vsel %vm259_vm3, %v1663_v14, 0.0 }
 0x3e9   : > { %753 = vadd.xlane.f32.xlu0 %v752_v10 }
 0x3ed   : > { %874 = vadd.xlane.f32.xlu0 %v873_v13 }
 0x3f1   : > { %995 = vadd.xlane.f32.xlu1 %v994_v15  ;;  %1116 = vadd.xlane.f32.xlu0 %v1115_v16 }
 0x402   : > { %1000 = vrot.lane.b32.xlu1 %v1269_v43, %s1503_s26 }
 0x406   : > { %1121 = vrot.lane.b32.xlu1 %v1269_v43, %s1504_s27 }
 0x407   : > { %879 = vrot.lane.b32.xlu0 %v1269_v43, %s1502_s25 }
 0x439   : > { %v388_v17 = vpop.xlane.xlu1 %387 }
 0x43a   : > { %1473 = vrcp.f32 %v388_v17 }
 0x441   : > { %v512_v19 = vpop.xlane.xlu0 %511 }
 0x442   : > { %1475 = vrcp.f32 %v512_v19 }
 0x444   : > { %v1474_v20 = vpop.eup %1473 }
 0x445   : > { %v390_v21 = vmul.f32 %v1474_v20, %v1460_v9  ;;  %v638_v28 = vpop.permute.xlu0 %637 }
 0x446   : > { %v643_v30 = vsel %vm275_vm4, %v638_v28, 0 }
 0x447   : > { %v391_v22 = vpack.c.bf16 %v390_v21, %v390_v21 }
 0x449   : > { %1352 = vmatmul.mubr.msk.bf16.vlgmr.msra.gmra.mrb[4].mxu0 %vm259_vm3, %v391_v22  ;;  %v633_v25 = vpop.xlane.xlu1 %632 }
 0x44a   : > { %1477 = vrcp.f32 %v633_v25  ;;  %1362 = vmatpush3.bf16.msra.mxu0 %v522_v24  ;;  %1363 = vmatprep.mubr.msk.bf16.mxu0 %vm1496_vm0, %v1495_v0 }
 0x44b   : > { %1373 = vmatprep.subr.bf16.mxu0 %v1495_v0 }
 0x44c   : > { %v1476_v26 = vpop.eup %1475 }
 0x44d   : > { %v514_v27 = vmul.f32 %v1476_v26, %v1462_v23  ;;  %v759_v33 = vpop.permute.xlu1 %758 }
 0x44e   : > { %v764_v35 = vsel %vm275_vm4, %v759_v33, 0 }
 0x44f   : > { %v515_v29 = vpack.c.bf16 %v514_v27, %v514_v27 }
 0x451   : > { %1364 = vmatmul.mubr.msk.bf16.vlgmr.msra.gmra.mrb[8].mxu0 %vm259_vm3, %v515_v29 }
 0x452   : > { %1374 = vmatpush3.bf16.msra.mxu0 %v643_v30  ;;  %1375 = vmatprep.mubr.msk.bf16.mxu0 %vm1496_vm0, %v1495_v0 }
 0x453   : > { %1385 = vmatprep.subr.bf16.mxu0 %v1495_v0 }
 0x454   : > { %v1478_v31 = vpop.eup %1477 }
 0x455   : > { %v635_v32 = vmul.f32 %v1478_v31, %v1651_v55 }
 0x457   : > { %v636_v34 = vpack.c.bf16 %v635_v32, %v635_v32 }
 0x459   : > { %1376 = vmatmul.mubr.msk.bf16.vlgmr.msra.gmra.mrb[12].mxu0 %vm259_vm3, %v636_v34 }
 0x45a   : > { %1386 = vmatpush3.bf16.msra.mxu0 %v764_v35  ;;  %1387 = vmatprep.mubr.msk.bf16.mxu0 %vm1496_vm0, %v1495_v0 }
 0x45b   : > { %1397 = vmatprep.subr.bf16.mxu0 %v1495_v0 }
 0x476   : > { %v754_v36 = vpop.xlane.xlu0 %753 }
 0x477   : > { %1479 = vrcp.f32 %v754_v36 }
 0x47a   : > { %v875_v37 = vpop.xlane.xlu0 %874 }
 0x47b   : > { %1481 = vrcp.f32 %v875_v37 }
 0x47e   : > { %v1117_v38 = vpop.xlane.xlu0 %1116  ;;  %v996_v39 = vpop.xlane.xlu1 %995 }
 0x47f   : > { %1483 = vrcp.f32 %v996_v39 }
 0x480   : > { %1485 = vrcp.f32 %v1117_v38 }
 0x481   : > { %v1480_v40 = vpop.eup %1479 }
 0x482   : > { %v756_v41 = vmul.f32 %v1480_v40, %v1466_v8  ;;  %v880_v42 = vpop.permute.xlu0 %879  ;;  %v1001_v47 = vpop.permute.xlu1 %1000 }
 0x483   : > { %v885_v43 = vsel %vm275_vm4, %v880_v42, 0  ;;  %v1006_v48 = vsel %vm275_vm4, %v1001_v47, 0 }
 0x484   : > { %v757_v44 = vpack.c.bf16 %v756_v41, %v756_v41 }
 0x485   : > { %v1482_v45 = vpop.eup %1481 }
 0x486   : > { %1388 = vmatmul.mubr.msk.bf16.vlgmr.msra.gmra.mrb[16].mxu0 %vm259_vm3, %v757_v44  ;;  %v877_v46 = vmul.f32 %v1482_v45, %v1468_v11  ;;  %v1122_v51 = vpop.permute.xlu1 %1121 }
 0x487   : > { %1398 = vmatpush3.bf16.msra.mxu0 %v885_v43  ;;  %1399 = vmatprep.mubr.msk.bf16.mxu0 %vm1496_vm0, %v1495_v0  ;;  %v1127_v52 = vsel %vm275_vm4, %v1122_v51, 0 }
 0x488   : > { %1409 = vmatprep.subr.bf16.mxu0 %v1495_v0  ;;  %v878_v49 = vpack.c.bf16 %v877_v46, %v877_v46 }
 0x489   : > { %v1484_v9 = vpop.eup %1483 }
 0x48a   : > { %v998_v50 = vmul.f32 %v1484_v9, %v1660_v12  ;;  %v1486_v23 = vpop.eup %1485 }
 0x48b   : > { %v1119_v54 = vmul.f32 %v1486_v23, %v1663_v14 }
 0x48c   : > { %v999_v53 = vpack.c.bf16 %v998_v50, %v998_v50 }
 0x48d   : > { %v1120_v55 = vpack.c.bf16 %v1119_v54, %v1119_v54 }
 0x48e   : > { %1400 = vmatmul.mubr.msk.bf16.vlgmr.msra.gmra.mrb[20].mxu0 %vm259_vm3, %v878_v49 }
 0x48f   : > { %1410 = vmatpush3.bf16.msra.mxu0 %v1006_v48  ;;  %1411 = vmatprep.mubr.msk.bf16.mxu0 %vm1496_vm0, %v1495_v0 }
 0x490   : > { %1421 = vmatprep.subr.bf16.mxu0 %v1495_v0 }
 0x496   : > { %1412 = vmatmul.mubr.msk.bf16.vlgmr.msra.gmra.mrb[24].mxu0 %vm259_vm3, %v999_v53 }
 0x497   : > { %1422 = vmatpush3.bf16.msra.mxu0 %v1127_v52  ;;  %1423 = vmatprep.mubr.msk.bf16.mxu0 %vm1496_vm0, %v1495_v0 }
 0x49e   : > { %1424 = vmatmul.mubr.msk.bf16.vlgmr.msra.gmra.mrb[28].mxu0 %vm259_vm3, %v1120_v55 }
 0x51c   : > { %v437_v56 = vpop.f32.mrb[4].mxu0 }
 0x51d   : > { %v1292_v57 = vpack.c.bf16 %v437_v56, %v437_v56  ;;  %v1353_v58 = vpop.f32.mrb[5].mxu0 }
 0x51e   : > { %v440_v59 = vpop.f32.mrb[6].mxu0 }
 0x51f   : > { %447 = vrot.lane.b32.xlu1 %v1292_v57, %s1505_s7  ;;  %v1354_v60 = vpop.f32.mrb[7].mxu0 }
 0x524   : > { %v558_v61 = vpop.f32.mrb[8].mxu0 }
 0x525   : > { %v1293_v62 = vpack.c.bf16 %v558_v61, %v558_v61  ;;  %v1365_v63 = vpop.f32.mrb[9].mxu0 }
 0x526   : > { %v561_v1 = vpop.f32.mrb[10].mxu0 }
 0x527   : > { %568 = vrot.lane.b32.xlu1 %v1293_v62, %s1506_s8  ;;  %v1366_v2 = vpop.f32.mrb[11].mxu0 }
 0x52c   : > { %v679_v0 = vpop.f32.mrb[12].mxu0 }
 0x52d   : > { %v1294_v3 = vpack.c.bf16 %v679_v0, %v679_v0  ;;  %v1377_v4 = vpop.f32.mrb[13].mxu0 }
 0x52e   : > { %v682_v5 = vpop.f32.mrb[14].mxu0 }
 0x52f   : > { %689 = vrot.lane.b32.xlu0 %v1294_v3, %s1507_s9  ;;  %v1378_v6 = vpop.f32.mrb[15].mxu0 }
 0x559   : > { %v800_v7 = vpop.f32.mrb[16].mxu0 }
 0x55a   : > { %v1295_v8 = vpack.c.bf16 %v800_v7, %v800_v7  ;;  %v1389_v10 = vpop.f32.mrb[17].mxu0 }
 0x55b   : > { %v803_v11 = vpop.f32.mrb[18].mxu0 }
 0x55c   : > { %810 = vrot.lane.b32.xlu1 %v1295_v8, %s1508_s10  ;;  %v1390_v12 = vpop.f32.mrb[19].mxu0 }
 0x561   : > { %v921_v13 = vpop.f32.mrb[20].mxu0 }
 0x562   : > { %v1296_v14 = vpack.c.bf16 %v921_v13, %v921_v13  ;;  %v1401_v15 = vpop.f32.mrb[21].mxu0 }
 0x563   : > { %v924_v16 = vpop.f32.mrb[22].mxu0 }
 0x564   : > { %931 = vrot.lane.b32.xlu0 %v1296_v14, %s1509_s11  ;;  %v1402_v17 = vpop.f32.mrb[23].mxu0 }
 0x569   : > { %v1042_v18 = vpop.f32.mrb[24].mxu0 }
 0x56a   : > { %v1297_v19 = vpack.c.bf16 %v1042_v18, %v1042_v18  ;;  %v1413_v20 = vpop.f32.mrb[25].mxu0 }
 0x56b   : > { %v1045_v21 = vpop.f32.mrb[26].mxu0 }
 0x56c   : > { %1052 = vrot.lane.b32.xlu1 %v1297_v19, %s1510_s13  ;;  %v1414_v22 = vpop.f32.mrb[27].mxu0 }
 0x571   : > { %v1163_v24 = vpop.f32.mrb[28].mxu0 }
 0x572   : > { %v1298_v25 = vpack.c.bf16 %v1163_v24, %v1163_v24  ;;  %v1425_v26 = vpop.f32.mrb[29].mxu0 }
 0x573   : > { %v1166_v27 = vpop.f32.mrb[30].mxu0 }
 0x574   : > { %1173 = vrot.lane.b32.xlu0 %v1298_v25, %s1511_s14  ;;  %v1426_v28 = vpop.f32.mrb[31].mxu0 }
 0x591   : > { %v448_v29 = vpop.permute.xlu1 %447 }
 0x592   : > { %451 = vst.msk [vmem:[%s1628_s6] sm:$0xf] %vm450_vm6, %v448_v29 }
 0x599   : > { %v569_v30 = vpop.permute.xlu1 %568 }
 0x59a   : > { %572 = vst.msk [vmem:[%s1628_s6] sm:$0xf] %vm571_vm7, %v569_v30 }
 0x5a1   : > { %v690_v31 = vpop.permute.xlu0 %689 }
 0x5a2   : > { %693 = vst.msk [vmem:[%s1628_s6] sm:$0xf] %vm692_vm8, %v690_v31 }
 0x5ce   : > { %v811_v32 = vpop.permute.xlu1 %810 }
 0x5cf   : > { %814 = vst.msk [vmem:[%s1628_s6] sm:$0xf] %vm813_vm9, %v811_v32 }
 0x5d6   : > { %v932_v33 = vpop.permute.xlu0 %931 }
 0x5d7   : > { %935 = vst.msk [vmem:[%s1628_s6] sm:$0xf] %vm934_vm10, %v932_v33 }
 0x5de   : > { %v1053_v34 = vpop.permute.xlu1 %1052 }
 0x5df   : > { %1056 = vst.msk [vmem:[%s1628_s6] sm:$0xf] %vm1055_vm11, %v1053_v34 }
 0x5e6   : > { %v1174_v35 = vpop.permute.xlu0 %1173 }
 0x5e7   : > { %1177 = vst.msk [vmem:[%s1628_s6] sm:$0xf] %vm1176_vm12, %v1174_v35 }
 0x5e8 PF: > { %s13_s12 = sadd.s32 1, %s1493_s12  }
 0x5e9   : > { %p10_p4 = scmp.ge.s32.totalorder %s13_s12, 4  }
 0x5eb   :  { %12 = sbr.rel (!%p10_p4) target bundleno = 1 (0x1), region = 68 }

</bundles_post_ra>
